<compile_context>
chip_gen: v6e
topology: v6e:2x2x1
jax: 0.10.0
libtpu: 0.0.40
codegen_flags: <defaults>
</compile_context>

<pallas_src>
import functools

import jax
import jax.numpy as jnp
from jax import lax
from jax.experimental import pallas as pl
from jax.experimental.pallas import tpu as pltpu

DECAY = 0.2   # module-level `decay`

_TAPS = tuple((dh, dw) for dh in (-1, 0, 1) for dw in (-1, 0, 1))


def _round_up(x, m):
    return (x + m - 1) // m * m


def _pick_chunk(npad, target=512):
    c = min(target, npad)
    while npad % c:
        c -= 128
    return c


def snn_thresh_kernel(x_ref, w_ref, b_ref, m_ref, out_ref, mem_scratch,
                      *, n_steps, width, halo, chunk, thresh):
    """One batch image: conv+BN for all steps (MXU), then the LIF recurrence (VPU).

    x_ref      : (S, C, Lf)       bf16  flat dense image rows, `halo` zeros both sides
    w_ref      : (9, Cout, C)     bf16  fused conv+BN weight, tap-major
    b_ref      : (Cout, 1)        f32   fused conv+BN bias
    m_ref      : (2, Npad)        bf16  column-wrap masks for the dw = -1 / +1 taps
    out_ref    : (S, Cout, Npad)  bf16  spikes
    mem_scratch: (S, Cout, chunk) f32   per-chunk conv+bias results for all steps
    """
    n_out = out_ref.shape[1]
    n_ch = x_ref.shape[1]
    npad = out_ref.shape[-1]

    # 9 tiny (Cout, C) weight tiles, loaded once.
    w_taps = [w_ref[k] for k in range(len(_TAPS))]

    unroll_conv = True if n_steps <= 8 else 2
    unroll_lif = True if n_steps <= 8 else 4

    for c0 in range(0, npad, chunk):          # static lane-chunk loop
        # hoisted broadcasts (never re-broadcast inside the time loops)
        bias_b = jnp.broadcast_to(b_ref[...], (n_out, chunk))
        mask_l = jnp.broadcast_to(m_ref[0:1, c0:c0 + chunk], (n_ch, chunk))
        mask_r = jnp.broadcast_to(m_ref[1:2, c0:c0 + chunk], (n_ch, chunk))

        # ---- phase 1: conv + BN for every timestep (no recurrence -> MXU pipelines) --
        def conv_step(t, carry):
            xt = x_ref[t]                                    # (C, Lf) bf16
            acc = bias_b
            for k, (dh, dw) in enumerate(_TAPS):
                off = halo + c0 + dh * width + dw            # static offset
                tap = xt[:, off:off + chunk]                 # (C, chunk) bf16
                if dw == -1:
                    tap = tap * mask_l
                elif dw == 1:
                    tap = tap * mask_r
                acc = acc + jnp.dot(w_taps[k], tap,
                                    preferred_element_type=jnp.float32)
            mem_scratch[t] = acc                             # conv + bias (== mem_this)
            return carry

        lax.fori_loop(0, n_steps, conv_step, 0, unroll=unroll_conv)

        # ---- phase 2: LIF recurrence, membrane carried in vregs ----------------------
        def lif_step(t, mem):
            mem = mem + mem_scratch[t]                       # self.mem = self.mem + mem_this
            fired = mem > thresh                             # ActFun_thresh: input.gt(v_th)
            spk = fired.astype(out_ref.dtype)                # spike (exact in bf16)
            if chunk == npad:
                out_ref[t] = spk
            else:
                out_ref[t, :, c0:c0 + chunk] = spk
            return jnp.where(fired, 0.0, mem * DECAY)        # mem * decay * (1 - spike)

        lax.fori_loop(0, n_steps, lif_step,
                      jnp.zeros((n_out, chunk), jnp.float32),   # is_first -> mem = 0
                      unroll=unroll_lif)


def snn_2d_thresh_forward(seq_input, conv_w, conv_b, bn_gamma, bn_beta,
                          bn_mean, bn_var, *, thresh=0.3, eps=1e-5):
    """Eval-mode forward over a spike sequence (conv+BN fused, fuse_conv_bn_eval
    semantics); the module is called once per timestep with is_first=True at t==0.
    Returns bf16 spikes of shape (B, S, Cout, H, W)."""
    B, S, C, H, W = seq_input.shape
    Cout, Cin, KH, KW = conv_w.shape
    assert Cin == C and KH == 3 and KW == 3     # stride=1, padding=1, dilation=1

    # ---- glue: fuse conv + BN (eval semantics) ----
    scale = bn_gamma / jnp.sqrt(bn_var + eps)
    w_fused = conv_w * scale[:, None, None, None]             # (Cout, C, 3, 3)
    b_fused = (conv_b - bn_mean) * scale + bn_beta            # (Cout,)

    # tap-major weight layout (9, Cout, C) matching the on-chip patch construction
    w_taps = jnp.transpose(w_fused, (2, 3, 0, 1)).reshape(KH * KW, Cout, C)
    w_taps = w_taps.astype(jnp.bfloat16)
    bias = b_fused.reshape(Cout, 1).astype(jnp.float32)

    # ---- glue: flat lane-dense input with a zero halo (replaces HBM im2col) ----
    N = H * W
    Npad = _round_up(N, 128)
    halo = W + 1                      # >= W+1 keeps every shifted tap read in-bounds
    Lf = Npad + 2 * halo
    x = seq_input.reshape(B, S, C, N)
    x = jnp.pad(x, ((0, 0), (0, 0), (0, 0), (halo, halo + Npad - N)))
    x = x.astype(jnp.bfloat16)        # (B, S, C, Lf)

    # column-wrap masks for the dw = -1 / +1 taps (dense rows wrap into the neighbour
    # row start; vertical out-of-range taps land in the zero halo automatically)
    col = jnp.arange(Npad, dtype=jnp.int32) % W
    masks = jnp.stack([col != 0, col != (W - 1)], axis=0).astype(jnp.bfloat16)

    chunk = _pick_chunk(Npad)

    # VMEM budget: double-buffered in/out blocks + scratch + headroom; 16 MiB floor
    # keeps default behaviour on small problems, 64 MiB cap = v7x physical VMEM.
    x_blk = S * C * Lf * 2
    out_blk = S * Cout * Npad * 2
    scr = S * Cout * chunk * 4
    need = 2 * (x_blk + out_blk) + scr + (2 << 20)
    vmem_limit = int(min(max(need, 16 << 20), 64 << 20))

    spikes = pl.pallas_call(
        functools.partial(snn_thresh_kernel, n_steps=S, width=W, halo=halo,
                          chunk=chunk, thresh=float(thresh)),
        out_shape=jax.ShapeDtypeStruct((B, S, Cout, Npad), jnp.bfloat16),
        grid_spec=pltpu.PrefetchScalarGridSpec(
            num_scalar_prefetch=0,
            grid=(B,),
            in_specs=[
                pl.BlockSpec((None, S, C, Lf), lambda b: (b, 0, 0, 0)),
                pl.BlockSpec((KH * KW, Cout, C), lambda b: (0, 0, 0)),
                pl.BlockSpec((Cout, 1), lambda b: (0, 0)),
                pl.BlockSpec((2, Npad), lambda b: (0, 0)),
            ],
            out_specs=pl.BlockSpec((None, S, Cout, Npad), lambda b: (b, 0, 0, 0)),
            scratch_shapes=[pltpu.VMEM((S, Cout, chunk), jnp.float32)],
        ),
        compiler_params=pltpu.CompilerParams(
            dimension_semantics=("parallel",),   # images carry independent LIF state
            vmem_limit_bytes=vmem_limit),
    )(x, w_taps, bias, masks)

    # only a (free) reshape back to the PyTorch layout; no S<->B transpose copy.
    # NOTE: padded lanes [N, Npad) (none at these shapes) would hold junk and are
    # sliced off here.
    if Npad != N:
        spikes = spikes[..., :N]
    return spikes.reshape(B, S, Cout, H, W)


def _reference_forward(seq_input, conv_w, conv_b, bn_gamma, bn_beta, bn_mean, bn_var,
                       *, thresh=0.3, eps=1e-5):
    """Pure-JAX reference with the same bf16 quantization of the conv inputs."""
    B, S, C, H, W = seq_input.shape
    Cout = conv_w.shape[0]
    scale = bn_gamma / jnp.sqrt(bn_var + eps)
    w_f = (conv_w * scale[:, None, None, None]).astype(jnp.bfloat16).astype(jnp.float32)
    b_f = (conv_b - bn_mean) * scale + bn_beta
    x = seq_input.astype(jnp.bfloat16).astype(jnp.float32)

    mem = jnp.zeros((B, Cout, H, W), jnp.float32)
    outs = []
    for t in range(S):
        mem_this = lax.conv_general_dilated(
            x[:, t], w_f, window_strides=(1, 1), padding=((1, 1), (1, 1)),
            dimension_numbers=("NCHW", "OIHW", "NCHW"))
        mem_this = mem_this + b_f[None, :, None, None]
        mem = mem + mem_this
        spike = (mem > thresh).astype(jnp.float32)
        outs.append(spike)
        mem = mem * DECAY * (1.0 - spike)
    return jnp.stack(outs, axis=1)            # (B, S, Cout, H, W)


if __name__ == "__main__":
    key = jax.random.PRNGKey(0)
    B, S, C, H, W = 2, 8, 4, 16, 16
    Cout = 4

    k_in, k_w, k_b = jax.random.split(key, 3)
    seq_input = jax.random.normal(k_in, (B, S, C, H, W), jnp.float32)

    fan_in = C * 3 * 3
    bound = float(1.0 / (fan_in ** 0.5))
    conv_w = jax.random.uniform(k_w, (Cout, C, 3, 3), jnp.float32, -bound, bound)
    conv_b = jax.random.uniform(k_b, (Cout,), jnp.float32, -bound, bound)

    # BatchNorm2d default init (eval-mode running stats)
    bn_gamma = jnp.ones((Cout,), jnp.float32)
    bn_beta = jnp.zeros((Cout,), jnp.float32)
    bn_mean = jnp.zeros((Cout,), jnp.float32)
    bn_var = jnp.ones((Cout,), jnp.float32)

    out = snn_2d_thresh_forward(seq_input, conv_w, conv_b, bn_gamma, bn_beta,
                                bn_mean, bn_var, thresh=0.3)
    out = jax.block_until_ready(out)
    assert out.shape == (B, S, Cout, H, W)
    assert out.dtype == jnp.bfloat16

    ref = _reference_forward(seq_input, conv_w, conv_b, bn_gamma, bn_beta,
                             bn_mean, bn_var, thresh=0.3)
    mismatch = float(jnp.mean(jnp.abs(out.astype(jnp.float32) - ref)))
    # bf16 conv noise can flip a spike that sits exactly at the threshold; keep a
    # small mismatch budget as the tolerance policy.
    assert mismatch < 0.01, f"spike mismatch fraction {mismatch:.4f}"
    print("KERNEL_OK")
</pallas_src>

<mosaic_0001>
module attributes {stable_mosaic.version = 11 : i64} {
  func.func @snn_thresh_kernel(%arg0: i32, %arg1: memref<1x8x4x290xbf16, #tpu.memory_space<vmem>>, %arg2: memref<9x4x4xbf16, #tpu.memory_space<vmem>>, %arg3: memref<4x1xf32, #tpu.memory_space<vmem>>, %arg4: memref<2x256xbf16, #tpu.memory_space<vmem>>, %arg5: memref<1x8x4x256xbf16, #tpu.memory_space<vmem>>, %arg6: memref<8x4x256xf32, #tpu.memory_space<vmem>>) attributes {dimension_semantics = [#tpu.dimension_semantics<parallel>], iteration_bounds = array<i64: 2>, scalar_prefetch = 0 : i64, scratch_operands = 1 : i64, tpu.core_type = #tpu.core_type<tc>, window_params = [{transform_indices = @transform_0, window_bounds = array<i64: 1, 8, 4, 290>}, {pipeline_mode = #tpu.pipeline_mode<synchronous>, transform_indices = @transform_1, window_bounds = array<i64: 9, 4, 4>}, {pipeline_mode = #tpu.pipeline_mode<synchronous>, transform_indices = @transform_2, window_bounds = array<i64: 4, 1>}, {pipeline_mode = #tpu.pipeline_mode<synchronous>, transform_indices = @transform_3, window_bounds = array<i64: 2, 256>}, {transform_indices = @transform_4, window_bounds = array<i64: 1, 8, 4, 256>}]} {
    %c0 = arith.constant 0 : index
    %c0_0 = arith.constant 0 : index
    %c0_1 = arith.constant 0 : index
    %0 = vector.load %arg2[%c0, %c0_0, %c0_1] : memref<9x4x4xbf16, #tpu.memory_space<vmem>>, vector<1x4x4xbf16>
    %1 = vector.shape_cast %0 : vector<1x4x4xbf16> to vector<4x4xbf16>
    %c1 = arith.constant 1 : index
    %c0_2 = arith.constant 0 : index
    %c0_3 = arith.constant 0 : index
    %2 = vector.load %arg2[%c1, %c0_2, %c0_3] : memref<9x4x4xbf16, #tpu.memory_space<vmem>>, vector<1x4x4xbf16>
    %3 = vector.shape_cast %2 : vector<1x4x4xbf16> to vector<4x4xbf16>
    %c2 = arith.constant 2 : index
    %c0_4 = arith.constant 0 : index
    %c0_5 = arith.constant 0 : index
    %4 = vector.load %arg2[%c2, %c0_4, %c0_5] : memref<9x4x4xbf16, #tpu.memory_space<vmem>>, vector<1x4x4xbf16>
    %5 = vector.shape_cast %4 : vector<1x4x4xbf16> to vector<4x4xbf16>
    %c3 = arith.constant 3 : index
    %c0_6 = arith.constant 0 : index
    %c0_7 = arith.constant 0 : index
    %6 = vector.load %arg2[%c3, %c0_6, %c0_7] : memref<9x4x4xbf16, #tpu.memory_space<vmem>>, vector<1x4x4xbf16>
    %7 = vector.shape_cast %6 : vector<1x4x4xbf16> to vector<4x4xbf16>
    %c4 = arith.constant 4 : index
    %c0_8 = arith.constant 0 : index
    %c0_9 = arith.constant 0 : index
    %8 = vector.load %arg2[%c4, %c0_8, %c0_9] : memref<9x4x4xbf16, #tpu.memory_space<vmem>>, vector<1x4x4xbf16>
    %9 = vector.shape_cast %8 : vector<1x4x4xbf16> to vector<4x4xbf16>
    %c5 = arith.constant 5 : index
    %c0_10 = arith.constant 0 : index
    %c0_11 = arith.constant 0 : index
    %10 = vector.load %arg2[%c5, %c0_10, %c0_11] : memref<9x4x4xbf16, #tpu.memory_space<vmem>>, vector<1x4x4xbf16>
    %11 = vector.shape_cast %10 : vector<1x4x4xbf16> to vector<4x4xbf16>
    %c6 = arith.constant 6 : index
    %c0_12 = arith.constant 0 : index
    %c0_13 = arith.constant 0 : index
    %12 = vector.load %arg2[%c6, %c0_12, %c0_13] : memref<9x4x4xbf16, #tpu.memory_space<vmem>>, vector<1x4x4xbf16>
    %13 = vector.shape_cast %12 : vector<1x4x4xbf16> to vector<4x4xbf16>
    %c7 = arith.constant 7 : index
    %c0_14 = arith.constant 0 : index
    %c0_15 = arith.constant 0 : index
    %14 = vector.load %arg2[%c7, %c0_14, %c0_15] : memref<9x4x4xbf16, #tpu.memory_space<vmem>>, vector<1x4x4xbf16>
    %15 = vector.shape_cast %14 : vector<1x4x4xbf16> to vector<4x4xbf16>
    %c8 = arith.constant 8 : index
    %c0_16 = arith.constant 0 : index
    %c0_17 = arith.constant 0 : index
    %16 = vector.load %arg2[%c8, %c0_16, %c0_17] : memref<9x4x4xbf16, #tpu.memory_space<vmem>>, vector<1x4x4xbf16>
    %17 = vector.shape_cast %16 : vector<1x4x4xbf16> to vector<4x4xbf16>
    %c0_18 = arith.constant 0 : index
    %c0_19 = arith.constant 0 : index
    %18 = vector.load %arg3[%c0_18, %c0_19] : memref<4x1xf32, #tpu.memory_space<vmem>>, vector<4x1xf32>
    %19 = vector.shape_cast %18 : vector<4x1xf32> to vector<4x1xf32>
    %20 = vector.broadcast %19 : vector<4x1xf32> to vector<4x256xf32>
    %c0_20 = arith.constant 0 : index
    %c0_21 = arith.constant 0 : index
    %21 = vector.load %arg4[%c0_20, %c0_21] : memref<2x256xbf16, #tpu.memory_space<vmem>>, vector<1x256xbf16>
    %22 = vector.shape_cast %21 : vector<1x256xbf16> to vector<1x256xbf16>
    %23 = vector.broadcast %22 : vector<1x256xbf16> to vector<4x256xbf16>
    %c1_22 = arith.constant 1 : index
    %c0_23 = arith.constant 0 : index
    %24 = vector.load %arg4[%c1_22, %c0_23] : memref<2x256xbf16, #tpu.memory_space<vmem>>, vector<1x256xbf16>
    %25 = vector.shape_cast %24 : vector<1x256xbf16> to vector<1x256xbf16>
    %26 = vector.broadcast %25 : vector<1x256xbf16> to vector<4x256xbf16>
    %c0_i32 = arith.constant 0 : i32
    %c0_24 = arith.constant 0 : index
    %27 = arith.index_cast %c0_i32 : i32 to index
    %c0_25 = arith.constant 0 : index
    %c0_26 = arith.constant 0 : index
    %28 = vector.load %arg1[%c0_24, %27, %c0_25, %c0_26] : memref<1x8x4x290xbf16, #tpu.memory_space<vmem>>, vector<1x1x4x290xbf16>
    %29 = vector.shape_cast %28 : vector<1x1x4x290xbf16> to vector<4x290xbf16>
    %30 = vector.extract_strided_slice %29 {offsets = [0, 0], sizes = [4, 256], strides = [1, 1]} : vector<4x290xbf16> to vector<4x256xbf16>
    %31 = arith.mulf %30, %23 : vector<4x256xbf16>
    %cst = arith.constant dense<0.000000e+00> : vector<4x256xf32>
    %32 = tpu.matmul %1, %31, %cst {dimension_numbers = #tpu.dot_dimension_numbers<[1], [0], [0], [1], [0, 0, 1, 1], [], []>} : vector<4x4xbf16>, vector<4x256xbf16>, vector<4x256xf32> -> vector<4x256xf32>
    %33 = arith.addf %20, %32 : vector<4x256xf32>
    %34 = vector.extract_strided_slice %29 {offsets = [0, 1], sizes = [4, 256], strides = [1, 1]} : vector<4x290xbf16> to vector<4x256xbf16>
    %cst_27 = arith.constant dense<0.000000e+00> : vector<4x256xf32>
    %35 = tpu.matmul %3, %34, %cst_27 {dimension_numbers = #tpu.dot_dimension_numbers<[1], [0], [0], [1], [0, 0, 1, 1], [], []>} : vector<4x4xbf16>, vector<4x256xbf16>, vector<4x256xf32> -> vector<4x256xf32>
    %36 = arith.addf %33, %35 : vector<4x256xf32>
    %37 = vector.extract_strided_slice %29 {offsets = [0, 2], sizes = [4, 256], strides = [1, 1]} : vector<4x290xbf16> to vector<4x256xbf16>
    %38 = arith.mulf %37, %26 : vector<4x256xbf16>
    %cst_28 = arith.constant dense<0.000000e+00> : vector<4x256xf32>
    %39 = tpu.matmul %5, %38, %cst_28 {dimension_numbers = #tpu.dot_dimension_numbers<[1], [0], [0], [1], [0, 0, 1, 1], [], []>} : vector<4x4xbf16>, vector<4x256xbf16>, vector<4x256xf32> -> vector<4x256xf32>
    %40 = arith.addf %36, %39 : vector<4x256xf32>
    %41 = vector.extract_strided_slice %29 {offsets = [0, 16], sizes = [4, 256], strides = [1, 1]} : vector<4x290xbf16> to vector<4x256xbf16>
    %42 = arith.mulf %41, %23 : vector<4x256xbf16>
    %cst_29 = arith.constant dense<0.000000e+00> : vector<4x256xf32>
    %43 = tpu.matmul %7, %42, %cst_29 {dimension_numbers = #tpu.dot_dimension_numbers<[1], [0], [0], [1], [0, 0, 1, 1], [], []>} : vector<4x4xbf16>, vector<4x256xbf16>, vector<4x256xf32> -> vector<4x256xf32>
    %44 = arith.addf %40, %43 : vector<4x256xf32>
    %45 = vector.extract_strided_slice %29 {offsets = [0, 17], sizes = [4, 256], strides = [1, 1]} : vector<4x290xbf16> to vector<4x256xbf16>
    %cst_30 = arith.constant dense<0.000000e+00> : vector<4x256xf32>
    %46 = tpu.matmul %9, %45, %cst_30 {dimension_numbers = #tpu.dot_dimension_numbers<[1], [0], [0], [1], [0, 0, 1, 1], [], []>} : vector<4x4xbf16>, vector<4x256xbf16>, vector<4x256xf32> -> vector<4x256xf32>
    %47 = arith.addf %44, %46 : vector<4x256xf32>
    %48 = vector.extract_strided_slice %29 {offsets = [0, 18], sizes = [4, 256], strides = [1, 1]} : vector<4x290xbf16> to vector<4x256xbf16>
    %49 = arith.mulf %48, %26 : vector<4x256xbf16>
    %cst_31 = arith.constant dense<0.000000e+00> : vector<4x256xf32>
    %50 = tpu.matmul %11, %49, %cst_31 {dimension_numbers = #tpu.dot_dimension_numbers<[1], [0], [0], [1], [0, 0, 1, 1], [], []>} : vector<4x4xbf16>, vector<4x256xbf16>, vector<4x256xf32> -> vector<4x256xf32>
    %51 = arith.addf %47, %50 : vector<4x256xf32>
    %52 = vector.extract_strided_slice %29 {offsets = [0, 32], sizes = [4, 256], strides = [1, 1]} : vector<4x290xbf16> to vector<4x256xbf16>
    %53 = arith.mulf %52, %23 : vector<4x256xbf16>
    %cst_32 = arith.constant dense<0.000000e+00> : vector<4x256xf32>
    %54 = tpu.matmul %13, %53, %cst_32 {dimension_numbers = #tpu.dot_dimension_numbers<[1], [0], [0], [1], [0, 0, 1, 1], [], []>} : vector<4x4xbf16>, vector<4x256xbf16>, vector<4x256xf32> -> vector<4x256xf32>
    %55 = arith.addf %51, %54 : vector<4x256xf32>
    %56 = vector.extract_strided_slice %29 {offsets = [0, 33], sizes = [4, 256], strides = [1, 1]} : vector<4x290xbf16> to vector<4x256xbf16>
    %cst_33 = arith.constant dense<0.000000e+00> : vector<4x256xf32>
    %57 = tpu.matmul %15, %56, %cst_33 {dimension_numbers = #tpu.dot_dimension_numbers<[1], [0], [0], [1], [0, 0, 1, 1], [], []>} : vector<4x4xbf16>, vector<4x256xbf16>, vector<4x256xf32> -> vector<4x256xf32>
    %58 = arith.addf %55, %57 : vector<4x256xf32>
    %59 = vector.extract_strided_slice %29 {offsets = [0, 34], sizes = [4, 256], strides = [1, 1]} : vector<4x290xbf16> to vector<4x256xbf16>
    %60 = arith.mulf %59, %26 : vector<4x256xbf16>
    %cst_34 = arith.constant dense<0.000000e+00> : vector<4x256xf32>
    %61 = tpu.matmul %17, %60, %cst_34 {dimension_numbers = #tpu.dot_dimension_numbers<[1], [0], [0], [1], [0, 0, 1, 1], [], []>} : vector<4x4xbf16>, vector<4x256xbf16>, vector<4x256xf32> -> vector<4x256xf32>
    %62 = arith.addf %58, %61 : vector<4x256xf32>
    %63 = arith.index_cast %c0_i32 : i32 to index
    %c0_35 = arith.constant 0 : index
    %c0_36 = arith.constant 0 : index
    %64 = vector.load %arg6[%63, %c0_35, %c0_36] : memref<8x4x256xf32, #tpu.memory_space<vmem>>, vector<1x4x256xf32>
    %65 = vector.shape_cast %64 : vector<1x4x256xf32> to vector<4x256xf32>
    %66 = vector.shape_cast %62 : vector<4x256xf32> to vector<1x4x256xf32>
    tpu.vector_store %arg6[%63, %c0_35, %c0_36], %66 {strides = array<i32>} : memref<8x4x256xf32, #tpu.memory_space<vmem>>, vector<1x4x256xf32>,
    %c1_i32 = arith.constant 1 : i32
    %c0_37 = arith.constant 0 : index
    %67 = arith.index_cast %c1_i32 : i32 to index
    %c0_38 = arith.constant 0 : index
    %c0_39 = arith.constant 0 : index
    %68 = vector.load %arg1[%c0_37, %67, %c0_38, %c0_39] : memref<1x8x4x290xbf16, #tpu.memory_space<vmem>>, vector<1x1x4x290xbf16>
    %69 = vector.shape_cast %68 : vector<1x1x4x290xbf16> to vector<4x290xbf16>
    %70 = vector.extract_strided_slice %69 {offsets = [0, 0], sizes = [4, 256], strides = [1, 1]} : vector<4x290xbf16> to vector<4x256xbf16>
    %71 = arith.mulf %70, %23 : vector<4x256xbf16>
    %cst_40 = arith.constant dense<0.000000e+00> : vector<4x256xf32>
    %72 = tpu.matmul %1, %71, %cst_40 {dimension_numbers = #tpu.dot_dimension_numbers<[1], [0], [0], [1], [0, 0, 1, 1], [], []>} : vector<4x4xbf16>, vector<4x256xbf16>, vector<4x256xf32> -> vector<4x256xf32>
    %73 = arith.addf %20, %72 : vector<4x256xf32>
    %74 = vector.extract_strided_slice %69 {offsets = [0, 1], sizes = [4, 256], strides = [1, 1]} : vector<4x290xbf16> to vector<4x256xbf16>
    %cst_41 = arith.constant dense<0.000000e+00> : vector<4x256xf32>
    %75 = tpu.matmul %3, %74, %cst_41 {dimension_numbers = #tpu.dot_dimension_numbers<[1], [0], [0], [1], [0, 0, 1, 1], [], []>} : vector<4x4xbf16>, vector<4x256xbf16>, vector<4x256xf32> -> vector<4x256xf32>
    %76 = arith.addf %73, %75 : vector<4x256xf32>
    %77 = vector.extract_strided_slice %69 {offsets = [0, 2], sizes = [4, 256], strides = [1, 1]} : vector<4x290xbf16> to vector<4x256xbf16>
    %78 = arith.mulf %77, %26 : vector<4x256xbf16>
    %cst_42 = arith.constant dense<0.000000e+00> : vector<4x256xf32>
    %79 = tpu.matmul %5, %78, %cst_42 {dimension_numbers = #tpu.dot_dimension_numbers<[1], [0], [0], [1], [0, 0, 1, 1], [], []>} : vector<4x4xbf16>, vector<4x256xbf16>, vector<4x256xf32> -> vector<4x256xf32>
    %80 = arith.addf %76, %79 : vector<4x256xf32>
    %81 = vector.extract_strided_slice %69 {offsets = [0, 16], sizes = [4, 256], strides = [1, 1]} : vector<4x290xbf16> to vector<4x256xbf16>
    %82 = arith.mulf %81, %23 : vector<4x256xbf16>
    %cst_43 = arith.constant dense<0.000000e+00> : vector<4x256xf32>
    %83 = tpu.matmul %7, %82, %cst_43 {dimension_numbers = #tpu.dot_dimension_numbers<[1], [0], [0], [1], [0, 0, 1, 1], [], []>} : vector<4x4xbf16>, vector<4x256xbf16>, vector<4x256xf32> -> vector<4x256xf32>
    %84 = arith.addf %80, %83 : vector<4x256xf32>
    %85 = vector.extract_strided_slice %69 {offsets = [0, 17], sizes = [4, 256], strides = [1, 1]} : vector<4x290xbf16> to vector<4x256xbf16>
    %cst_44 = arith.constant dense<0.000000e+00> : vector<4x256xf32>
    %86 = tpu.matmul %9, %85, %cst_44 {dimension_numbers = #tpu.dot_dimension_numbers<[1], [0], [0], [1], [0, 0, 1, 1], [], []>} : vector<4x4xbf16>, vector<4x256xbf16>, vector<4x256xf32> -> vector<4x256xf32>
    %87 = arith.addf %84, %86 : vector<4x256xf32>
    %88 = vector.extract_strided_slice %69 {offsets = [0, 18], sizes = [4, 256], strides = [1, 1]} : vector<4x290xbf16> to vector<4x256xbf16>
    %89 = arith.mulf %88, %26 : vector<4x256xbf16>
    %cst_45 = arith.constant dense<0.000000e+00> : vector<4x256xf32>
    %90 = tpu.matmul %11, %89, %cst_45 {dimension_numbers = #tpu.dot_dimension_numbers<[1], [0], [0], [1], [0, 0, 1, 1], [], []>} : vector<4x4xbf16>, vector<4x256xbf16>, vector<4x256xf32> -> vector<4x256xf32>
    %91 = arith.addf %87, %90 : vector<4x256xf32>
    %92 = vector.extract_strided_slice %69 {offsets = [0, 32], sizes = [4, 256], strides = [1, 1]} : vector<4x290xbf16> to vector<4x256xbf16>
    %93 = arith.mulf %92, %23 : vector<4x256xbf16>
    %cst_46 = arith.constant dense<0.000000e+00> : vector<4x256xf32>
    %94 = tpu.matmul %13, %93, %cst_46 {dimension_numbers = #tpu.dot_dimension_numbers<[1], [0], [0], [1], [0, 0, 1, 1], [], []>} : vector<4x4xbf16>, vector<4x256xbf16>, vector<4x256xf32> -> vector<4x256xf32>
    %95 = arith.addf %91, %94 : vector<4x256xf32>
    %96 = vector.extract_strided_slice %69 {offsets = [0, 33], sizes = [4, 256], strides = [1, 1]} : vector<4x290xbf16> to vector<4x256xbf16>
    %cst_47 = arith.constant dense<0.000000e+00> : vector<4x256xf32>
    %97 = tpu.matmul %15, %96, %cst_47 {dimension_numbers = #tpu.dot_dimension_numbers<[1], [0], [0], [1], [0, 0, 1, 1], [], []>} : vector<4x4xbf16>, vector<4x256xbf16>, vector<4x256xf32> -> vector<4x256xf32>
    %98 = arith.addf %95, %97 : vector<4x256xf32>
    %99 = vector.extract_strided_slice %69 {offsets = [0, 34], sizes = [4, 256], strides = [1, 1]} : vector<4x290xbf16> to vector<4x256xbf16>
    %100 = arith.mulf %99, %26 : vector<4x256xbf16>
    %cst_48 = arith.constant dense<0.000000e+00> : vector<4x256xf32>
    %101 = tpu.matmul %17, %100, %cst_48 {dimension_numbers = #tpu.dot_dimension_numbers<[1], [0], [0], [1], [0, 0, 1, 1], [], []>} : vector<4x4xbf16>, vector<4x256xbf16>, vector<4x256xf32> -> vector<4x256xf32>
    %102 = arith.addf %98, %101 : vector<4x256xf32>
    %103 = arith.index_cast %c1_i32 : i32 to index
    %c0_49 = arith.constant 0 : index
    %c0_50 = arith.constant 0 : index
    %104 = vector.load %arg6[%103, %c0_49, %c0_50] : memref<8x4x256xf32, #tpu.memory_space<vmem>>, vector<1x4x256xf32>
    %105 = vector.shape_cast %104 : vector<1x4x256xf32> to vector<4x256xf32>
    %106 = vector.shape_cast %102 : vector<4x256xf32> to vector<1x4x256xf32>
    tpu.vector_store %arg6[%103, %c0_49, %c0_50], %106 {strides = array<i32>} : memref<8x4x256xf32, #tpu.memory_space<vmem>>, vector<1x4x256xf32>,
    %c2_i32 = arith.constant 2 : i32
    %c0_51 = arith.constant 0 : index
    %107 = arith.index_cast %c2_i32 : i32 to index
    %c0_52 = arith.constant 0 : index
    %c0_53 = arith.constant 0 : index
    %108 = vector.load %arg1[%c0_51, %107, %c0_52, %c0_53] : memref<1x8x4x290xbf16, #tpu.memory_space<vmem>>, vector<1x1x4x290xbf16>
    %109 = vector.shape_cast %108 : vector<1x1x4x290xbf16> to vector<4x290xbf16>
    %110 = vector.extract_strided_slice %109 {offsets = [0, 0], sizes = [4, 256], strides = [1, 1]} : vector<4x290xbf16> to vector<4x256xbf16>
    %111 = arith.mulf %110, %23 : vector<4x256xbf16>
    %cst_54 = arith.constant dense<0.000000e+00> : vector<4x256xf32>
    %112 = tpu.matmul %1, %111, %cst_54 {dimension_numbers = #tpu.dot_dimension_numbers<[1], [0], [0], [1], [0, 0, 1, 1], [], []>} : vector<4x4xbf16>, vector<4x256xbf16>, vector<4x256xf32> -> vector<4x256xf32>
    %113 = arith.addf %20, %112 : vector<4x256xf32>
    %114 = vector.extract_strided_slice %109 {offsets = [0, 1], sizes = [4, 256], strides = [1, 1]} : vector<4x290xbf16> to vector<4x256xbf16>
    %cst_55 = arith.constant dense<0.000000e+00> : vector<4x256xf32>
    %115 = tpu.matmul %3, %114, %cst_55 {dimension_numbers = #tpu.dot_dimension_numbers<[1], [0], [0], [1], [0, 0, 1, 1], [], []>} : vector<4x4xbf16>, vector<4x256xbf16>, vector<4x256xf32> -> vector<4x256xf32>
    %116 = arith.addf %113, %115 : vector<4x256xf32>
    %117 = vector.extract_strided_slice %109 {offsets = [0, 2], sizes = [4, 256], strides = [1, 1]} : vector<4x290xbf16> to vector<4x256xbf16>
    %118 = arith.mulf %117, %26 : vector<4x256xbf16>
    %cst_56 = arith.constant dense<0.000000e+00> : vector<4x256xf32>
    %119 = tpu.matmul %5, %118, %cst_56 {dimension_numbers = #tpu.dot_dimension_numbers<[1], [0], [0], [1], [0, 0, 1, 1], [], []>} : vector<4x4xbf16>, vector<4x256xbf16>, vector<4x256xf32> -> vector<4x256xf32>
    %120 = arith.addf %116, %119 : vector<4x256xf32>
    %121 = vector.extract_strided_slice %109 {offsets = [0, 16], sizes = [4, 256], strides = [1, 1]} : vector<4x290xbf16> to vector<4x256xbf16>
    %122 = arith.mulf %121, %23 : vector<4x256xbf16>
    %cst_57 = arith.constant dense<0.000000e+00> : vector<4x256xf32>
    %123 = tpu.matmul %7, %122, %cst_57 {dimension_numbers = #tpu.dot_dimension_numbers<[1], [0], [0], [1], [0, 0, 1, 1], [], []>} : vector<4x4xbf16>, vector<4x256xbf16>, vector<4x256xf32> -> vector<4x256xf32>
    %124 = arith.addf %120, %123 : vector<4x256xf32>
    %125 = vector.extract_strided_slice %109 {offsets = [0, 17], sizes = [4, 256], strides = [1, 1]} : vector<4x290xbf16> to vector<4x256xbf16>
    %cst_58 = arith.constant dense<0.000000e+00> : vector<4x256xf32>
    %126 = tpu.matmul %9, %125, %cst_58 {dimension_numbers = #tpu.dot_dimension_numbers<[1], [0], [0], [1], [0, 0, 1, 1], [], []>} : vector<4x4xbf16>, vector<4x256xbf16>, vector<4x256xf32> -> vector<4x256xf32>
    %127 = arith.addf %124, %126 : vector<4x256xf32>
    %128 = vector.extract_strided_slice %109 {offsets = [0, 18], sizes = [4, 256], strides = [1, 1]} : vector<4x290xbf16> to vector<4x256xbf16>
    %129 = arith.mulf %128, %26 : vector<4x256xbf16>
    %cst_59 = arith.constant dense<0.000000e+00> : vector<4x256xf32>
    %130 = tpu.matmul %11, %129, %cst_59 {dimension_numbers = #tpu.dot_dimension_numbers<[1], [0], [0], [1], [0, 0, 1, 1], [], []>} : vector<4x4xbf16>, vector<4x256xbf16>, vector<4x256xf32> -> vector<4x256xf32>
    %131 = arith.addf %127, %130 : vector<4x256xf32>
    %132 = vector.extract_strided_slice %109 {offsets = [0, 32], sizes = [4, 256], strides = [1, 1]} : vector<4x290xbf16> to vector<4x256xbf16>
    %133 = arith.mulf %132, %23 : vector<4x256xbf16>
    %cst_60 = arith.constant dense<0.000000e+00> : vector<4x256xf32>
    %134 = tpu.matmul %13, %133, %cst_60 {dimension_numbers = #tpu.dot_dimension_numbers<[1], [0], [0], [1], [0, 0, 1, 1], [], []>} : vector<4x4xbf16>, vector<4x256xbf16>, vector<4x256xf32> -> vector<4x256xf32>
    %135 = arith.addf %131, %134 : vector<4x256xf32>
    %136 = vector.extract_strided_slice %109 {offsets = [0, 33], sizes = [4, 256], strides = [1, 1]} : vector<4x290xbf16> to vector<4x256xbf16>
    %cst_61 = arith.constant dense<0.000000e+00> : vector<4x256xf32>
    %137 = tpu.matmul %15, %136, %cst_61 {dimension_numbers = #tpu.dot_dimension_numbers<[1], [0], [0], [1], [0, 0, 1, 1], [], []>} : vector<4x4xbf16>, vector<4x256xbf16>, vector<4x256xf32> -> vector<4x256xf32>
    %138 = arith.addf %135, %137 : vector<4x256xf32>
    %139 = vector.extract_strided_slice %109 {offsets = [0, 34], sizes = [4, 256], strides = [1, 1]} : vector<4x290xbf16> to vector<4x256xbf16>
    %140 = arith.mulf %139, %26 : vector<4x256xbf16>
    %cst_62 = arith.constant dense<0.000000e+00> : vector<4x256xf32>
    %141 = tpu.matmul %17, %140, %cst_62 {dimension_numbers = #tpu.dot_dimension_numbers<[1], [0], [0], [1], [0, 0, 1, 1], [], []>} : vector<4x4xbf16>, vector<4x256xbf16>, vector<4x256xf32> -> vector<4x256xf32>
    %142 = arith.addf %138, %141 : vector<4x256xf32>
    %143 = arith.index_cast %c2_i32 : i32 to index
    %c0_63 = arith.constant 0 : index
    %c0_64 = arith.constant 0 : index
    %144 = vector.load %arg6[%143, %c0_63, %c0_64] : memref<8x4x256xf32, #tpu.memory_space<vmem>>, vector<1x4x256xf32>
    %145 = vector.shape_cast %144 : vector<1x4x256xf32> to vector<4x256xf32>
    %146 = vector.shape_cast %142 : vector<4x256xf32> to vector<1x4x256xf32>
    tpu.vector_store %arg6[%143, %c0_63, %c0_64], %146 {strides = array<i32>} : memref<8x4x256xf32, #tpu.memory_space<vmem>>, vector<1x4x256xf32>,
    %c3_i32 = arith.constant 3 : i32
    %c0_65 = arith.constant 0 : index
    %147 = arith.index_cast %c3_i32 : i32 to index
    %c0_66 = arith.constant 0 : index
    %c0_67 = arith.constant 0 : index
    %148 = vector.load %arg1[%c0_65, %147, %c0_66, %c0_67] : memref<1x8x4x290xbf16, #tpu.memory_space<vmem>>, vector<1x1x4x290xbf16>
    %149 = vector.shape_cast %148 : vector<1x1x4x290xbf16> to vector<4x290xbf16>
    %150 = vector.extract_strided_slice %149 {offsets = [0, 0], sizes = [4, 256], strides = [1, 1]} : vector<4x290xbf16> to vector<4x256xbf16>
    %151 = arith.mulf %150, %23 : vector<4x256xbf16>
    %cst_68 = arith.constant dense<0.000000e+00> : vector<4x256xf32>
    %152 = tpu.matmul %1, %151, %cst_68 {dimension_numbers = #tpu.dot_dimension_numbers<[1], [0], [0], [1], [0, 0, 1, 1], [], []>} : vector<4x4xbf16>, vector<4x256xbf16>, vector<4x256xf32> -> vector<4x256xf32>
    %153 = arith.addf %20, %152 : vector<4x256xf32>
    %154 = vector.extract_strided_slice %149 {offsets = [0, 1], sizes = [4, 256], strides = [1, 1]} : vector<4x290xbf16> to vector<4x256xbf16>
    %cst_69 = arith.constant dense<0.000000e+00> : vector<4x256xf32>
    %155 = tpu.matmul %3, %154, %cst_69 {dimension_numbers = #tpu.dot_dimension_numbers<[1], [0], [0], [1], [0, 0, 1, 1], [], []>} : vector<4x4xbf16>, vector<4x256xbf16>, vector<4x256xf32> -> vector<4x256xf32>
    %156 = arith.addf %153, %155 : vector<4x256xf32>
    %157 = vector.extract_strided_slice %149 {offsets = [0, 2], sizes = [4, 256], strides = [1, 1]} : vector<4x290xbf16> to vector<4x256xbf16>
    %158 = arith.mulf %157, %26 : vector<4x256xbf16>
    %cst_70 = arith.constant dense<0.000000e+00> : vector<4x256xf32>
    %159 = tpu.matmul %5, %158, %cst_70 {dimension_numbers = #tpu.dot_dimension_numbers<[1], [0], [0], [1], [0, 0, 1, 1], [], []>} : vector<4x4xbf16>, vector<4x256xbf16>, vector<4x256xf32> -> vector<4x256xf32>
    %160 = arith.addf %156, %159 : vector<4x256xf32>
    %161 = vector.extract_strided_slice %149 {offsets = [0, 16], sizes = [4, 256], strides = [1, 1]} : vector<4x290xbf16> to vector<4x256xbf16>
    %162 = arith.mulf %161, %23 : vector<4x256xbf16>
    %cst_71 = arith.constant dense<0.000000e+00> : vector<4x256xf32>
    %163 = tpu.matmul %7, %162, %cst_71 {dimension_numbers = #tpu.dot_dimension_numbers<[1], [0], [0], [1], [0, 0, 1, 1], [], []>} : vector<4x4xbf16>, vector<4x256xbf16>, vector<4x256xf32> -> vector<4x256xf32>
    %164 = arith.addf %160, %163 : vector<4x256xf32>
    %165 = vector.extract_strided_slice %149 {offsets = [0, 17], sizes = [4, 256], strides = [1, 1]} : vector<4x290xbf16> to vector<4x256xbf16>
    %cst_72 = arith.constant dense<0.000000e+00> : vector<4x256xf32>
    %166 = tpu.matmul %9, %165, %cst_72 {dimension_numbers = #tpu.dot_dimension_numbers<[1], [0], [0], [1], [0, 0, 1, 1], [], []>} : vector<4x4xbf16>, vector<4x256xbf16>, vector<4x256xf32> -> vector<4x256xf32>
    %167 = arith.addf %164, %166 : vector<4x256xf32>
    %168 = vector.extract_strided_slice %149 {offsets = [0, 18], sizes = [4, 256], strides = [1, 1]} : vector<4x290xbf16> to vector<4x256xbf16>
    %169 = arith.mulf %168, %26 : vector<4x256xbf16>
    %cst_73 = arith.constant dense<0.000000e+00> : vector<4x256xf32>
    %170 = tpu.matmul %11, %169, %cst_73 {dimension_numbers = #tpu.dot_dimension_numbers<[1], [0], [0], [1], [0, 0, 1, 1], [], []>} : vector<4x4xbf16>, vector<4x256xbf16>, vector<4x256xf32> -> vector<4x256xf32>
    %171 = arith.addf %167, %170 : vector<4x256xf32>
    %172 = vector.extract_strided_slice %149 {offsets = [0, 32], sizes = [4, 256], strides = [1, 1]} : vector<4x290xbf16> to vector<4x256xbf16>
    %173 = arith.mulf %172, %23 : vector<4x256xbf16>
    %cst_74 = arith.constant dense<0.000000e+00> : vector<4x256xf32>
    %174 = tpu.matmul %13, %173, %cst_74 {dimension_numbers = #tpu.dot_dimension_numbers<[1], [0], [0], [1], [0, 0, 1, 1], [], []>} : vector<4x4xbf16>, vector<4x256xbf16>, vector<4x256xf32> -> vector<4x256xf32>
    %175 = arith.addf %171, %174 : vector<4x256xf32>
    %176 = vector.extract_strided_slice %149 {offsets = [0, 33], sizes = [4, 256], strides = [1, 1]} : vector<4x290xbf16> to vector<4x256xbf16>
    %cst_75 = arith.constant dense<0.000000e+00> : vector<4x256xf32>
    %177 = tpu.matmul %15, %176, %cst_75 {dimension_numbers = #tpu.dot_dimension_numbers<[1], [0], [0], [1], [0, 0, 1, 1], [], []>} : vector<4x4xbf16>, vector<4x256xbf16>, vector<4x256xf32> -> vector<4x256xf32>
    %178 = arith.addf %175, %177 : vector<4x256xf32>
    %179 = vector.extract_strided_slice %149 {offsets = [0, 34], sizes = [4, 256], strides = [1, 1]} : vector<4x290xbf16> to vector<4x256xbf16>
    %180 = arith.mulf %179, %26 : vector<4x256xbf16>
    %cst_76 = arith.constant dense<0.000000e+00> : vector<4x256xf32>
    %181 = tpu.matmul %17, %180, %cst_76 {dimension_numbers = #tpu.dot_dimension_numbers<[1], [0], [0], [1], [0, 0, 1, 1], [], []>} : vector<4x4xbf16>, vector<4x256xbf16>, vector<4x256xf32> -> vector<4x256xf32>
    %182 = arith.addf %178, %181 : vector<4x256xf32>
    %183 = arith.index_cast %c3_i32 : i32 to index
    %c0_77 = arith.constant 0 : index
    %c0_78 = arith.constant 0 : index
    %184 = vector.load %arg6[%183, %c0_77, %c0_78] : memref<8x4x256xf32, #tpu.memory_space<vmem>>, vector<1x4x256xf32>
    %185 = vector.shape_cast %184 : vector<1x4x256xf32> to vector<4x256xf32>
    %186 = vector.shape_cast %182 : vector<4x256xf32> to vector<1x4x256xf32>
    tpu.vector_store %arg6[%183, %c0_77, %c0_78], %186 {strides = array<i32>} : memref<8x4x256xf32, #tpu.memory_space<vmem>>, vector<1x4x256xf32>,
    %c4_i32 = arith.constant 4 : i32
    %c0_79 = arith.constant 0 : index
    %187 = arith.index_cast %c4_i32 : i32 to index
    %c0_80 = arith.constant 0 : index
    %c0_81 = arith.constant 0 : index
    %188 = vector.load %arg1[%c0_79, %187, %c0_80, %c0_81] : memref<1x8x4x290xbf16, #tpu.memory_space<vmem>>, vector<1x1x4x290xbf16>
    %189 = vector.shape_cast %188 : vector<1x1x4x290xbf16> to vector<4x290xbf16>
    %190 = vector.extract_strided_slice %189 {offsets = [0, 0], sizes = [4, 256], strides = [1, 1]} : vector<4x290xbf16> to vector<4x256xbf16>
    %191 = arith.mulf %190, %23 : vector<4x256xbf16>
    %cst_82 = arith.constant dense<0.000000e+00> : vector<4x256xf32>
    %192 = tpu.matmul %1, %191, %cst_82 {dimension_numbers = #tpu.dot_dimension_numbers<[1], [0], [0], [1], [0, 0, 1, 1], [], []>} : vector<4x4xbf16>, vector<4x256xbf16>, vector<4x256xf32> -> vector<4x256xf32>
    %193 = arith.addf %20, %192 : vector<4x256xf32>
    %194 = vector.extract_strided_slice %189 {offsets = [0, 1], sizes = [4, 256], strides = [1, 1]} : vector<4x290xbf16> to vector<4x256xbf16>
    %cst_83 = arith.constant dense<0.000000e+00> : vector<4x256xf32>
    %195 = tpu.matmul %3, %194, %cst_83 {dimension_numbers = #tpu.dot_dimension_numbers<[1], [0], [0], [1], [0, 0, 1, 1], [], []>} : vector<4x4xbf16>, vector<4x256xbf16>, vector<4x256xf32> -> vector<4x256xf32>
    %196 = arith.addf %193, %195 : vector<4x256xf32>
    %197 = vector.extract_strided_slice %189 {offsets = [0, 2], sizes = [4, 256], strides = [1, 1]} : vector<4x290xbf16> to vector<4x256xbf16>
    %198 = arith.mulf %197, %26 : vector<4x256xbf16>
    %cst_84 = arith.constant dense<0.000000e+00> : vector<4x256xf32>
    %199 = tpu.matmul %5, %198, %cst_84 {dimension_numbers = #tpu.dot_dimension_numbers<[1], [0], [0], [1], [0, 0, 1, 1], [], []>} : vector<4x4xbf16>, vector<4x256xbf16>, vector<4x256xf32> -> vector<4x256xf32>
    %200 = arith.addf %196, %199 : vector<4x256xf32>
    %201 = vector.extract_strided_slice %189 {offsets = [0, 16], sizes = [4, 256], strides = [1, 1]} : vector<4x290xbf16> to vector<4x256xbf16>
    %202 = arith.mulf %201, %23 : vector<4x256xbf16>
    %cst_85 = arith.constant dense<0.000000e+00> : vector<4x256xf32>
    %203 = tpu.matmul %7, %202, %cst_85 {dimension_numbers = #tpu.dot_dimension_numbers<[1], [0], [0], [1], [0, 0, 1, 1], [], []>} : vector<4x4xbf16>, vector<4x256xbf16>, vector<4x256xf32> -> vector<4x256xf32>
    %204 = arith.addf %200, %203 : vector<4x256xf32>
    %205 = vector.extract_strided_slice %189 {offsets = [0, 17], sizes = [4, 256], strides = [1, 1]} : vector<4x290xbf16> to vector<4x256xbf16>
    %cst_86 = arith.constant dense<0.000000e+00> : vector<4x256xf32>
    %206 = tpu.matmul %9, %205, %cst_86 {dimension_numbers = #tpu.dot_dimension_numbers<[1], [0], [0], [1], [0, 0, 1, 1], [], []>} : vector<4x4xbf16>, vector<4x256xbf16>, vector<4x256xf32> -> vector<4x256xf32>
    %207 = arith.addf %204, %206 : vector<4x256xf32>
    %208 = vector.extract_strided_slice %189 {offsets = [0, 18], sizes = [4, 256], strides = [1, 1]} : vector<4x290xbf16> to vector<4x256xbf16>
    %209 = arith.mulf %208, %26 : vector<4x256xbf16>
    %cst_87 = arith.constant dense<0.000000e+00> : vector<4x256xf32>
    %210 = tpu.matmul %11, %209, %cst_87 {dimension_numbers = #tpu.dot_dimension_numbers<[1], [0], [0], [1], [0, 0, 1, 1], [], []>} : vector<4x4xbf16>, vector<4x256xbf16>, vector<4x256xf32> -> vector<4x256xf32>
    %211 = arith.addf %207, %210 : vector<4x256xf32>
    %212 = vector.extract_strided_slice %189 {offsets = [0, 32], sizes = [4, 256], strides = [1, 1]} : vector<4x290xbf16> to vector<4x256xbf16>
    %213 = arith.mulf %212, %23 : vector<4x256xbf16>
    %cst_88 = arith.constant dense<0.000000e+00> : vector<4x256xf32>
    %214 = tpu.matmul %13, %213, %cst_88 {dimension_numbers = #tpu.dot_dimension_numbers<[1], [0], [0], [1], [0, 0, 1, 1], [], []>} : vector<4x4xbf16>, vector<4x256xbf16>, vector<4x256xf32> -> vector<4x256xf32>
    %215 = arith.addf %211, %214 : vector<4x256xf32>
    %216 = vector.extract_strided_slice %189 {offsets = [0, 33], sizes = [4, 256], strides = [1, 1]} : vector<4x290xbf16> to vector<4x256xbf16>
    %cst_89 = arith.constant dense<0.000000e+00> : vector<4x256xf32>
    %217 = tpu.matmul %15, %216, %cst_89 {dimension_numbers = #tpu.dot_dimension_numbers<[1], [0], [0], [1], [0, 0, 1, 1], [], []>} : vector<4x4xbf16>, vector<4x256xbf16>, vector<4x256xf32> -> vector<4x256xf32>
    %218 = arith.addf %215, %217 : vector<4x256xf32>
    %219 = vector.extract_strided_slice %189 {offsets = [0, 34], sizes = [4, 256], strides = [1, 1]} : vector<4x290xbf16> to vector<4x256xbf16>
    %220 = arith.mulf %219, %26 : vector<4x256xbf16>
    %cst_90 = arith.constant dense<0.000000e+00> : vector<4x256xf32>
    %221 = tpu.matmul %17, %220, %cst_90 {dimension_numbers = #tpu.dot_dimension_numbers<[1], [0], [0], [1], [0, 0, 1, 1], [], []>} : vector<4x4xbf16>, vector<4x256xbf16>, vector<4x256xf32> -> vector<4x256xf32>
    %222 = arith.addf %218, %221 : vector<4x256xf32>
    %223 = arith.index_cast %c4_i32 : i32 to index
    %c0_91 = arith.constant 0 : index
    %c0_92 = arith.constant 0 : index
    %224 = vector.load %arg6[%223, %c0_91, %c0_92] : memref<8x4x256xf32, #tpu.memory_space<vmem>>, vector<1x4x256xf32>
    %225 = vector.shape_cast %224 : vector<1x4x256xf32> to vector<4x256xf32>
    %226 = vector.shape_cast %222 : vector<4x256xf32> to vector<1x4x256xf32>
    tpu.vector_store %arg6[%223, %c0_91, %c0_92], %226 {strides = array<i32>} : memref<8x4x256xf32, #tpu.memory_space<vmem>>, vector<1x4x256xf32>,
    %c5_i32 = arith.constant 5 : i32
    %c0_93 = arith.constant 0 : index
    %227 = arith.index_cast %c5_i32 : i32 to index
    %c0_94 = arith.constant 0 : index
    %c0_95 = arith.constant 0 : index
    %228 = vector.load %arg1[%c0_93, %227, %c0_94, %c0_95] : memref<1x8x4x290xbf16, #tpu.memory_space<vmem>>, vector<1x1x4x290xbf16>
    %229 = vector.shape_cast %228 : vector<1x1x4x290xbf16> to vector<4x290xbf16>
    %230 = vector.extract_strided_slice %229 {offsets = [0, 0], sizes = [4, 256], strides = [1, 1]} : vector<4x290xbf16> to vector<4x256xbf16>
    %231 = arith.mulf %230, %23 : vector<4x256xbf16>
    %cst_96 = arith.constant dense<0.000000e+00> : vector<4x256xf32>
    %232 = tpu.matmul %1, %231, %cst_96 {dimension_numbers = #tpu.dot_dimension_numbers<[1], [0], [0], [1], [0, 0, 1, 1], [], []>} : vector<4x4xbf16>, vector<4x256xbf16>, vector<4x256xf32> -> vector<4x256xf32>
    %233 = arith.addf %20, %232 : vector<4x256xf32>
    %234 = vector.extract_strided_slice %229 {offsets = [0, 1], sizes = [4, 256], strides = [1, 1]} : vector<4x290xbf16> to vector<4x256xbf16>
    %cst_97 = arith.constant dense<0.000000e+00> : vector<4x256xf32>
    %235 = tpu.matmul %3, %234, %cst_97 {dimension_numbers = #tpu.dot_dimension_numbers<[1], [0], [0], [1], [0, 0, 1, 1], [], []>} : vector<4x4xbf16>, vector<4x256xbf16>, vector<4x256xf32> -> vector<4x256xf32>
    %236 = arith.addf %233, %235 : vector<4x256xf32>
    %237 = vector.extract_strided_slice %229 {offsets = [0, 2], sizes = [4, 256], strides = [1, 1]} : vector<4x290xbf16> to vector<4x256xbf16>
    %238 = arith.mulf %237, %26 : vector<4x256xbf16>
    %cst_98 = arith.constant dense<0.000000e+00> : vector<4x256xf32>
    %239 = tpu.matmul %5, %238, %cst_98 {dimension_numbers = #tpu.dot_dimension_numbers<[1], [0], [0], [1], [0, 0, 1, 1], [], []>} : vector<4x4xbf16>, vector<4x256xbf16>, vector<4x256xf32> -> vector<4x256xf32>
    %240 = arith.addf %236, %239 : vector<4x256xf32>
    %241 = vector.extract_strided_slice %229 {offsets = [0, 16], sizes = [4, 256], strides = [1, 1]} : vector<4x290xbf16> to vector<4x256xbf16>
    %242 = arith.mulf %241, %23 : vector<4x256xbf16>
    %cst_99 = arith.constant dense<0.000000e+00> : vector<4x256xf32>
    %243 = tpu.matmul %7, %242, %cst_99 {dimension_numbers = #tpu.dot_dimension_numbers<[1], [0], [0], [1], [0, 0, 1, 1], [], []>} : vector<4x4xbf16>, vector<4x256xbf16>, vector<4x256xf32> -> vector<4x256xf32>
    %244 = arith.addf %240, %243 : vector<4x256xf32>
    %245 = vector.extract_strided_slice %229 {offsets = [0, 17], sizes = [4, 256], strides = [1, 1]} : vector<4x290xbf16> to vector<4x256xbf16>
    %cst_100 = arith.constant dense<0.000000e+00> : vector<4x256xf32>
    %246 = tpu.matmul %9, %245, %cst_100 {dimension_numbers = #tpu.dot_dimension_numbers<[1], [0], [0], [1], [0, 0, 1, 1], [], []>} : vector<4x4xbf16>, vector<4x256xbf16>, vector<4x256xf32> -> vector<4x256xf32>
    %247 = arith.addf %244, %246 : vector<4x256xf32>
    %248 = vector.extract_strided_slice %229 {offsets = [0, 18], sizes = [4, 256], strides = [1, 1]} : vector<4x290xbf16> to vector<4x256xbf16>
    %249 = arith.mulf %248, %26 : vector<4x256xbf16>
    %cst_101 = arith.constant dense<0.000000e+00> : vector<4x256xf32>
    %250 = tpu.matmul %11, %249, %cst_101 {dimension_numbers = #tpu.dot_dimension_numbers<[1], [0], [0], [1], [0, 0, 1, 1], [], []>} : vector<4x4xbf16>, vector<4x256xbf16>, vector<4x256xf32> -> vector<4x256xf32>
    %251 = arith.addf %247, %250 : vector<4x256xf32>
    %252 = vector.extract_strided_slice %229 {offsets = [0, 32], sizes = [4, 256], strides = [1, 1]} : vector<4x290xbf16> to vector<4x256xbf16>
    %253 = arith.mulf %252, %23 : vector<4x256xbf16>
    %cst_102 = arith.constant dense<0.000000e+00> : vector<4x256xf32>
    %254 = tpu.matmul %13, %253, %cst_102 {dimension_numbers = #tpu.dot_dimension_numbers<[1], [0], [0], [1], [0, 0, 1, 1], [], []>} : vector<4x4xbf16>, vector<4x256xbf16>, vector<4x256xf32> -> vector<4x256xf32>
    %255 = arith.addf %251, %254 : vector<4x256xf32>
    %256 = vector.extract_strided_slice %229 {offsets = [0, 33], sizes = [4, 256], strides = [1, 1]} : vector<4x290xbf16> to vector<4x256xbf16>
    %cst_103 = arith.constant dense<0.000000e+00> : vector<4x256xf32>
    %257 = tpu.matmul %15, %256, %cst_103 {dimension_numbers = #tpu.dot_dimension_numbers<[1], [0], [0], [1], [0, 0, 1, 1], [], []>} : vector<4x4xbf16>, vector<4x256xbf16>, vector<4x256xf32> -> vector<4x256xf32>
    %258 = arith.addf %255, %257 : vector<4x256xf32>
    %259 = vector.extract_strided_slice %229 {offsets = [0, 34], sizes = [4, 256], strides = [1, 1]} : vector<4x290xbf16> to vector<4x256xbf16>
    %260 = arith.mulf %259, %26 : vector<4x256xbf16>
    %cst_104 = arith.constant dense<0.000000e+00> : vector<4x256xf32>
    %261 = tpu.matmul %17, %260, %cst_104 {dimension_numbers = #tpu.dot_dimension_numbers<[1], [0], [0], [1], [0, 0, 1, 1], [], []>} : vector<4x4xbf16>, vector<4x256xbf16>, vector<4x256xf32> -> vector<4x256xf32>
    %262 = arith.addf %258, %261 : vector<4x256xf32>
    %263 = arith.index_cast %c5_i32 : i32 to index
    %c0_105 = arith.constant 0 : index
    %c0_106 = arith.constant 0 : index
    %264 = vector.load %arg6[%263, %c0_105, %c0_106] : memref<8x4x256xf32, #tpu.memory_space<vmem>>, vector<1x4x256xf32>
    %265 = vector.shape_cast %264 : vector<1x4x256xf32> to vector<4x256xf32>
    %266 = vector.shape_cast %262 : vector<4x256xf32> to vector<1x4x256xf32>
    tpu.vector_store %arg6[%263, %c0_105, %c0_106], %266 {strides = array<i32>} : memref<8x4x256xf32, #tpu.memory_space<vmem>>, vector<1x4x256xf32>,
    %c6_i32 = arith.constant 6 : i32
    %c0_107 = arith.constant 0 : index
    %267 = arith.index_cast %c6_i32 : i32 to index
    %c0_108 = arith.constant 0 : index
    %c0_109 = arith.constant 0 : index
    %268 = vector.load %arg1[%c0_107, %267, %c0_108, %c0_109] : memref<1x8x4x290xbf16, #tpu.memory_space<vmem>>, vector<1x1x4x290xbf16>
    %269 = vector.shape_cast %268 : vector<1x1x4x290xbf16> to vector<4x290xbf16>
    %270 = vector.extract_strided_slice %269 {offsets = [0, 0], sizes = [4, 256], strides = [1, 1]} : vector<4x290xbf16> to vector<4x256xbf16>
    %271 = arith.mulf %270, %23 : vector<4x256xbf16>
    %cst_110 = arith.constant dense<0.000000e+00> : vector<4x256xf32>
    %272 = tpu.matmul %1, %271, %cst_110 {dimension_numbers = #tpu.dot_dimension_numbers<[1], [0], [0], [1], [0, 0, 1, 1], [], []>} : vector<4x4xbf16>, vector<4x256xbf16>, vector<4x256xf32> -> vector<4x256xf32>
    %273 = arith.addf %20, %272 : vector<4x256xf32>
    %274 = vector.extract_strided_slice %269 {offsets = [0, 1], sizes = [4, 256], strides = [1, 1]} : vector<4x290xbf16> to vector<4x256xbf16>
    %cst_111 = arith.constant dense<0.000000e+00> : vector<4x256xf32>
    %275 = tpu.matmul %3, %274, %cst_111 {dimension_numbers = #tpu.dot_dimension_numbers<[1], [0], [0], [1], [0, 0, 1, 1], [], []>} : vector<4x4xbf16>, vector<4x256xbf16>, vector<4x256xf32> -> vector<4x256xf32>
    %276 = arith.addf %273, %275 : vector<4x256xf32>
    %277 = vector.extract_strided_slice %269 {offsets = [0, 2], sizes = [4, 256], strides = [1, 1]} : vector<4x290xbf16> to vector<4x256xbf16>
    %278 = arith.mulf %277, %26 : vector<4x256xbf16>
    %cst_112 = arith.constant dense<0.000000e+00> : vector<4x256xf32>
    %279 = tpu.matmul %5, %278, %cst_112 {dimension_numbers = #tpu.dot_dimension_numbers<[1], [0], [0], [1], [0, 0, 1, 1], [], []>} : vector<4x4xbf16>, vector<4x256xbf16>, vector<4x256xf32> -> vector<4x256xf32>
    %280 = arith.addf %276, %279 : vector<4x256xf32>
    %281 = vector.extract_strided_slice %269 {offsets = [0, 16], sizes = [4, 256], strides = [1, 1]} : vector<4x290xbf16> to vector<4x256xbf16>
    %282 = arith.mulf %281, %23 : vector<4x256xbf16>
    %cst_113 = arith.constant dense<0.000000e+00> : vector<4x256xf32>
    %283 = tpu.matmul %7, %282, %cst_113 {dimension_numbers = #tpu.dot_dimension_numbers<[1], [0], [0], [1], [0, 0, 1, 1], [], []>} : vector<4x4xbf16>, vector<4x256xbf16>, vector<4x256xf32> -> vector<4x256xf32>
    %284 = arith.addf %280, %283 : vector<4x256xf32>
    %285 = vector.extract_strided_slice %269 {offsets = [0, 17], sizes = [4, 256], strides = [1, 1]} : vector<4x290xbf16> to vector<4x256xbf16>
    %cst_114 = arith.constant dense<0.000000e+00> : vector<4x256xf32>
    %286 = tpu.matmul %9, %285, %cst_114 {dimension_numbers = #tpu.dot_dimension_numbers<[1], [0], [0], [1], [0, 0, 1, 1], [], []>} : vector<4x4xbf16>, vector<4x256xbf16>, vector<4x256xf32> -> vector<4x256xf32>
    %287 = arith.addf %284, %286 : vector<4x256xf32>
    %288 = vector.extract_strided_slice %269 {offsets = [0, 18], sizes = [4, 256], strides = [1, 1]} : vector<4x290xbf16> to vector<4x256xbf16>
    %289 = arith.mulf %288, %26 : vector<4x256xbf16>
    %cst_115 = arith.constant dense<0.000000e+00> : vector<4x256xf32>
    %290 = tpu.matmul %11, %289, %cst_115 {dimension_numbers = #tpu.dot_dimension_numbers<[1], [0], [0], [1], [0, 0, 1, 1], [], []>} : vector<4x4xbf16>, vector<4x256xbf16>, vector<4x256xf32> -> vector<4x256xf32>
    %291 = arith.addf %287, %290 : vector<4x256xf32>
    %292 = vector.extract_strided_slice %269 {offsets = [0, 32], sizes = [4, 256], strides = [1, 1]} : vector<4x290xbf16> to vector<4x256xbf16>
    %293 = arith.mulf %292, %23 : vector<4x256xbf16>
    %cst_116 = arith.constant dense<0.000000e+00> : vector<4x256xf32>
    %294 = tpu.matmul %13, %293, %cst_116 {dimension_numbers = #tpu.dot_dimension_numbers<[1], [0], [0], [1], [0, 0, 1, 1], [], []>} : vector<4x4xbf16>, vector<4x256xbf16>, vector<4x256xf32> -> vector<4x256xf32>
    %295 = arith.addf %291, %294 : vector<4x256xf32>
    %296 = vector.extract_strided_slice %269 {offsets = [0, 33], sizes = [4, 256], strides = [1, 1]} : vector<4x290xbf16> to vector<4x256xbf16>
    %cst_117 = arith.constant dense<0.000000e+00> : vector<4x256xf32>
    %297 = tpu.matmul %15, %296, %cst_117 {dimension_numbers = #tpu.dot_dimension_numbers<[1], [0], [0], [1], [0, 0, 1, 1], [], []>} : vector<4x4xbf16>, vector<4x256xbf16>, vector<4x256xf32> -> vector<4x256xf32>
    %298 = arith.addf %295, %297 : vector<4x256xf32>
    %299 = vector.extract_strided_slice %269 {offsets = [0, 34], sizes = [4, 256], strides = [1, 1]} : vector<4x290xbf16> to vector<4x256xbf16>
    %300 = arith.mulf %299, %26 : vector<4x256xbf16>
    %cst_118 = arith.constant dense<0.000000e+00> : vector<4x256xf32>
    %301 = tpu.matmul %17, %300, %cst_118 {dimension_numbers = #tpu.dot_dimension_numbers<[1], [0], [0], [1], [0, 0, 1, 1], [], []>} : vector<4x4xbf16>, vector<4x256xbf16>, vector<4x256xf32> -> vector<4x256xf32>
    %302 = arith.addf %298, %301 : vector<4x256xf32>
    %303 = arith.index_cast %c6_i32 : i32 to index
    %c0_119 = arith.constant 0 : index
    %c0_120 = arith.constant 0 : index
    %304 = vector.load %arg6[%303, %c0_119, %c0_120] : memref<8x4x256xf32, #tpu.memory_space<vmem>>, vector<1x4x256xf32>
    %305 = vector.shape_cast %304 : vector<1x4x256xf32> to vector<4x256xf32>
    %306 = vector.shape_cast %302 : vector<4x256xf32> to vector<1x4x256xf32>
    tpu.vector_store %arg6[%303, %c0_119, %c0_120], %306 {strides = array<i32>} : memref<8x4x256xf32, #tpu.memory_space<vmem>>, vector<1x4x256xf32>,
    %c7_i32 = arith.constant 7 : i32
    %c0_121 = arith.constant 0 : index
    %307 = arith.index_cast %c7_i32 : i32 to index
    %c0_122 = arith.constant 0 : index
    %c0_123 = arith.constant 0 : index
    %308 = vector.load %arg1[%c0_121, %307, %c0_122, %c0_123] : memref<1x8x4x290xbf16, #tpu.memory_space<vmem>>, vector<1x1x4x290xbf16>
    %309 = vector.shape_cast %308 : vector<1x1x4x290xbf16> to vector<4x290xbf16>
    %310 = vector.extract_strided_slice %309 {offsets = [0, 0], sizes = [4, 256], strides = [1, 1]} : vector<4x290xbf16> to vector<4x256xbf16>
    %311 = arith.mulf %310, %23 : vector<4x256xbf16>
    %cst_124 = arith.constant dense<0.000000e+00> : vector<4x256xf32>
    %312 = tpu.matmul %1, %311, %cst_124 {dimension_numbers = #tpu.dot_dimension_numbers<[1], [0], [0], [1], [0, 0, 1, 1], [], []>} : vector<4x4xbf16>, vector<4x256xbf16>, vector<4x256xf32> -> vector<4x256xf32>
    %313 = arith.addf %20, %312 : vector<4x256xf32>
    %314 = vector.extract_strided_slice %309 {offsets = [0, 1], sizes = [4, 256], strides = [1, 1]} : vector<4x290xbf16> to vector<4x256xbf16>
    %cst_125 = arith.constant dense<0.000000e+00> : vector<4x256xf32>
    %315 = tpu.matmul %3, %314, %cst_125 {dimension_numbers = #tpu.dot_dimension_numbers<[1], [0], [0], [1], [0, 0, 1, 1], [], []>} : vector<4x4xbf16>, vector<4x256xbf16>, vector<4x256xf32> -> vector<4x256xf32>
    %316 = arith.addf %313, %315 : vector<4x256xf32>
    %317 = vector.extract_strided_slice %309 {offsets = [0, 2], sizes = [4, 256], strides = [1, 1]} : vector<4x290xbf16> to vector<4x256xbf16>
    %318 = arith.mulf %317, %26 : vector<4x256xbf16>
    %cst_126 = arith.constant dense<0.000000e+00> : vector<4x256xf32>
    %319 = tpu.matmul %5, %318, %cst_126 {dimension_numbers = #tpu.dot_dimension_numbers<[1], [0], [0], [1], [0, 0, 1, 1], [], []>} : vector<4x4xbf16>, vector<4x256xbf16>, vector<4x256xf32> -> vector<4x256xf32>
    %320 = arith.addf %316, %319 : vector<4x256xf32>
    %321 = vector.extract_strided_slice %309 {offsets = [0, 16], sizes = [4, 256], strides = [1, 1]} : vector<4x290xbf16> to vector<4x256xbf16>
    %322 = arith.mulf %321, %23 : vector<4x256xbf16>
    %cst_127 = arith.constant dense<0.000000e+00> : vector<4x256xf32>
    %323 = tpu.matmul %7, %322, %cst_127 {dimension_numbers = #tpu.dot_dimension_numbers<[1], [0], [0], [1], [0, 0, 1, 1], [], []>} : vector<4x4xbf16>, vector<4x256xbf16>, vector<4x256xf32> -> vector<4x256xf32>
    %324 = arith.addf %320, %323 : vector<4x256xf32>
    %325 = vector.extract_strided_slice %309 {offsets = [0, 17], sizes = [4, 256], strides = [1, 1]} : vector<4x290xbf16> to vector<4x256xbf16>
    %cst_128 = arith.constant dense<0.000000e+00> : vector<4x256xf32>
    %326 = tpu.matmul %9, %325, %cst_128 {dimension_numbers = #tpu.dot_dimension_numbers<[1], [0], [0], [1], [0, 0, 1, 1], [], []>} : vector<4x4xbf16>, vector<4x256xbf16>, vector<4x256xf32> -> vector<4x256xf32>
    %327 = arith.addf %324, %326 : vector<4x256xf32>
    %328 = vector.extract_strided_slice %309 {offsets = [0, 18], sizes = [4, 256], strides = [1, 1]} : vector<4x290xbf16> to vector<4x256xbf16>
    %329 = arith.mulf %328, %26 : vector<4x256xbf16>
    %cst_129 = arith.constant dense<0.000000e+00> : vector<4x256xf32>
    %330 = tpu.matmul %11, %329, %cst_129 {dimension_numbers = #tpu.dot_dimension_numbers<[1], [0], [0], [1], [0, 0, 1, 1], [], []>} : vector<4x4xbf16>, vector<4x256xbf16>, vector<4x256xf32> -> vector<4x256xf32>
    %331 = arith.addf %327, %330 : vector<4x256xf32>
    %332 = vector.extract_strided_slice %309 {offsets = [0, 32], sizes = [4, 256], strides = [1, 1]} : vector<4x290xbf16> to vector<4x256xbf16>
    %333 = arith.mulf %332, %23 : vector<4x256xbf16>
    %cst_130 = arith.constant dense<0.000000e+00> : vector<4x256xf32>
    %334 = tpu.matmul %13, %333, %cst_130 {dimension_numbers = #tpu.dot_dimension_numbers<[1], [0], [0], [1], [0, 0, 1, 1], [], []>} : vector<4x4xbf16>, vector<4x256xbf16>, vector<4x256xf32> -> vector<4x256xf32>
    %335 = arith.addf %331, %334 : vector<4x256xf32>
    %336 = vector.extract_strided_slice %309 {offsets = [0, 33], sizes = [4, 256], strides = [1, 1]} : vector<4x290xbf16> to vector<4x256xbf16>
    %cst_131 = arith.constant dense<0.000000e+00> : vector<4x256xf32>
    %337 = tpu.matmul %15, %336, %cst_131 {dimension_numbers = #tpu.dot_dimension_numbers<[1], [0], [0], [1], [0, 0, 1, 1], [], []>} : vector<4x4xbf16>, vector<4x256xbf16>, vector<4x256xf32> -> vector<4x256xf32>
    %338 = arith.addf %335, %337 : vector<4x256xf32>
    %339 = vector.extract_strided_slice %309 {offsets = [0, 34], sizes = [4, 256], strides = [1, 1]} : vector<4x290xbf16> to vector<4x256xbf16>
    %340 = arith.mulf %339, %26 : vector<4x256xbf16>
    %cst_132 = arith.constant dense<0.000000e+00> : vector<4x256xf32>
    %341 = tpu.matmul %17, %340, %cst_132 {dimension_numbers = #tpu.dot_dimension_numbers<[1], [0], [0], [1], [0, 0, 1, 1], [], []>} : vector<4x4xbf16>, vector<4x256xbf16>, vector<4x256xf32> -> vector<4x256xf32>
    %342 = arith.addf %338, %341 : vector<4x256xf32>
    %343 = arith.index_cast %c7_i32 : i32 to index
    %c0_133 = arith.constant 0 : index
    %c0_134 = arith.constant 0 : index
    %344 = vector.load %arg6[%343, %c0_133, %c0_134] : memref<8x4x256xf32, #tpu.memory_space<vmem>>, vector<1x4x256xf32>
    %345 = vector.shape_cast %344 : vector<1x4x256xf32> to vector<4x256xf32>
    %346 = vector.shape_cast %342 : vector<4x256xf32> to vector<1x4x256xf32>
    tpu.vector_store %arg6[%343, %c0_133, %c0_134], %346 {strides = array<i32>} : memref<8x4x256xf32, #tpu.memory_space<vmem>>, vector<1x4x256xf32>,
    %c8_i32 = arith.constant 8 : i32
    %cst_135 = arith.constant 0.000000e+00 : f32
    %347 = vector.broadcast %cst_135 : f32 to vector<4x256xf32>
    %c0_i32_136 = arith.constant 0 : i32
    %348 = arith.index_cast %c0_i32_136 : i32 to index
    %c0_137 = arith.constant 0 : index
    %c0_138 = arith.constant 0 : index
    %349 = vector.load %arg6[%348, %c0_137, %c0_138] : memref<8x4x256xf32, #tpu.memory_space<vmem>>, vector<1x4x256xf32>
    %350 = vector.shape_cast %349 : vector<1x4x256xf32> to vector<4x256xf32>
    %351 = arith.addf %347, %350 : vector<4x256xf32>
    %cst_139 = arith.constant 3.000000e-01 : f32
    %352 = vector.broadcast %cst_139 : f32 to vector<4x256xf32>
    %353 = arith.cmpf ogt, %351, %352 : vector<4x256xf32>
    %354 = arith.extui %353 : vector<4x256xi1> to vector<4x256xi32>
    %355 = arith.sitofp %354 : vector<4x256xi32> to vector<4x256xf32>
    %356 = arith.truncf %355 : vector<4x256xf32> to vector<4x256xbf16>
    %c0_140 = arith.constant 0 : index
    %357 = arith.index_cast %c0_i32_136 : i32 to index
    %c0_141 = arith.constant 0 : index
    %c0_142 = arith.constant 0 : index
    %358 = vector.load %arg5[%c0_140, %357, %c0_141, %c0_142] : memref<1x8x4x256xbf16, #tpu.memory_space<vmem>>, vector<1x1x4x256xbf16>
    %359 = vector.shape_cast %358 : vector<1x1x4x256xbf16> to vector<4x256xbf16>
    %360 = vector.shape_cast %356 : vector<4x256xbf16> to vector<1x1x4x256xbf16>
    tpu.vector_store %arg5[%c0_140, %357, %c0_141, %c0_142], %360 {strides = array<i32>} : memref<1x8x4x256xbf16, #tpu.memory_space<vmem>>, vector<1x1x4x256xbf16>,
    %cst_143 = arith.constant 2.000000e-01 : f32
    %361 = vector.broadcast %cst_143 : f32 to vector<4x256xf32>
    %362 = arith.mulf %351, %361 : vector<4x256xf32>
    %cst_144 = arith.constant 0.000000e+00 : f32
    %363 = vector.broadcast %cst_144 : f32 to vector<4x256xf32>
    %364 = arith.select %353, %363, %362 : vector<4x256xi1>, vector<4x256xf32>
    %c1_i32_145 = arith.constant 1 : i32
    %365 = arith.index_cast %c1_i32_145 : i32 to index
    %c0_146 = arith.constant 0 : index
    %c0_147 = arith.constant 0 : index
    %366 = vector.load %arg6[%365, %c0_146, %c0_147] : memref<8x4x256xf32, #tpu.memory_space<vmem>>, vector<1x4x256xf32>
    %367 = vector.shape_cast %366 : vector<1x4x256xf32> to vector<4x256xf32>
    %368 = arith.addf %364, %367 : vector<4x256xf32>
    %cst_148 = arith.constant 3.000000e-01 : f32
    %369 = vector.broadcast %cst_148 : f32 to vector<4x256xf32>
    %370 = arith.cmpf ogt, %368, %369 : vector<4x256xf32>
    %371 = arith.extui %370 : vector<4x256xi1> to vector<4x256xi32>
    %372 = arith.sitofp %371 : vector<4x256xi32> to vector<4x256xf32>
    %373 = arith.truncf %372 : vector<4x256xf32> to vector<4x256xbf16>
    %c0_149 = arith.constant 0 : index
    %374 = arith.index_cast %c1_i32_145 : i32 to index
    %c0_150 = arith.constant 0 : index
    %c0_151 = arith.constant 0 : index
    %375 = vector.load %arg5[%c0_149, %374, %c0_150, %c0_151] : memref<1x8x4x256xbf16, #tpu.memory_space<vmem>>, vector<1x1x4x256xbf16>
    %376 = vector.shape_cast %375 : vector<1x1x4x256xbf16> to vector<4x256xbf16>
    %377 = vector.shape_cast %373 : vector<4x256xbf16> to vector<1x1x4x256xbf16>
    tpu.vector_store %arg5[%c0_149, %374, %c0_150, %c0_151], %377 {strides = array<i32>} : memref<1x8x4x256xbf16, #tpu.memory_space<vmem>>, vector<1x1x4x256xbf16>,
    %cst_152 = arith.constant 2.000000e-01 : f32
    %378 = vector.broadcast %cst_152 : f32 to vector<4x256xf32>
    %379 = arith.mulf %368, %378 : vector<4x256xf32>
    %cst_153 = arith.constant 0.000000e+00 : f32
    %380 = vector.broadcast %cst_153 : f32 to vector<4x256xf32>
    %381 = arith.select %370, %380, %379 : vector<4x256xi1>, vector<4x256xf32>
    %c2_i32_154 = arith.constant 2 : i32
    %382 = arith.index_cast %c2_i32_154 : i32 to index
    %c0_155 = arith.constant 0 : index
    %c0_156 = arith.constant 0 : index
    %383 = vector.load %arg6[%382, %c0_155, %c0_156] : memref<8x4x256xf32, #tpu.memory_space<vmem>>, vector<1x4x256xf32>
    %384 = vector.shape_cast %383 : vector<1x4x256xf32> to vector<4x256xf32>
    %385 = arith.addf %381, %384 : vector<4x256xf32>
    %cst_157 = arith.constant 3.000000e-01 : f32
    %386 = vector.broadcast %cst_157 : f32 to vector<4x256xf32>
    %387 = arith.cmpf ogt, %385, %386 : vector<4x256xf32>
    %388 = arith.extui %387 : vector<4x256xi1> to vector<4x256xi32>
    %389 = arith.sitofp %388 : vector<4x256xi32> to vector<4x256xf32>
    %390 = arith.truncf %389 : vector<4x256xf32> to vector<4x256xbf16>
    %c0_158 = arith.constant 0 : index
    %391 = arith.index_cast %c2_i32_154 : i32 to index
    %c0_159 = arith.constant 0 : index
    %c0_160 = arith.constant 0 : index
    %392 = vector.load %arg5[%c0_158, %391, %c0_159, %c0_160] : memref<1x8x4x256xbf16, #tpu.memory_space<vmem>>, vector<1x1x4x256xbf16>
    %393 = vector.shape_cast %392 : vector<1x1x4x256xbf16> to vector<4x256xbf16>
    %394 = vector.shape_cast %390 : vector<4x256xbf16> to vector<1x1x4x256xbf16>
    tpu.vector_store %arg5[%c0_158, %391, %c0_159, %c0_160], %394 {strides = array<i32>} : memref<1x8x4x256xbf16, #tpu.memory_space<vmem>>, vector<1x1x4x256xbf16>,
    %cst_161 = arith.constant 2.000000e-01 : f32
    %395 = vector.broadcast %cst_161 : f32 to vector<4x256xf32>
    %396 = arith.mulf %385, %395 : vector<4x256xf32>
    %cst_162 = arith.constant 0.000000e+00 : f32
    %397 = vector.broadcast %cst_162 : f32 to vector<4x256xf32>
    %398 = arith.select %387, %397, %396 : vector<4x256xi1>, vector<4x256xf32>
    %c3_i32_163 = arith.constant 3 : i32
    %399 = arith.index_cast %c3_i32_163 : i32 to index
    %c0_164 = arith.constant 0 : index
    %c0_165 = arith.constant 0 : index
    %400 = vector.load %arg6[%399, %c0_164, %c0_165] : memref<8x4x256xf32, #tpu.memory_space<vmem>>, vector<1x4x256xf32>
    %401 = vector.shape_cast %400 : vector<1x4x256xf32> to vector<4x256xf32>
    %402 = arith.addf %398, %401 : vector<4x256xf32>
    %cst_166 = arith.constant 3.000000e-01 : f32
    %403 = vector.broadcast %cst_166 : f32 to vector<4x256xf32>
    %404 = arith.cmpf ogt, %402, %403 : vector<4x256xf32>
    %405 = arith.extui %404 : vector<4x256xi1> to vector<4x256xi32>
    %406 = arith.sitofp %405 : vector<4x256xi32> to vector<4x256xf32>
    %407 = arith.truncf %406 : vector<4x256xf32> to vector<4x256xbf16>
    %c0_167 = arith.constant 0 : index
    %408 = arith.index_cast %c3_i32_163 : i32 to index
    %c0_168 = arith.constant 0 : index
    %c0_169 = arith.constant 0 : index
    %409 = vector.load %arg5[%c0_167, %408, %c0_168, %c0_169] : memref<1x8x4x256xbf16, #tpu.memory_space<vmem>>, vector<1x1x4x256xbf16>
    %410 = vector.shape_cast %409 : vector<1x1x4x256xbf16> to vector<4x256xbf16>
    %411 = vector.shape_cast %407 : vector<4x256xbf16> to vector<1x1x4x256xbf16>
    tpu.vector_store %arg5[%c0_167, %408, %c0_168, %c0_169], %411 {strides = array<i32>} : memref<1x8x4x256xbf16, #tpu.memory_space<vmem>>, vector<1x1x4x256xbf16>,
    %cst_170 = arith.constant 2.000000e-01 : f32
    %412 = vector.broadcast %cst_170 : f32 to vector<4x256xf32>
    %413 = arith.mulf %402, %412 : vector<4x256xf32>
    %cst_171 = arith.constant 0.000000e+00 : f32
    %414 = vector.broadcast %cst_171 : f32 to vector<4x256xf32>
    %415 = arith.select %404, %414, %413 : vector<4x256xi1>, vector<4x256xf32>
    %c4_i32_172 = arith.constant 4 : i32
    %416 = arith.index_cast %c4_i32_172 : i32 to index
    %c0_173 = arith.constant 0 : index
    %c0_174 = arith.constant 0 : index
    %417 = vector.load %arg6[%416, %c0_173, %c0_174] : memref<8x4x256xf32, #tpu.memory_space<vmem>>, vector<1x4x256xf32>
    %418 = vector.shape_cast %417 : vector<1x4x256xf32> to vector<4x256xf32>
    %419 = arith.addf %415, %418 : vector<4x256xf32>
    %cst_175 = arith.constant 3.000000e-01 : f32
    %420 = vector.broadcast %cst_175 : f32 to vector<4x256xf32>
    %421 = arith.cmpf ogt, %419, %420 : vector<4x256xf32>
    %422 = arith.extui %421 : vector<4x256xi1> to vector<4x256xi32>
    %423 = arith.sitofp %422 : vector<4x256xi32> to vector<4x256xf32>
    %424 = arith.truncf %423 : vector<4x256xf32> to vector<4x256xbf16>
    %c0_176 = arith.constant 0 : index
    %425 = arith.index_cast %c4_i32_172 : i32 to index
    %c0_177 = arith.constant 0 : index
    %c0_178 = arith.constant 0 : index
    %426 = vector.load %arg5[%c0_176, %425, %c0_177, %c0_178] : memref<1x8x4x256xbf16, #tpu.memory_space<vmem>>, vector<1x1x4x256xbf16>
    %427 = vector.shape_cast %426 : vector<1x1x4x256xbf16> to vector<4x256xbf16>
    %428 = vector.shape_cast %424 : vector<4x256xbf16> to vector<1x1x4x256xbf16>
    tpu.vector_store %arg5[%c0_176, %425, %c0_177, %c0_178], %428 {strides = array<i32>} : memref<1x8x4x256xbf16, #tpu.memory_space<vmem>>, vector<1x1x4x256xbf16>,
    %cst_179 = arith.constant 2.000000e-01 : f32
    %429 = vector.broadcast %cst_179 : f32 to vector<4x256xf32>
    %430 = arith.mulf %419, %429 : vector<4x256xf32>
    %cst_180 = arith.constant 0.000000e+00 : f32
    %431 = vector.broadcast %cst_180 : f32 to vector<4x256xf32>
    %432 = arith.select %421, %431, %430 : vector<4x256xi1>, vector<4x256xf32>
    %c5_i32_181 = arith.constant 5 : i32
    %433 = arith.index_cast %c5_i32_181 : i32 to index
    %c0_182 = arith.constant 0 : index
    %c0_183 = arith.constant 0 : index
    %434 = vector.load %arg6[%433, %c0_182, %c0_183] : memref<8x4x256xf32, #tpu.memory_space<vmem>>, vector<1x4x256xf32>
    %435 = vector.shape_cast %434 : vector<1x4x256xf32> to vector<4x256xf32>
    %436 = arith.addf %432, %435 : vector<4x256xf32>
    %cst_184 = arith.constant 3.000000e-01 : f32
    %437 = vector.broadcast %cst_184 : f32 to vector<4x256xf32>
    %438 = arith.cmpf ogt, %436, %437 : vector<4x256xf32>
    %439 = arith.extui %438 : vector<4x256xi1> to vector<4x256xi32>
    %440 = arith.sitofp %439 : vector<4x256xi32> to vector<4x256xf32>
    %441 = arith.truncf %440 : vector<4x256xf32> to vector<4x256xbf16>
    %c0_185 = arith.constant 0 : index
    %442 = arith.index_cast %c5_i32_181 : i32 to index
    %c0_186 = arith.constant 0 : index
    %c0_187 = arith.constant 0 : index
    %443 = vector.load %arg5[%c0_185, %442, %c0_186, %c0_187] : memref<1x8x4x256xbf16, #tpu.memory_space<vmem>>, vector<1x1x4x256xbf16>
    %444 = vector.shape_cast %443 : vector<1x1x4x256xbf16> to vector<4x256xbf16>
    %445 = vector.shape_cast %441 : vector<4x256xbf16> to vector<1x1x4x256xbf16>
    tpu.vector_store %arg5[%c0_185, %442, %c0_186, %c0_187], %445 {strides = array<i32>} : memref<1x8x4x256xbf16, #tpu.memory_space<vmem>>, vector<1x1x4x256xbf16>,
    %cst_188 = arith.constant 2.000000e-01 : f32
    %446 = vector.broadcast %cst_188 : f32 to vector<4x256xf32>
    %447 = arith.mulf %436, %446 : vector<4x256xf32>
    %cst_189 = arith.constant 0.000000e+00 : f32
    %448 = vector.broadcast %cst_189 : f32 to vector<4x256xf32>
    %449 = arith.select %438, %448, %447 : vector<4x256xi1>, vector<4x256xf32>
    %c6_i32_190 = arith.constant 6 : i32
    %450 = arith.index_cast %c6_i32_190 : i32 to index
    %c0_191 = arith.constant 0 : index
    %c0_192 = arith.constant 0 : index
    %451 = vector.load %arg6[%450, %c0_191, %c0_192] : memref<8x4x256xf32, #tpu.memory_space<vmem>>, vector<1x4x256xf32>
    %452 = vector.shape_cast %451 : vector<1x4x256xf32> to vector<4x256xf32>
    %453 = arith.addf %449, %452 : vector<4x256xf32>
    %cst_193 = arith.constant 3.000000e-01 : f32
    %454 = vector.broadcast %cst_193 : f32 to vector<4x256xf32>
    %455 = arith.cmpf ogt, %453, %454 : vector<4x256xf32>
    %456 = arith.extui %455 : vector<4x256xi1> to vector<4x256xi32>
    %457 = arith.sitofp %456 : vector<4x256xi32> to vector<4x256xf32>
    %458 = arith.truncf %457 : vector<4x256xf32> to vector<4x256xbf16>
    %c0_194 = arith.constant 0 : index
    %459 = arith.index_cast %c6_i32_190 : i32 to index
    %c0_195 = arith.constant 0 : index
    %c0_196 = arith.constant 0 : index
    %460 = vector.load %arg5[%c0_194, %459, %c0_195, %c0_196] : memref<1x8x4x256xbf16, #tpu.memory_space<vmem>>, vector<1x1x4x256xbf16>
    %461 = vector.shape_cast %460 : vector<1x1x4x256xbf16> to vector<4x256xbf16>
    %462 = vector.shape_cast %458 : vector<4x256xbf16> to vector<1x1x4x256xbf16>
    tpu.vector_store %arg5[%c0_194, %459, %c0_195, %c0_196], %462 {strides = array<i32>} : memref<1x8x4x256xbf16, #tpu.memory_space<vmem>>, vector<1x1x4x256xbf16>,
    %cst_197 = arith.constant 2.000000e-01 : f32
    %463 = vector.broadcast %cst_197 : f32 to vector<4x256xf32>
    %464 = arith.mulf %453, %463 : vector<4x256xf32>
    %cst_198 = arith.constant 0.000000e+00 : f32
    %465 = vector.broadcast %cst_198 : f32 to vector<4x256xf32>
    %466 = arith.select %455, %465, %464 : vector<4x256xi1>, vector<4x256xf32>
    %c7_i32_199 = arith.constant 7 : i32
    %467 = arith.index_cast %c7_i32_199 : i32 to index
    %c0_200 = arith.constant 0 : index
    %c0_201 = arith.constant 0 : index
    %468 = vector.load %arg6[%467, %c0_200, %c0_201] : memref<8x4x256xf32, #tpu.memory_space<vmem>>, vector<1x4x256xf32>
    %469 = vector.shape_cast %468 : vector<1x4x256xf32> to vector<4x256xf32>
    %470 = arith.addf %466, %469 : vector<4x256xf32>
    %cst_202 = arith.constant 3.000000e-01 : f32
    %471 = vector.broadcast %cst_202 : f32 to vector<4x256xf32>
    %472 = arith.cmpf ogt, %470, %471 : vector<4x256xf32>
    %473 = arith.extui %472 : vector<4x256xi1> to vector<4x256xi32>
    %474 = arith.sitofp %473 : vector<4x256xi32> to vector<4x256xf32>
    %475 = arith.truncf %474 : vector<4x256xf32> to vector<4x256xbf16>
    %c0_203 = arith.constant 0 : index
    %476 = arith.index_cast %c7_i32_199 : i32 to index
    %c0_204 = arith.constant 0 : index
    %c0_205 = arith.constant 0 : index
    %477 = vector.load %arg5[%c0_203, %476, %c0_204, %c0_205] : memref<1x8x4x256xbf16, #tpu.memory_space<vmem>>, vector<1x1x4x256xbf16>
    %478 = vector.shape_cast %477 : vector<1x1x4x256xbf16> to vector<4x256xbf16>
    %479 = vector.shape_cast %475 : vector<4x256xbf16> to vector<1x1x4x256xbf16>
    tpu.vector_store %arg5[%c0_203, %476, %c0_204, %c0_205], %479 {strides = array<i32>} : memref<1x8x4x256xbf16, #tpu.memory_space<vmem>>, vector<1x1x4x256xbf16>,
    %cst_206 = arith.constant 2.000000e-01 : f32
    %480 = vector.broadcast %cst_206 : f32 to vector<4x256xf32>
    %481 = arith.mulf %470, %480 : vector<4x256xf32>
    %cst_207 = arith.constant 0.000000e+00 : f32
    %482 = vector.broadcast %cst_207 : f32 to vector<4x256xf32>
    %483 = arith.select %472, %482, %481 : vector<4x256xi1>, vector<4x256xf32>
    %c8_i32_208 = arith.constant 8 : i32
    return
  }
  func.func @transform_0(%arg0: i32) -> (i32, i32, i32, i32) {
    %c0_i32 = arith.constant 0 : i32
    %c0_i32_0 = arith.constant 0 : i32
    %c0_i32_1 = arith.constant 0 : i32
    %c0_i32_2 = arith.constant 0 : i32
    return %arg0, %c0_i32, %c0_i32_0, %c0_i32_1 : i32, i32, i32, i32
  }
  func.func @transform_1(%arg0: i32) -> (i32, i32, i32) {
    %c0_i32 = arith.constant 0 : i32
    %c0_i32_0 = arith.constant 0 : i32
    %c0_i32_1 = arith.constant 0 : i32
    %c0_i32_2 = arith.constant 0 : i32
    return %c0_i32, %c0_i32_0, %c0_i32_1 : i32, i32, i32
  }
  func.func @transform_2(%arg0: i32) -> (i32, i32) {
    %c0_i32 = arith.constant 0 : i32
    %c0_i32_0 = arith.constant 0 : i32
    %c0_i32_1 = arith.constant 0 : i32
    return %c0_i32, %c0_i32_0 : i32, i32
  }
  func.func @transform_3(%arg0: i32) -> (i32, i32) {
    %c0_i32 = arith.constant 0 : i32
    %c0_i32_0 = arith.constant 0 : i32
    %c0_i32_1 = arith.constant 0 : i32
    return %c0_i32, %c0_i32_0 : i32, i32
  }
  func.func @transform_4(%arg0: i32) -> (i32, i32, i32, i32) {
    %c0_i32 = arith.constant 0 : i32
    %c0_i32_0 = arith.constant 0 : i32
    %c0_i32_1 = arith.constant 0 : i32
    %c0_i32_2 = arith.constant 0 : i32
    return %arg0, %c0_i32, %c0_i32_0, %c0_i32_1 : i32, i32, i32, i32
  }
}

</mosaic_0001>

<bundles_post_ra>
// kernel: tpu_custom_call.1
= control target key start
LH: loop header
LB: loop body
LE: loop exit
PB: predicated region body
PF: predicated region fallthrough
CT: control target
= control target key end

     0   :  { %9 = vsyncpa [#allocation4], 0  ;;  %s8163_s0 = inlined_call_operand.hbm [shape: bf16[2,8,4,290], index: 0, kind: input, shape index: {}]   ;;  %s8164_s1 = inlined_call_operand.vmem [shape: bf16[9,4,4], index: 1, kind: input, shape index: {}]   ;;  %s8165_s2 = inlined_call_operand.vmem [shape: f32[4,1], index: 2, kind: input, shape index: {}]   ;;  %s8166_s3 = inlined_call_operand.vmem [shape: bf16[2,256], index: 3, kind: input, shape index: {}]   ;;  %s8167_s4 = inlined_call_operand.hbm [shape: bf16[2,8,4,256], index: 4, kind: output, shape index: {}]  }
   0x1   :  { %11 = vsyncpa [#allocation4 + $0x1], 0 }
   0x2   :  { %12 = vsyncpa [#allocation5], 0 }
   0x3   :  { %14 = vsyncpa [#allocation5 + $0x1], 0  ;;  %s6138_s15 = smov 0   ;;  %s6140_s16 = smov 0  }
   0x4   :  { %s6142_s17 = smov 0   ;;  %s6144_s18 = smov 0  }
   0x5 LB: > { %s6159_s19 = sadd.s32 4294967295, %s6088_s18   ;;  %s5702_s20 = sadd.s32 4294967294, %s6088_s18   ;;  %s6088_s18 = sphi %s6144_s18, %s8219_s18   ;;  %s6084_s17 = sphi %s6142_s17, %s8218_s17   ;;  %s6080_s16 = sphi %s6140_s16, %s8217_s16   ;;  %s6076_s15 = sphi %s6138_s15, %s8216_s15  }
   0x6   : > { %s6163_s21 = sadd.s32 1, %s6088_s18   ;;  %s27_s22 = sadd.s32 1, %s6084_s17 }
   0x7   : > { %s24_s23 = ssub.s32 %s6088_s18, %s6163_s21  ;;  %p34_p0 = scmp.ne.s32.totalorder %s6084_s17, %s6080_s16 }
   0x8   : > { %p25_p1 = scmp.eq.s32.totalorder %s24_s23, 0  ;;  %p35_p2 = scmp.eq.s32.totalorder %s6088_s18, 0 }
   0x9   : > { %p40_p3 = scmp.ne.s32.totalorder %s6080_s16, %s6076_s15  ;;  %p41_p4 = scmp.eq.s32.totalorder %s6159_s19, 0 }
   0xa   : > { %s6175_s24 = scalar_select %p25_p1, %s6084_s17, %s27_s22  }
   0xb   : > { %p36_p5 = por %p35_p2, %p34_p0  ;;  %p6177_p6 = por %p41_p4, %p40_p3 }
   0xc   : > { %p127_p7 = scmp.eq.s32.totalorder %s6159_s19, 1  ;;  %p133_p8 = scmp.eq.s32.totalorder %s5702_s20, 1 }
   0xd   : > { %s8177_s25 = scalar_select %p6177_p6, 1, 0 }
   0xe   : > { %p5920_p10 = scmp.lt.s32.totalorder %s6088_s18, 2  ;;  %p6184_p11 = por %p127_p7, %p34_p0 }
   0xf   : > { %p6188_p12 = por %p133_p8, %p40_p3  ;;  %s162_s28 = sand.u32 1, %s6084_s17  }
  0x10   : > { %s8178_s26 = scalar_select %p6184_p11, 1, 0 }
  0x11   : > { %s8179_s27 = scalar_select %p6188_p12, 1, 0 }
  0x12   : > { %s5906_s29 = smul.u32 768, %s6088_s18  ;;  %p6199_p13 = pnand %p5920_p10, %p36_p5 }
  0x13   : > { %s5905_s30 = smul.u32 48, %s162_s28  ;;  %s6205_s11 = scalar_lea.sflag [#allocation4], %s162_s28 }
  0x14   : > { %s6197_s7 = scalar_lea.hbm %s8163_s0, %s5906_s29  ;;  %p5998_p1 = pneg %p6199_p13 }
  0x15   : > { %s166_s9 = scalar_lea.vmem [#allocation3], %s5905_s30  ;;  %s5996_s12 = scalar_lea.hbm %s6197_s7, 768 }
  0x16   : > { %s173_s10 = sshll.u32 %s166_s9, 4  ;;  %p5997_p0 = scmp.ne.s32.totalorder %s6197_s7, %s5996_s12  ;;  %s6203_s10 = int_to_ptr.vmem [resolvable:$true] %s173_s10 }
  0x17   : > { %s6001_s20 = scalar_lea.hbm %s8163_s0, 1536  ;;  %p6002_p4 = scmp.lt.s32.totalorder %s6197_s7, %s8163_s0 }
  0x18   : > { %p5999_p2 = pnand %p5998_p1, %p5997_p0  ;;  %p6003_p5 = scmp.lt.s32.totalorder %s6001_s20, %s5996_s12 }
  0x1a   : > { %p6000_p3 = pneg %p5999_p2  ;;  %p6004_p7 = por %p6003_p5, %p6002_p4 }
  0x1c   : > { %p6005_p8 = pnand %p6004_p7, %p6000_p3 }
  0x1e   : > { %6008 = shalt.err (!%p6005_p8)
}
  0x1f   : > { %s6009_s28 = scalar_lea.vmem %s6203_s10, 768  ;;  %s6090_s29 = smov [#allocation3]  }
  0x20   : > { %p6010_p10 = scmp.ne.s32.totalorder %s6203_s10, %s6009_s28  ;;  %s6014_s30 = sshll.u32 %s6090_s29, 4  ;;  %s6015_s30 = int_to_ptr.vmem [resolvable:$false] %s6014_s30 }
  0x21   : > { %s6016_s5 = scalar_lea.vmem %s6015_s30, 1536  ;;  %p6017_p2 = scmp.lt.s32.totalorder %s6203_s10, %s6015_s30 }
  0x22   : > { %p6012_p9 = pnand %p6010_p10, %p5998_p1  ;;  %p6018_p12 = scmp.lt.s32.totalorder %s6016_s5, %s6009_s28 }
  0x24   : > { %p6013_p0 = pneg %p6012_p9  ;;  %p6019_p11 = por %p6018_p12, %p6017_p2 }
  0x26   : > { %p6020_p6 = pnand %p6019_p11, %p6013_p0 }
  0x28   : > { %6023 = shalt.err (!%p6020_p6)
}
  0x29   : > { %s6091_s6 = smov 96   ;;  %s6092_s9 = smov 6  }
  0x2a   : > { %5915 = dma.hbm_to_vmem [thread:$0]  (!%p6199_p13), %s6197_s7, 768, %s6203_s10, %s6205_s11, %s6091_s6, %s6091_s6, %s6092_s9  }
  0x2b   : > { %p5706_p9 = scmp.ge.s32.totalorder %s6088_s18, 1  ;;  %p181_p1 = scmp.lt.s32.totalorder %s6088_s18, 3 }
  0x2d   : > { %p182_p3 = pnand %p5706_p9, %p181_p1 }
  0x2f   : > { %185 = sbr.rel (%p182_p3) target bundleno = 877 (0x36d), region = 36 }
  0x34   : > { %s6229_s12 = sand.u32 1, %s6080_s16   ;;  %p8181_p6 = scmp.ne.s32.totalorder %s8177_s25, 0 }
  0x35   : > { %s5907_s13 = smul.u32 48, %s6229_s12  ;;  %s188_s14 = scalar_lea.sflag [#allocation4], %s6229_s12 }
  0x37   : > { %s6233_s20 = scalar_lea.vmem [#allocation3], %s5907_s13 }
  0x38   : > { %6067 = dma.done.wait (%p8181_p6), %s188_s14, 768  }
  0x39   : > { %6069 = vsyncadd (%p8181_p6), %s188_s14, 4294966528  ;;  %v253_v0 = vlaneseq  ;;  %v6093_v1 = vmov 1983009808   ;;  %v6094_v4 = vmov 1966171168   ;;  %s6095_s25 = smov 111  }
  0x3a   : > { %v297_v2 = vunpack.c.l.s4 %v6093_v1  ;;  %v251_v5 = vunpack.c.l.s4 %v6094_v4  ;;  %v6242_v10 = vld [vmem:[%s6233_s20] sm:$0x3f]  ;;  %s6096_s10 = smov 127   ;;  %s6097_s11 = smov 95   ;;  %v6266_v34 = vld [vmem:[%s6233_s20 + $0x6] sm:$0x3f] }
  0x3b   : > { %v254_v3 = vshrl.u32 %v253_v0, 7  ;;  %v5716_v11 = vld.sshfl [vmem:[%s8166_s3] sm:$0x11 pattern:$0x75316420]  ;;  %v369_v13 = vcombine.high %v6242_v10, %v6242_v10  ;;  %s6098_s22 = smov 16   ;;  %v1070_v36 = vcombine.high %v6266_v34, %v6266_v34 }
  0x3c   : > { %v298_v6 = vunpack.c.0.s8 %v297_v2  ;;  %v252_v7 = vunpack.c.0.s8 %v251_v5  ;;  %v249_v14 = vcombine.high %v5716_v11, %v5716_v11  ;;  %s6099_s23 = smov 32   ;;  %s6100_s28 = smov 2   ;;  %v6280_v39 = vld [vmem:[%s6233_s20 + $0xc] sm:$0x3f]  ;;  %vm391_vm0 = vcmask 1039360  }
  0x3d   : > { %v269_v16 = vsub.s32 0, %v254_v3  ;;  %s6101_s29 = smov 34   ;;  %s6102_s30 = smov 18   ;;  %v1700_v42 = vcombine.high %v6280_v39, %v6280_v39  ;;  %vm318_vm1 = vcmask 1041408   ;;  %vm544_vm2 = vcmask 130048  }
  0x3e   : > { %v6239_v8 = vsub.s32 %v298_v6, %v254_v3  ;;  %v255_v9 = vsub.s32 %v252_v7, %v254_v3  ;;  %vm775_vm3 = vcmask 261120   ;;  %s6103_s5 = smov 112   ;;  %vm690_vm4 = vcmask 146432   ;;  %s6104_s6 = smov 96  }
  0x3f   : > { %vm459_vm5 = vcmask 15360   ;;  %vm921_vm6 = vcmask 277504   ;;  %s6106_s14 = smov 110   ;;  %s6107_s7 = smov 126   ;;  %vm314_vm7 = vcmask 31744   ;;  %vm571_vm8 = vcmask 916480  }
  0x40   : > { %v376_v12 = vrot.slane %v6242_v10, %v6239_v8  ;;  %v256_v15 = vrot.slane %v5716_v11, %v255_v9  ;;  %v383_v18 = vrot.slane %v369_v13, %v6239_v8  ;;  %v263_v19 = vrot.slane %v249_v14, %v255_v9  ;;  %s6108_s8 = smov 94   ;;  %s5616_s13 = scalar_lea.sflag [#allocation5], %s6229_s12 }
  0x41   : > { %v1077_v35 = vrot.slane %v6266_v34, %v6239_v8  ;;  %v1084_v38 = vrot.slane %v1070_v36, %v6239_v8  ;;  %v1707_v40 = vrot.slane %v6280_v39, %v6239_v8  ;;  %v6294_v43 = vrot.slane %v1700_v42, %v6239_v8  ;;  %p8213_p12 = scmp.ne.s32.totalorder %s8178_s26, 0 }
  0x42   : > { %626 = vrot.lane.b32.xlu0 %v376_v12, %s6095_s25  ;;  %385 = vrot.lane.b32.xlu1 %v376_v12, %s6096_s10  ;;  %v384_v17 = vcombine.high %v376_v12, %v376_v12  ;;  %v278_v20 = vshrl.u32 %v256_v15, 16  ;;  %v265_v21 = vpack.i.b16 %v256_v15, %v256_v15  ;;  %v272_v22 = vpack.i.b16 %v263_v19, %v263_v19 }
  0x43   : > { %v285_v24 = vshrl.u32 %v263_v19, 16  ;;  %v1085_v37 = vcombine.high %v1077_v35, %v1077_v35  ;;  %v1715_v41 = vcombine.high %v1707_v40, %v1707_v40  ;;  %vm486_vm9 = vcmask 1031168  }
  0x44   : > { %v279_v23 = vpack.i.b16 %v278_v20, %v278_v20  ;;  %v270_v25 = vrot.slane %v265_v21, %v269_v16  ;;  %v277_v26 = vrot.slane %v272_v22, %v269_v16  ;;  %v8170_v21 = vmov 0  }
  0x45   : > { %v286_v28 = vpack.i.b16 %v285_v24, %v285_v24  ;;  %435 = vmatprep.mubr.bf16.mxu1 %v8170_v21  ;;  %v6385_v24 = vld [vmem:[%s8164_s1 + $0x2] sm:$0x3]  ;;  %357 = vmatprep.mubr.bf16.mxu0 %v8170_v21  ;;  %vm632_vm10 = vcmask 908288   ;;  %vm717_vm11 = vcmask 900096   ;;  %vm863_vm12 = vcmask 777216  }
  0x46   : > { %387 = vrot.lane.b32.xlu0 %v384_v17, %s6096_s10  ;;  %389 = vrot.lane.b32.xlu1 %v383_v18, %s6096_s10  ;;  %v284_v27 = vrot.slane %v279_v23, %v269_v16  ;;  %v295_v29 = vcombine.low %v270_v25, %v277_v26  ;;  %vm802_vm13 = vcmask 785408   ;;  %vm948_vm14 = vcmask 769024  }
  0x47   : > { %v291_v30 = vrot.slane %v286_v28, %v269_v16  ;;  %5975 = vset.pattern.permute.xlu1 %v8170_v21  ;;  %5976 = vset.pattern.permute.xlu0 %v8170_v21 }
  0x48   : > { %v6259_v31 = vrot.slane %v295_v29, %v6239_v8 }
  0x49   : > { %v448_v32 = vcombine.low %v284_v27, %v291_v30 }
  0x4a   : > { %630 = vrot.lane.b32.xlu0 %v383_v18, %s6095_s25  ;;  %628 = vrot.lane.b32.xlu1 %v384_v17, %s6095_s25 }
  0x4b   : > { %v455_v33 = vrot.slane %v448_v32, %v6239_v8 }
  0x4e   : > { %857 = vrot.lane.b32.xlu1 %v376_v12, %s6097_s11  ;;  %541 = vrot.lane.b32.xlu0 %v6259_v31, %s6098_s22 }
  0x52   : > { %772 = vrot.lane.b32.xlu1 %v6259_v31, %s6099_s23  ;;  %456 = vrot.lane.b32.xlu0 %v455_v33, %s6100_s28 }
  0x56   : > { %918 = vrot.lane.b32.xlu0 %v455_v33, %s6101_s29  ;;  %687 = vrot.lane.b32.xlu1 %v455_v33, %s6102_s30 }
  0x5a   : > { %859 = vrot.lane.b32.xlu0 %v384_v17, %s6097_s11  ;;  %861 = vrot.lane.b32.xlu1 %v383_v18, %s6097_s11 }
  0x5e   : > { %1086 = vrot.lane.b32.xlu1 %v1077_v35, %s6096_s10  ;;  %1088 = vrot.lane.b32.xlu0 %v1085_v37, %s6096_s10 }
  0x62   : > { %1090 = vrot.lane.b32.xlu1 %v1084_v38, %s6096_s10  ;;  %1293 = vrot.lane.b32.xlu0 %v1077_v35, %s6095_s25 }
  0x66   : > { %1295 = vrot.lane.b32.xlu1 %v1085_v37, %s6095_s25  ;;  %1297 = vrot.lane.b32.xlu0 %v1084_v38, %s6095_s25 }
  0x6a   : > { %1500 = vrot.lane.b32.xlu1 %v1077_v35, %s6097_s11  ;;  %1502 = vrot.lane.b32.xlu0 %v1085_v37, %s6097_s11 }
  0x6e   : > { %1504 = vrot.lane.b32.xlu1 %v1084_v38, %s6097_s11  ;;  %1718 = vrot.lane.b32.xlu0 %v1715_v41, %s6096_s10 }
  0x72   : > { %1716 = vrot.lane.b32.xlu1 %v1707_v40, %s6096_s10  ;;  %1923 = vrot.lane.b32.xlu0 %v1707_v40, %s6095_s25 }
  0x76   : > { %1720 = vrot.lane.b32.xlu1 %v6294_v43, %s6096_s10  ;;  %1927 = vrot.lane.b32.xlu0 %v6294_v43, %s6095_s25 }
  0x7a   : > { %1925 = vrot.lane.b32.xlu1 %v1715_v41, %s6095_s25  ;;  %2132 = vrot.lane.b32.xlu0 %v1715_v41, %s6097_s11 }
  0x7e   : > { %2130 = vrot.lane.b32.xlu1 %v1707_v40, %s6097_s11 }
  0xb4   : > { %v6304_v44 = vpop.permute.xlu0 %626  ;;  %v386_v45 = vpop.permute.xlu1 %385 }
  0xb8   : > { %v388_v46 = vpop.permute.xlu0 %387  ;;  %v390_v47 = vpop.permute.xlu1 %389 }
  0xb9   : > { %v393_v48 = vsel %vm391_vm0, %v388_v46, %v390_v47  ;;  %v392_v49 = vsel %vm391_vm0, %v386_v45, %v388_v46 }
  0xba   : > { %5719 = vmatprep.subr.msk.bf16.mxu1 %vm318_vm1, %v393_v48  ;;  %v398_v50 = vsel %vm318_vm1, %v392_v49, 0 }
  0xbb   : > { %418 = vmatpush1.bf16.msra.mxu1 %v398_v50 }
  0xbc   : > { %v6310_v51 = vpop.permute.xlu0 %630  ;;  %v6312_v52 = vpop.permute.xlu1 %628 }
  0xbe   : > { %5720 = vmatmul.mubr.msk.bf16.vlgmr.msra.gmra.mxu1 %vm314_vm7, %v6385_v24 }
  0xbf   : > { %615 = vmatprep.mubr.bf16.mxu1 %v8170_v21 }
  0xc0   : > { %v6314_v53 = vpop.permute.xlu1 %857  ;;  %v542_v54 = vpop.permute.xlu0 %541 }
  0xc1   : > { %v543_v55 = vrot.slane %v542_v54, 6 }
  0xc3   : > { %v6316_v56 = vsel %vm544_vm2, %v543_v55, %v542_v54 }
  0xc4   : > { %v773_v57 = vpop.permute.xlu1 %772  ;;  %v547_v58 = vmul.bf16 %v6316_v56, %v6242_v10  ;;  %v1218_v59 = vmul.bf16 %v6266_v34, %v6316_v56  ;;  %v6333_v2 = vmul.bf16 %v6280_v39, %v6316_v56  ;;  %v457_v4 = vpop.permute.xlu0 %456 }
  0xc5   : > { %v774_v60 = vrot.slane %v773_v57, 6  ;;  %v458_v7 = vrot.slane %v457_v4, 6 }
  0xc6   : > { %v556_v61 = vrot.slane %v547_v58, %v6239_v8  ;;  %v6329_v0 = vrot.slane %v1218_v59, %v6239_v8  ;;  %v6345_v9 = vrot.slane %v6333_v2, %v6239_v8  ;;  %v549_v11 = vcombine.high %v547_v58, %v547_v58 }
  0xc7   : > { %v6323_v62 = vsel %vm775_vm3, %v774_v60, %v773_v57  ;;  %v6355_v15 = vsel %vm459_vm5, %v458_v7, %v457_v4  ;;  %v1220_v28 = vcombine.high %v1218_v59, %v1218_v59  ;;  %v1850_v45 = vcombine.high %v6333_v2, %v6333_v2  ;;  %v6475_v2 = vld [vmem:[%s8164_s1] sm:$0x3] }
  0xc8   : > { %565 = vrot.lane.b32.xlu1 %v556_v61, %s6103_s5  ;;  %v778_v63 = vmul.bf16 %v6323_v62, %v6242_v10  ;;  %v688_v1 = vpop.permute.xlu1 %687  ;;  %v6338_v6 = vmul.bf16 %v6266_v34, %v6323_v62  ;;  %v6353_v14 = vmul.bf16 %v6280_v39, %v6323_v62  ;;  %v563_v16 = vrot.slane %v549_v11, %v6239_v8  ;;  %v919_v22 = vpop.permute.xlu0 %918 }
  0xc9   : > { %v689_v3 = vrot.slane %v688_v1, 6  ;;  %v6369_v19 = vmul.bf16 %v6355_v15, %v6242_v10  ;;  %v920_v25 = vrot.slane %v919_v22, 6  ;;  %v564_v27 = vcombine.high %v556_v61, %v556_v61 }
  0xca   : > { %v787_v5 = vrot.slane %v778_v63, %v6239_v8  ;;  %v1434_v13 = vrot.slane %v6338_v6, %v6239_v8  ;;  %v2064_v18 = vrot.slane %v6353_v14, %v6239_v8  ;;  %v780_v29 = vcombine.high %v778_v63, %v778_v63 }
  0xcb   : > { %v6347_v12 = vsel %vm690_vm4, %v689_v3, %v688_v1  ;;  %v6380_v23 = vrot.slane %v6369_v19, %v6239_v8  ;;  %v6396_v30 = vsel %vm921_vm6, %v920_v25, %v919_v22  ;;  %v1234_v32 = vrot.slane %v1220_v28, %v6239_v8 }
  0xcc   : > { %796 = vrot.lane.b32.xlu0 %v787_v5, %s6104_s6  ;;  %1236 = vrot.lane.b32.xlu1 %v6329_v0, %s6103_s5  ;;  %v6363_v17 = vmul.bf16 %v6347_v12, %v6242_v10  ;;  %v795_v26 = vcombine.high %v787_v5, %v787_v5  ;;  %v794_v33 = vrot.slane %v780_v29, %v6239_v8  ;;  %v6495_v11 = vpop.permute.xlu1 %861  ;;  %v6512_v22 = vpop.permute.xlu0 %859 }
  0xcd   : > { %v6405_v35 = vmul.bf16 %v6266_v34, %v6347_v12  ;;  %v6409_v36 = vmul.bf16 %v6396_v30, %v6242_v10  ;;  %v6421_v40 = vmul.bf16 %v6266_v34, %v6355_v15  ;;  %v1442_v41 = vcombine.high %v1434_v13, %v1434_v13 }
  0xce   : > { %v6375_v20 = vrot.slane %v6363_v17, %v6239_v8  ;;  %v1864_v46 = vrot.slane %v1850_v45, %v6239_v8  ;;  %v1235_v47 = vcombine.high %v6329_v0, %v6329_v0  ;;  %v6437_v48 = vmul.bf16 %v6280_v39, %v6347_v12 }
  0xcf   : > { %v6415_v37 = vrot.slane %v6405_v35, %v6239_v8  ;;  %v933_v38 = vrot.slane %v6409_v36, %v6239_v8  ;;  %v1152_v42 = vrot.slane %v6421_v40, %v6239_v8  ;;  %v1427_v49 = vcombine.high %v6338_v6, %v6338_v6 }
  0xd0   : > { %1443 = vrot.lane.b32.xlu0 %v1434_v13, %s6104_s6  ;;  %1866 = vrot.lane.b32.xlu1 %v6345_v9, %s6103_s5  ;;  %v6445_v50 = vrot.slane %v6437_v48, %v6239_v8  ;;  %v6450_v55 = vmul.bf16 %v6266_v34, %v6396_v30  ;;  %v304_v57 = vmul.bf16 %v6259_v31, %v6242_v10  ;;  %v6523_v29 = vpop.permute.xlu0 %1088 }
  0xd1   : > { %v1441_v54 = vrot.slane %v1427_v49, %v6239_v8  ;;  %v2072_v58 = vcombine.high %v2064_v18, %v2064_v18  ;;  %v6461_v60 = vmul.bf16 %v6280_v39, %v6355_v15  ;;  %v479_v10 = vcombine.high %v6380_v23, %v6380_v23 }
  0xd2   : > { %v1566_v59 = vrot.slane %v6450_v55, %v6239_v8  ;;  %v312_v61 = vrot.slane %v304_v57, %v6239_v8  ;;  %v1865_v3 = vcombine.high %v6345_v9, %v6345_v9  ;;  %v695_v4 = vcombine.high %v6363_v17, %v6363_v17 }
  0xd3   : > { %v1782_v1 = vrot.slane %v6461_v60, %v6239_v8  ;;  %v2057_v5 = vcombine.high %v6353_v14, %v6353_v14  ;;  %v464_v9 = vcombine.high %v6369_v19, %v6369_v19  ;;  %v941_v14 = vcombine.high %v933_v38, %v933_v38 }
  0xd4   : > { %2073 = vrot.lane.b32.xlu0 %v2064_v18, %s6104_s6  ;;  %569 = vrot.lane.b32.xlu1 %v563_v16, %s6103_s5  ;;  %v313_v63 = vcombine.high %v312_v61, %v312_v61  ;;  %v320_v0 = vsel %vm318_vm1, %v312_v61, 0  ;;  %v709_v6 = vrot.slane %v695_v4, %v6239_v8  ;;  %v710_v16 = vcombine.high %v6375_v20, %v6375_v20 }
  0xd5   : > { %v2071_v7 = vrot.slane %v2057_v5, %v6239_v8  ;;  %v478_v13 = vrot.slane %v464_v9, %v6239_v8  ;;  %v1160_v17 = vcombine.high %v1152_v42, %v1152_v42  ;;  %v1352_v18 = vcombine.high %v6405_v35, %v6405_v35 }
  0xd6   : > { %5717 = vmatprep.subr.msk.bf16.mxu0 %vm318_vm1, %v313_v63  ;;  %v926_v19 = vcombine.high %v6409_v36, %v6409_v36  ;;  %v1367_v35 = vcombine.high %v6415_v37, %v6415_v37  ;;  %v1982_v36 = vcombine.high %v6437_v48, %v6437_v48 }
  0xd7   : > { %340 = vmatpush1.bf16.msra.mxu0 %v320_v0 }
  0xd8   : > { %711 = vrot.lane.b32.xlu1 %v6375_v20, %s6106_s14  ;;  %480 = vrot.lane.b32.xlu0 %v6380_v23, %s6107_s7  ;;  %v1366_v23 = vrot.slane %v1352_v18, %v6239_v8  ;;  %v940_v25 = vrot.slane %v926_v19, %v6239_v8  ;;  %v1145_v20 = vcombine.high %v6421_v40, %v6421_v40 }
  0xd9   : > { %v2187_v40 = vmul.bf16 %v6280_v39, %v6396_v30 }
  0xda   : > { %5718 = vmatmul.mubr.msk.bf16.vlgmr.msra.gmra.mxu0 %vm314_vm7, %v6475_v2  ;;  %v1159_v28 = vrot.slane %v1145_v20, %v6239_v8 }
  0xdb   : > { %530 = vmatprep.mubr.bf16.mxu0 %v8170_v21  ;;  %v2196_v45 = vrot.slane %v2187_v40, %v6239_v8 }
  0xdc   : > { %798 = vrot.lane.b32.xlu1 %v795_v26, %s6104_s6  ;;  %567 = vrot.lane.b32.xlu0 %v564_v27, %s6103_s5  ;;  %v1574_v27 = vcombine.high %v1566_v59, %v1566_v59 }
  0xdd   : > { %v2204_v39 = vcombine.high %v2196_v45, %v2196_v45 }
  0xe0   : > { %1240 = vrot.lane.b32.xlu1 %v1234_v32, %s6103_s5  ;;  %800 = vrot.lane.b32.xlu0 %v794_v33, %s6104_s6  ;;  %v1790_v33 = vcombine.high %v1782_v1, %v1782_v1 }
  0xe4   : > { %1368 = vrot.lane.b32.xlu1 %v6415_v37, %s6106_s14  ;;  %942 = vrot.lane.b32.xlu0 %v933_v38, %s6108_s8  ;;  %v1559_v38 = vcombine.high %v6450_v55, %v6450_v55 }
  0xe6   : > { %v1573_v37 = vrot.slane %v1559_v38, %v6239_v8 }
  0xe8   : > { %1445 = vrot.lane.b32.xlu1 %v1442_v41, %s6104_s6  ;;  %1161 = vrot.lane.b32.xlu0 %v1152_v42, %s6107_s7  ;;  %v6539_v41 = vpop.permute.xlu0 %1293  ;;  %v1996_v42 = vrot.slane %v1982_v36, %v6239_v8 }
  0xec   : > { %1870 = vrot.lane.b32.xlu1 %v1864_v46, %s6103_s5  ;;  %1238 = vrot.lane.b32.xlu0 %v1235_v47, %s6103_s5  ;;  %v1775_v46 = vcombine.high %v6461_v60, %v6461_v60  ;;  %v6551_v49 = vpop.permute.xlu0 %1297 }
  0xee   : > { %v1789_v48 = vrot.slane %v1775_v46, %v6239_v8 }
  0xf0   : > { %1998 = vrot.lane.b32.xlu1 %v6445_v50, %s6106_s14  ;;  %1447 = vrot.lane.b32.xlu0 %v1441_v54, %s6104_s6  ;;  %v6554_v54 = vld [vmem:[%s6233_s20 + $0x12] sm:$0x3f]  ;;  %v6571_v63 = vpop.permute.xlu0 %1502 }
  0xf1   : > { %8182 = vst [vmem:[#allocation9_spill] sm:$0xff] %v6554_v54  ;;  %v2337_v55 = vrot.slane %v6554_v54, %v6239_v8  ;;  %v2330_v57 = vcombine.high %v6554_v54, %v6554_v54  ;;  %v2403_v60 = vmul.bf16 %v6554_v54, %v6355_v15  ;;  %v2478_v4 = vmul.bf16 %v6554_v54, %v6316_v56 }
  0xf3   : > { %v2344_v61 = vrot.slane %v2330_v57, %v6239_v8  ;;  %v2412_v0 = vrot.slane %v2403_v60, %v6239_v8  ;;  %v2487_v9 = vrot.slane %v2478_v4, %v6239_v8  ;;  %v2405_v18 = vcombine.high %v2403_v60, %v2403_v60 }
  0xf4   : > { %2075 = vrot.lane.b32.xlu1 %v2072_v58, %s6104_s6  ;;  %1575 = vrot.lane.b32.xlu0 %v1566_v59, %s6108_s8  ;;  %v1997_v59 = vcombine.high %v6445_v50, %v6445_v50  ;;  %v6581_v5 = vpop.permute.xlu0 %1718 }
  0xf5   : > { %v2420_v50 = vcombine.high %v2412_v0, %v2412_v0  ;;  %v2419_v19 = vrot.slane %v2405_v18, %v6239_v8 }
  0xf8   : > { %482 = vrot.lane.b32.xlu1 %v479_v10, %s6107_s7  ;;  %1791 = vrot.lane.b32.xlu0 %v1782_v1, %s6107_s7  ;;  %v2189_v10 = vcombine.high %v2187_v40, %v2187_v40 }
  0xfc   : > { %2134 = vrot.lane.b32.xlu1 %v6294_v43, %s6097_s11  ;;  %1868 = vrot.lane.b32.xlu0 %v1865_v3, %s6103_s5  ;;  %v6502_v43 = vpop.permute.xlu1 %1086  ;;  %v2203_v3 = vrot.slane %v2189_v10, %v6239_v8 }
 0x100   : > { %715 = vrot.lane.b32.xlu1 %v709_v6, %s6106_s14  ;;  %2077 = vrot.lane.b32.xlu0 %v2071_v7, %s6104_s6  ;;  %v6518_v26 = vpop.permute.xlu1 %1090  ;;  %v6585_v6 = vcombine.high %v2337_v55, %v2337_v55 }
 0x104   : > { %484 = vrot.lane.b32.xlu0 %v478_v13, %s6107_s7  ;;  %944 = vrot.lane.b32.xlu1 %v941_v14, %s6108_s8  ;;  %v6527_v32 = vpop.permute.xlu1 %1295  ;;  %v2480_v13 = vcombine.high %v2478_v4, %v2478_v4  ;;  %v6593_v14 = vpop.permute.xlu0 %1923 }
 0x105   : > { %8183 = vst [vmem:[#allocation10_spill] sm:$0xff] %v6593_v14 }
 0x108   : > { %713 = vrot.lane.b32.xlu0 %v710_v16, %s6106_s14  ;;  %1163 = vrot.lane.b32.xlu1 %v1160_v17, %s6107_s7  ;;  %v6546_v47 = vpop.permute.xlu1 %1500  ;;  %v2494_v16 = vrot.slane %v2480_v13, %v6239_v8 }
 0x10c   : > { %1372 = vrot.lane.b32.xlu1 %v1366_v23, %s6106_s14  ;;  %946 = vrot.lane.b32.xlu0 %v940_v25, %s6108_s8  ;;  %v6562_v58 = vpop.permute.xlu1 %1504  ;;  %v6601_v23 = vpop.permute.xlu0 %1927  ;;  %v2610_v25 = vmul.bf16 %v6554_v54, %v6347_v12 }
 0x10d   : > { %8185 = vst [vmem:[#allocation12_spill] sm:$0xff] %v6601_v23  ;;  %v1010_v23 = vmul.bf16 %v6266_v34, %v6259_v31 }
 0x110   : > { %1577 = vrot.lane.b32.xlu1 %v1574_v27, %s6108_s8  ;;  %1165 = vrot.lane.b32.xlu0 %v1159_v28, %s6107_s7  ;;  %v6574_v1 = vpop.permute.xlu1 %1716  ;;  %v2619_v27 = vrot.slane %v2610_v25, %v6239_v8  ;;  %v2495_v28 = vcombine.high %v2487_v9, %v2487_v9  ;;  %v6615_v36 = vpop.permute.xlu0 %2132 }
 0x111   : > { %8187 = vst [vmem:[#allocation14_spill] sm:$0xff] %v6615_v36 }
 0x112   : > { %v2627_v57 = vcombine.high %v2619_v27, %v2619_v27 }
 0x114   : > { %1793 = vrot.lane.b32.xlu1 %v1790_v33, %s6107_s7  ;;  %1370 = vrot.lane.b32.xlu0 %v1367_v35, %s6106_s14  ;;  %v6587_v7 = vpop.permute.xlu1 %1720  ;;  %v2612_v33 = vcombine.high %v2610_v25, %v2610_v25  ;;  %v2685_v35 = vmul.bf16 %v6554_v54, %v6323_v62 }
 0x116   : > { %v2626_v40 = vrot.slane %v2612_v33, %v6239_v8 }
 0x118   : > { %2002 = vrot.lane.b32.xlu1 %v1996_v42, %s6106_s14  ;;  %1579 = vrot.lane.b32.xlu0 %v1573_v37, %s6108_s8  ;;  %v6596_v17 = vpop.permute.xlu1 %1925  ;;  %v2694_v42 = vrot.slane %v2685_v35, %v6239_v8 }
 0x119   : > { %8184 = vst [vmem:[#allocation11_spill] sm:$0xff] %v6596_v17 }
 0x11a   : > { %v2702_v46 = vcombine.high %v2694_v42, %v2694_v42 }
 0x11c   : > { %2207 = vrot.lane.b32.xlu1 %v2204_v39, %s6108_s8  ;;  %1795 = vrot.lane.b32.xlu0 %v1789_v48, %s6107_s7  ;;  %v6608_v20 = vpop.permute.xlu1 %2130 }
 0x11d   : > { %8186 = vst [vmem:[#allocation13_spill] sm:$0xff] %v6608_v20 }
 0x120   : > { %2346 = vrot.lane.b32.xlu1 %v2337_v55, %s6096_s10  ;;  %2000 = vrot.lane.b32.xlu0 %v1997_v59, %s6106_s14  ;;  %v2817_v59 = vmul.bf16 %v6554_v54, %v6396_v30 }
 0x122   : > { %v2826_v10 = vrot.slane %v2817_v59, %v6239_v8 }
 0x124   : > { %2350 = vrot.lane.b32.xlu1 %v2344_v61, %s6096_s10  ;;  %2205 = vrot.lane.b32.xlu0 %v2196_v45, %s6108_s8 }
 0x128   : > { %2423 = vrot.lane.b32.xlu1 %v2420_v50, %s6107_s7  ;;  %2209 = vrot.lane.b32.xlu0 %v2203_v3, %s6108_s8  ;;  %v2687_v50 = vcombine.high %v2685_v35, %v2685_v35 }
 0x12a   : > { %v2701_v13 = vrot.slane %v2687_v50, %v6239_v8 }
 0x12c   : > { %2496 = vrot.lane.b32.xlu1 %v2487_v9, %s6103_s5  ;;  %2348 = vrot.lane.b32.xlu0 %v6585_v6, %s6096_s10  ;;  %v2834_v9 = vcombine.high %v2826_v10, %v2826_v10 }
 0x130   : > { %2500 = vrot.lane.b32.xlu1 %v2494_v16, %s6103_s5  ;;  %2421 = vrot.lane.b32.xlu0 %v2412_v0, %s6107_s7 }
 0x134   : > { %2555 = vrot.lane.b32.xlu1 %v6585_v6, %s6095_s25  ;;  %2425 = vrot.lane.b32.xlu0 %v2419_v19, %s6107_s7 }
 0x138   : > { %2628 = vrot.lane.b32.xlu1 %v2619_v27, %s6106_s14  ;;  %2498 = vrot.lane.b32.xlu0 %v2495_v28, %s6103_s5 }
 0x13a   : > { %v566_v38 = vpop.permute.xlu1 %565 }
 0x13c   : > { %2632 = vrot.lane.b32.xlu1 %v2626_v40, %s6106_s14  ;;  %2553 = vrot.lane.b32.xlu0 %v2337_v55, %s6095_s25 }
 0x13e   : > { %v6621_v37 = vpop.permute.xlu1 %1236  ;;  %v6623_v45 = vpop.permute.xlu0 %796 }
 0x140   : > { %2705 = vrot.lane.b32.xlu1 %v2702_v46, %s6104_s6  ;;  %2557 = vrot.lane.b32.xlu0 %v2344_v61, %s6095_s25  ;;  %v2819_v46 = vcombine.high %v2817_v59, %v2817_v59 }
 0x142   : > { %v6627_v39 = vpop.permute.xlu1 %1866  ;;  %v6629_v48 = vpop.permute.xlu0 %1443  ;;  %v2833_v59 = vrot.slane %v2819_v46, %v6239_v8 }
 0x144   : > { %2760 = vrot.lane.b32.xlu1 %v2337_v55, %s6097_s11  ;;  %2630 = vrot.lane.b32.xlu0 %v2627_v57, %s6106_s14  ;;  %v6646_v55 = vld [vmem:[%s6233_s20 + $0x18] sm:$0x3f]  ;;  %v6679_v57 = vld [vmem:[%s8164_s1 + $0x6] sm:$0x3] }
 0x145   : > { %8189 = vst [vmem:[#allocation16_spill] sm:$0xff] %v6646_v55  ;;  %v6652_v16 = vrot.slane %v6646_v55, %v6239_v8  ;;  %v3033_v25 = vmul.bf16 %v6646_v55, %v6355_v15  ;;  %v3315_v36 = vmul.bf16 %v6646_v55, %v6323_v62 }
 0x146   : > { %v570_v60 = vpop.permute.xlu1 %569  ;;  %v6635_v0 = vpop.permute.xlu0 %2073 }
 0x147   : > { %8188 = vst [vmem:[#allocation15_spill] sm:$0xff] %v6635_v0  ;;  %v3240_v0 = vmul.bf16 %v6646_v55, %v6347_v12 }
 0x148   : > { %2764 = vrot.lane.b32.xlu1 %v2344_v61, %s6097_s11  ;;  %2703 = vrot.lane.b32.xlu0 %v2694_v42, %s6104_s6  ;;  %v2960_v61 = vcombine.high %v6646_v55, %v6646_v55 }
 0x149   : > { %v3242_v20 = vcombine.high %v3240_v0, %v3240_v0 }
 0x14a   : > { %v6640_v3 = vpop.permute.xlu1 %711  ;;  %v6642_v4 = vpop.permute.xlu0 %480  ;;  %v6668_v35 = vrot.slane %v2960_v61, %v6239_v8 }
 0x14c   : > { %2837 = vrot.lane.b32.xlu1 %v2834_v9, %s6108_s8  ;;  %2707 = vrot.lane.b32.xlu0 %v2701_v13, %s6104_s6  ;;  %v3108_v9 = vmul.bf16 %v6646_v55, %v6316_v56 }
 0x14e   : > { %v6656_v18 = vpop.permute.xlu1 %798  ;;  %v568_v19 = vpop.permute.xlu0 %567 }
 0x14f   : > { %v572_v27 = vsel %vm571_vm8, %v566_v38, %v568_v19  ;;  %v573_v28 = vsel %vm571_vm8, %v568_v19, %v570_v60  ;;  %v3042_v38 = vrot.slane %v3033_v25, %v6239_v8  ;;  %v3117_v19 = vrot.slane %v3108_v9, %v6239_v8 }
 0x150   : > { %2976 = vrot.lane.b32.xlu1 %v6652_v16, %s6096_s10  ;;  %2762 = vrot.lane.b32.xlu0 %v6585_v6, %s6097_s11  ;;  %v578_v33 = vsel %vm318_vm1, %v572_v27, 0  ;;  %v3110_v27 = vcombine.high %v3108_v9, %v3108_v9 }
 0x151   : > { %5723 = vmatprep.subr.msk.bf16.mxu1 %vm318_vm1, %v573_v28  ;;  %v3050_v50 = vcombine.high %v3042_v38, %v3042_v38 }
 0x152   : > { %598 = vmatpush1.bf16.msra.mxu1 %v578_v33  ;;  %v6671_v40 = vpop.permute.xlu1 %1240  ;;  %v6673_v42 = vpop.permute.xlu0 %800  ;;  %v3124_v46 = vrot.slane %v3110_v27, %v6239_v8 }
 0x154   : > { %2980 = vrot.lane.b32.xlu1 %v6668_v35, %s6096_s10  ;;  %2835 = vrot.lane.b32.xlu0 %v2826_v10, %s6108_s8  ;;  %v6698_v10 = vcombine.high %v6652_v16, %v6652_v16 }
 0x155   : > { %5724 = vmatmul.mubr.msk.bf16.vlgmr.msra.gmra.mxu1 %vm314_vm7, %v6679_v57 }
 0x156   : > { %v6686_v6 = vpop.permute.xlu1 %1368  ;;  %v6688_v60 = vpop.permute.xlu0 %942  ;;  %761 = vmatprep.mubr.bf16.mxu1 %v8170_v21 }
 0x158   : > { %3053 = vrot.lane.b32.xlu1 %v3050_v50, %s6107_s7  ;;  %2839 = vrot.lane.b32.xlu0 %v2833_v59, %s6108_s8  ;;  %v3035_v50 = vcombine.high %v3033_v25, %v3033_v25 }
 0x15a   : > { %v6700_v13 = vpop.permute.xlu1 %1445  ;;  %v6702_v61 = vpop.permute.xlu0 %1161  ;;  %v3049_v9 = vrot.slane %v3035_v50, %v6239_v8 }
 0x15c   : > { %3126 = vrot.lane.b32.xlu1 %v3117_v19, %s6103_s5  ;;  %2978 = vrot.lane.b32.xlu0 %v6698_v10, %s6096_s10 }
 0x15e   : > { %v6708_v28 = vpop.permute.xlu1 %1870  ;;  %v6710_v33 = vpop.permute.xlu0 %1238 }
 0x160   : > { %3130 = vrot.lane.b32.xlu1 %v3124_v46, %s6103_s5  ;;  %3051 = vrot.lane.b32.xlu0 %v3042_v38, %s6107_s7  ;;  %v3249_v38 = vrot.slane %v3240_v0, %v6239_v8  ;;  %v3125_v46 = vcombine.high %v3117_v19, %v3117_v19 }
 0x162   : > { %v6715_v59 = vpop.permute.xlu1 %1998  ;;  %v6717_v21 = vpop.permute.xlu0 %1447 }
 0x163   : > { %8190 = vst [vmem:[#allocation17_spill] sm:$0xff] %v6715_v59 }
 0x164   : > { %3185 = vrot.lane.b32.xlu1 %v6698_v10, %s6095_s25  ;;  %3055 = vrot.lane.b32.xlu0 %v3049_v9, %s6107_s7  ;;  %v3256_v9 = vrot.slane %v3242_v20, %v6239_v8  ;;  %v3257_v20 = vcombine.high %v3249_v38, %v3249_v38 }
 0x166   : > { %v6725_v27 = vpop.permute.xlu1 %2075  ;;  %v6727_v25 = vpop.permute.xlu0 %1575 }
 0x167   : > { %8191 = vst [vmem:[#allocation18_spill] sm:$0xff] %v6725_v27  ;;  %v3324_v27 = vrot.slane %v3315_v36, %v6239_v8 }
 0x168   : > { %3258 = vrot.lane.b32.xlu1 %v3249_v38, %s6106_s14  ;;  %3128 = vrot.lane.b32.xlu0 %v3125_v46, %s6103_s5  ;;  %v3317_v38 = vcombine.high %v3315_v36, %v3315_v36  ;;  %v633_v36 = vsel %vm632_vm10, %v6304_v44, %v6312_v52 }
 0x169   : > { %v3332_v54 = vcombine.high %v3324_v27, %v3324_v27 }
 0x16a   : > { %v483_v50 = vpop.permute.xlu1 %482  ;;  %v6734_v14 = vpop.permute.xlu0 %1791 }
 0x16c   : > { %3262 = vrot.lane.b32.xlu1 %v3256_v9, %s6106_s14  ;;  %3183 = vrot.lane.b32.xlu0 %v6652_v16, %s6095_s25  ;;  %v6752_v9 = vmul.bf16 %v6646_v55, %v6396_v30 }
 0x16e   : > { %v6741_v0 = vpop.permute.xlu1 %2134  ;;  %v6743_v19 = vpop.permute.xlu0 %1868 }
 0x16f   : > { %8192 = vst [vmem:[#allocation19_spill] sm:$0xff] %v6741_v0 }
 0x170   : > { %3335 = vrot.lane.b32.xlu1 %v3332_v54, %s6104_s6  ;;  %3187 = vrot.lane.b32.xlu0 %v6668_v35, %s6095_s25  ;;  %v487_v54 = vsel %vm486_vm9, %v6642_v4, %v483_v50 }
 0x171   : > { %v493_v4 = vsel %vm318_vm1, %v487_v54, 0  ;;  %v1018_v54 = vrot.slane %v1010_v23, %v6239_v8  ;;  %v639_v23 = vsel %vm318_vm1, %v633_v36, 0 }
 0x172   : > { %v716_v46 = vpop.permute.xlu1 %715  ;;  %v6748_v59 = vpop.permute.xlu0 %2077 }
 0x173   : > { %8193 = vst [vmem:[#allocation20_spill] sm:$0xff] %v6748_v59  ;;  %v3456_v59 = vrot.slane %v6752_v9, %v6239_v8 }
 0x174   : > { %3390 = vrot.lane.b32.xlu1 %v6652_v16, %s6097_s11  ;;  %3260 = vrot.lane.b32.xlu0 %v3257_v20, %s6106_s14  ;;  %v634_v16 = vsel %vm632_vm10, %v6312_v52, %v6310_v51  ;;  %v6790_v20 = vld [vmem:[%s6233_s20 + $0x1e] sm:$0x3f] }
 0x175   : > { %v6798_v52 = vrot.slane %v6790_v20, %v6239_v8  ;;  %v6824_v36 = vmul.bf16 %v6790_v20, %v6355_v15 }
 0x176   : > { %v6759_v0 = vpop.permute.xlu1 %944  ;;  %v485_v17 = vpop.permute.xlu0 %484 }
 0x177   : > { %v488_v55 = vsel %vm486_vm9, %v483_v50, %v485_v17 }
 0x178   : > { %3394 = vrot.lane.b32.xlu1 %v6668_v35, %s6097_s11  ;;  %3333 = vrot.lane.b32.xlu0 %v3324_v27, %s6104_s6  ;;  %v3464_v35 = vcombine.high %v3456_v59, %v3456_v59  ;;  %v3331_v27 = vrot.slane %v3317_v38, %v6239_v8  ;;  %v865_v38 = vsel %vm863_vm12, %v6512_v22, %v6495_v11 }
 0x179   : > { %5721 = vmatprep.subr.msk.bf16.mxu0 %vm318_vm1, %v488_v55  ;;  %v6783_v55 = vld [vmem:[%s8164_s1 + $0x4] sm:$0x3]  ;;  %v1019_v11 = vcombine.high %v1018_v54, %v1018_v54 }
 0x17a   : > { %513 = vmatpush1.bf16.msra.mxu0 %v493_v4  ;;  %v6774_v17 = vpop.permute.xlu1 %1163  ;;  %v714_v34 = vpop.permute.xlu0 %713  ;;  %v804_v4 = vsel %vm802_vm13, %v6656_v18, %v6673_v42 }
 0x17b   : > { %v718_v50 = vsel %vm717_vm11, %v6640_v3, %v714_v34  ;;  %5725 = vmatprep.subr.msk.bf16.mxu0 %vm318_vm1, %v634_v16  ;;  %v719_v44 = vsel %vm717_vm11, %v714_v34, %v716_v46  ;;  %v3590_v3 = vcombine.high %v6790_v20, %v6790_v20  ;;  %v864_v46 = vsel %vm863_vm12, %v6314_v53, %v6512_v22  ;;  %v6820_v16 = vld [vmem:[%s8164_s1 + $0xa] sm:$0x3] }
 0x17c   : > { %3467 = vrot.lane.b32.xlu1 %v3464_v35, %s6108_s8  ;;  %3337 = vrot.lane.b32.xlu0 %v3331_v27, %s6104_s6  ;;  %v724_v51 = vsel %vm318_vm1, %v718_v50, 0  ;;  %v870_v42 = vsel %vm318_vm1, %v864_v46, 0  ;;  %v8194_v35 = vmov 0   ;;  %v803_v27 = vsel %vm802_vm13, %v6623_v45, %v6656_v18 }
 0x17d   : > { %5722 = vmatmul.mubr.msk.bf16.vlgmr.msra.gmra.mxu0 %vm314_vm7, %v6783_v55  ;;  %5727 = vmatprep.subr.msk.bf16.mxu1 %vm318_vm1, %v719_v44  ;;  %v6833_v22 = vrot.slane %v3590_v3, %v6239_v8  ;;  %v3449_v3 = vcombine.high %v6752_v9, %v6752_v9  ;;  %v809_v45 = vsel %vm318_vm1, %v803_v27, 0  ;;  %v3738_v18 = vmul.bf16 %v6790_v20, %v6316_v56 }
 0x17e   : > { %659 = vmatpush1.bf16.msra.mxu0 %v639_v23  ;;  %744 = vmatpush1.bf16.msra.mxu1 %v724_v51  ;;  %v6815_v34 = vpop.permute.xlu1 %1372  ;;  %v947_v53 = vpop.permute.xlu0 %946  ;;  %v3672_v51 = vrot.slane %v6824_v36, %v6239_v8  ;;  %v949_v27 = vsel %vm948_vm14, %v6688_v60, %v6759_v0 }
 0x17f   : > { %5729 = vmatprep.subr.msk.bf16.mxu0 %vm318_vm1, %v804_v4  ;;  %5731 = vmatprep.subr.msk.bf16.mxu1 %vm318_vm1, %v865_v38  ;;  %v950_v46 = vsel %vm948_vm14, %v6759_v0, %v947_v53  ;;  %v6873_v4 = vld [vmem:[%s8164_s1 + $0xe] sm:$0x3]  ;;  %v6882_v53 = vcombine.high %v6798_v52, %v6798_v52  ;;  %v955_v60 = vsel %vm318_vm1, %v949_v27, 0  ;;  %v1093_v0 = vsel %vm391_vm0, %v6523_v29, %v6518_v26 }
 0x180   : > { %3606 = vrot.lane.b32.xlu1 %v6798_v52, %s6096_s10  ;;  %3392 = vrot.lane.b32.xlu0 %v6698_v10, %s6097_s11  ;;  %v6847_v10 = vld [vmem:[%s8164_s1 + $0x8] sm:$0x3]  ;;  %v3680_v38 = vcombine.high %v3672_v51, %v3672_v51  ;;  %v3665_v27 = vcombine.high %v6824_v36, %v6824_v36  ;;  %v1092_v26 = vsel %vm391_vm0, %v6502_v43, %v6523_v29  ;;  %v6943_v43 = vld [vmem:[%s8164_s1 + $0x10] sm:$0x3] }
 0x181   : > { %5728 = vmatmul.mubr.msk.bf16.vlgmr.msra.gmra.mxu1 %vm314_vm7, %v6820_v16  ;;  %676 = vmatprep.mubr.bf16.mxu0 %v8194_v35  ;;  %v3870_v29 = vmul.bf16 %v6790_v20, %v6347_v12 }
 0x182   : > { %890 = vmatpush1.bf16.msra.mxu1 %v870_v42  ;;  %v6842_v50 = vpop.permute.xlu1 %1577  ;;  %v1166_v44 = vpop.permute.xlu0 %1165  ;;  %907 = vmatprep.mubr.bf16.mxu1 %v8194_v35  ;;  %v3747_v42 = vrot.slane %v3738_v18, %v6239_v8 }
 0x183   : > { %5736 = vmatprep.subr.msk.bf16.mxu1 %vm318_vm1, %v1019_v11  ;;  %v1021_v11 = vsel %vm318_vm1, %v1018_v54, 0  ;;  %v1168_v54 = vsel %vm486_vm9, %v6774_v17, %v1166_v44  ;;  %v1167_v44 = vsel %vm486_vm9, %v6702_v61, %v6774_v17  ;;  %v1300_v17 = vsel %vm632_vm10, %v6527_v32, %v6551_v49 }
 0x184   : > { %3610 = vrot.lane.b32.xlu1 %v6833_v22, %s6096_s10  ;;  %3465 = vrot.lane.b32.xlu0 %v3456_v59, %s6108_s8  ;;  %v3463_v59 = vrot.slane %v3449_v3, %v6239_v8  ;;  %v1170_v61 = vsel %vm318_vm1, %v1167_v44, 0  ;;  %v1299_v49 = vsel %vm632_vm10, %v6539_v41, %v6527_v32  ;;  %v1243_v44 = vsel %vm571_vm8, %v6710_v33, %v6671_v40 }
 0x185   : > { %5726 = vmatmul.mubr.msk.bf16.vlgmr.msra.gmra.mxu0 %vm314_vm7, %v6847_v10  ;;  %v3879_v32 = vrot.slane %v3870_v29, %v6239_v8  ;;  %v3872_v41 = vcombine.high %v3870_v29, %v3870_v29 }
 0x186   : > { %829 = vmatpush1.bf16.msra.mxu0 %v809_v45  ;;  %v6865_v9 = vpop.permute.xlu1 %1793  ;;  %v6867_v23 = vpop.permute.xlu0 %1370  ;;  %846 = vmatprep.mubr.bf16.mxu0 %v8194_v35 }
 0x187   : > { %5733 = vmatprep.subr.msk.bf16.mxu0 %vm318_vm1, %v950_v46  ;;  %v6899_v46 = vld [vmem:[%s8164_s1 + $0xc] sm:$0x3]  ;;  %v3886_v29 = vrot.slane %v3872_v41, %v6239_v8 }
 0x188   : > { %3683 = vrot.lane.b32.xlu1 %v3680_v38, %s6107_s7  ;;  %3469 = vrot.lane.b32.xlu0 %v3463_v59, %s6108_s8  ;;  %v3740_v38 = vcombine.high %v3738_v18, %v3738_v18 }
 0x189   : > { %5732 = vmatmul.mubr.msk.bf16.vlgmr.msra.gmra.mxu1 %vm314_vm7, %v6873_v4 }
 0x18a   : > { %1041 = vmatpush1.bf16.msra.mxu1 %v1021_v11  ;;  %v6892_v3 = vpop.permute.xlu1 %2002  ;;  %v6894_v45 = vpop.permute.xlu0 %1579  ;;  %1058 = vmatprep.mubr.bf16.mxu1 %v8194_v35  ;;  %v3754_v11 = vrot.slane %v3740_v38, %v6239_v8  ;;  %v1095_v38 = vsel %vm318_vm1, %v1092_v26, 0  ;;  %v1242_v26 = vsel %vm571_vm8, %v6621_v37, %v6710_v33  ;;  %v1449_v37 = vsel %vm802_vm13, %v6629_v48, %v6700_v13 }
 0x18b   : > { %5740 = vmatprep.subr.msk.bf16.mxu1 %vm318_vm1, %v1168_v54  ;;  %v1375_v33 = vsel %vm717_vm11, %v6867_v23, %v6815_v34  ;;  %v7018_v48 = vmul.bf16 %v6790_v20, %v6396_v30  ;;  %v1582_v34 = vsel %vm948_vm14, %v6842_v50, %v6894_v45  ;;  %v1581_v45 = vsel %vm948_vm14, %v6727_v25, %v6842_v50 }
 0x18c   : > { %3756 = vrot.lane.b32.xlu1 %v3747_v42, %s6103_s5  ;;  %3608 = vrot.lane.b32.xlu0 %v6882_v53, %s6096_s10  ;;  %v1506_v25 = vsel %vm863_vm12, %v6546_v47, %v6571_v63  ;;  %v1584_v50 = vsel %vm318_vm1, %v1581_v45, 0  ;;  %v7077_v47 = vld [vmem:[%s6233_s20 + $0x24] sm:$0x3f] }
 0x18d   : > { %5730 = vmatmul.mubr.msk.bf16.vlgmr.msra.gmra.mxu0 %vm314_vm7, %v6899_v46 }
 0x18e   : > { %975 = vmatpush1.bf16.msra.mxu0 %v955_v60  ;;  %v6915_v18 = vpop.permute.xlu1 %2207  ;;  %v6917_v59 = vpop.permute.xlu0 %1795  ;;  %992 = vmatprep.mubr.bf16.mxu0 %v8194_v35  ;;  %v3755_v60 = vcombine.high %v3747_v42, %v3747_v42  ;;  %v1302_v42 = vsel %vm318_vm1, %v1299_v49, 0 }
 0x18f   : > { %5738 = vmatprep.subr.msk.bf16.mxu0 %vm318_vm1, %v1093_v0  ;;  %v6960_v0 = vmul.bf16 %v6790_v20, %v6323_v62 }
 0x190   : > { %3760 = vrot.lane.b32.xlu1 %v3754_v11, %s6103_s5  ;;  %3681 = vrot.lane.b32.xlu0 %v3672_v51, %s6107_s7  ;;  %v3679_v51 = vrot.slane %v3665_v27, %v6239_v8 }
 0x191   : > { %5737 = vmatmul.mubr.msk.bf16.vlgmr.msra.gmra.mxu1 %vm314_vm7, %v6475_v2  ;;  %v3954_v40 = vrot.slane %v6960_v0, %v6239_v8 }
 0x192   : > { %1190 = vmatpush1.bf16.msra.mxu1 %v1170_v61  ;;  %v6935_v36 = vpop.permute.xlu1 %2346  ;;  %v6937_v54 = vpop.permute.xlu0 %2000  ;;  %1207 = vmatprep.mubr.bf16.mxu1 %v8194_v35  ;;  %v1450_v61 = vsel %vm802_vm13, %v6700_v13, %v6717_v21  ;;  %v1245_v21 = vsel %vm318_vm1, %v1242_v26, 0  ;;  %v1374_v13 = vsel %vm717_vm11, %v6686_v6, %v6867_v23  ;;  %v5985_v26 = vld [vmem:[%s6233_s20 + $0xc] sm:$0x3f]  ;;  %v1507_v23 = vsel %vm863_vm12, %v6571_v63, %v6562_v58 }
 0x193   : > { %5744 = vmatprep.subr.msk.bf16.mxu1 %vm318_vm1, %v1300_v17  ;;  %v1377_v6 = vsel %vm318_vm1, %v1374_v13, 0  ;;  %v1722_v13 = vsel %vm391_vm0, %v6574_v1, %v6581_v5 }
 0x194   : > { %3815 = vrot.lane.b32.xlu1 %v6882_v53, %s6095_s25  ;;  %3685 = vrot.lane.b32.xlu0 %v3679_v51, %s6107_s7 }
 0x195   : > { %5734 = vmatmul.mubr.msk.bf16.vlgmr.msra.gmra.mxu0 %vm314_vm7, %v6943_v43 }
 0x196   : > { %1115 = vmatpush1.bf16.msra.mxu0 %v1095_v38  ;;  %v6965_v11 = vpop.permute.xlu1 %2350  ;;  %v6967_v27 = vpop.permute.xlu0 %2205  ;;  %1132 = vmatprep.mubr.bf16.mxu0 %v8194_v35 }
 0x197   : > { %5742 = vmatprep.subr.msk.bf16.mxu0 %vm318_vm1, %v1243_v44 }
 0x198   : > { %3888 = vrot.lane.b32.xlu1 %v3879_v32, %s6106_s14  ;;  %3758 = vrot.lane.b32.xlu0 %v3755_v60, %s6103_s5  ;;  %v3962_v60 = vcombine.high %v3954_v40, %v3954_v40 }
 0x199   : > { %5741 = vmatmul.mubr.msk.bf16.vlgmr.msra.gmra.mxu1 %vm314_vm7, %v6783_v55 }
 0x19a   : > { %1322 = vmatpush1.bf16.msra.mxu1 %v1302_v42  ;;  %v6985_v17 = vpop.permute.xlu1 %2423  ;;  %v6987_v51 = vpop.permute.xlu0 %2209  ;;  %1339 = vmatprep.mubr.bf16.mxu1 %v8194_v35  ;;  %v3887_v42 = vcombine.high %v3879_v32, %v3879_v32 }
 0x19b   : > { %5748 = vmatprep.subr.msk.bf16.mxu1 %vm318_vm1, %v1450_v61  ;;  %v1640_v61 = vmul.bf16 %v5985_v26, %v6259_v31  ;;  %v7100_v26 = vmul.bf16 %v7077_v47, %v6355_v15 }
 0x19c   : > { %3892 = vrot.lane.b32.xlu1 %v3886_v29, %s6106_s14  ;;  %3813 = vrot.lane.b32.xlu0 %v6798_v52, %s6095_s25 }
 0x19d   : > { %5739 = vmatmul.mubr.msk.bf16.vlgmr.msra.gmra.mxu0 %vm314_vm7, %v6385_v24  ;;  %v1452_v24 = vsel %vm318_vm1, %v1449_v37, 0  ;;  %v1648_v58 = vrot.slane %v1640_v61, %v6239_v8  ;;  %v1725_v61 = vsel %vm318_vm1, %v1722_v13, 0  ;;  %v1797_v13 = vsel %vm486_vm9, %v6734_v14, %v6865_v9  ;;  %v8197_v14 = vld [vmem:[#allocation12_spill] sm:$0xff] }
 0x19e   : > { %1265 = vmatpush1.bf16.msra.mxu0 %v1245_v21  ;;  %v7004_v49 = vpop.permute.xlu1 %2496  ;;  %v7006_v38 = vpop.permute.xlu0 %2348  ;;  %1282 = vmatprep.mubr.bf16.mxu0 %v8194_v35  ;;  %v3947_v21 = vcombine.high %v6960_v0, %v6960_v0  ;;  %v1723_v0 = vsel %vm391_vm0, %v6581_v5, %v6587_v7  ;;  %v7083_v7 = vrot.slane %v7077_v47, %v6239_v8 }
 0x19f   : > { %5746 = vmatprep.subr.msk.bf16.mxu0 %vm318_vm1, %v1375_v33  ;;  %v1649_v63 = vcombine.high %v1648_v58, %v1648_v58  ;;  %v7110_v5 = vpop.f32.mrf.mxu1 }
 0x1a0   : > { %3965 = vrot.lane.b32.xlu1 %v3962_v60, %s6104_s6  ;;  %3817 = vrot.lane.b32.xlu0 %v6833_v22, %s6095_s25  ;;  %v4220_v60 = vcombine.high %v7077_v47, %v7077_v47  ;;  %8195 = vst [vmem:[#allocation21_spill] sm:$0xff] %v7110_v5 }
 0x1a1   : > { %5745 = vmatmul.mubr.msk.bf16.vlgmr.msra.gmra.mxu1 %vm314_vm7, %v6847_v10 }
 0x1a2   : > { %1472 = vmatpush1.bf16.msra.mxu1 %v1452_v24  ;;  %v7026_v44 = vpop.permute.xlu1 %2500  ;;  %v7028_v41 = vpop.permute.xlu0 %2421  ;;  %1489 = vmatprep.mubr.bf16.mxu1 %v8194_v35  ;;  %v1509_v24 = vsel %vm318_vm1, %v1506_v25, 0  ;;  %v7108_v1 = vrot.slane %v4220_v60, %v6239_v8  ;;  %v1651_v25 = vsel %vm318_vm1, %v1648_v58, 0  ;;  %v1798_v58 = vsel %vm486_vm9, %v6865_v9, %v6917_v59  ;;  %v8198_v9 = vld [vmem:[#allocation11_spill] sm:$0xff] }
 0x1a3   : > { %5752 = vmatprep.subr.msk.bf16.mxu1 %vm318_vm1, %v1582_v34 }
 0x1a4   : > { %4020 = vrot.lane.b32.xlu1 %v6798_v52, %s6097_s11  ;;  %3890 = vrot.lane.b32.xlu0 %v3887_v42, %s6106_s14  ;;  %v4086_v52 = vrot.slane %v7018_v48, %v6239_v8 }
 0x1a5   : > { %5743 = vmatmul.mubr.msk.bf16.vlgmr.msra.gmra.mxu0 %vm314_vm7, %v6679_v57 }
 0x1a6   : > { %1397 = vmatpush1.bf16.msra.mxu0 %v1377_v6  ;;  %v7046_v32 = vpop.permute.xlu1 %2555  ;;  %v7048_v29 = vpop.permute.xlu0 %2425  ;;  %1414 = vmatprep.mubr.bf16.mxu0 %v8194_v35  ;;  %v4079_v6 = vcombine.high %v7018_v48, %v7018_v48 }
 0x1a7   : > { %5750 = vmatprep.subr.msk.bf16.mxu0 %vm318_vm1, %v1507_v23  ;;  %v1873_v23 = vsel %vm571_vm8, %v6743_v19, %v6708_v28  ;;  %v7132_v48 = vpop.f32.mrf.mxu1 }
 0x1a8   : > { %4024 = vrot.lane.b32.xlu1 %v6833_v22, %s6097_s11  ;;  %3963 = vrot.lane.b32.xlu0 %v3954_v40, %s6104_s6  ;;  %v4094_v22 = vcombine.high %v4086_v52, %v4086_v52  ;;  %v3961_v40 = vrot.slane %v3947_v21, %v6239_v8  ;;  %v4302_v21 = vrot.slane %v7100_v26, %v6239_v8 }
 0x1a9   : > { %5749 = vmatmul.mubr.msk.bf16.vlgmr.msra.gmra.mxu1 %vm314_vm7, %v6899_v46  ;;  %8196 = vst [vmem:[#allocation22_spill] sm:$0xff] %v7132_v48  ;;  %v4093_v28 = vrot.slane %v4079_v6, %v6239_v8 }
 0x1aa   : > { %1604 = vmatpush1.bf16.msra.mxu1 %v1584_v50  ;;  %v7069_v37 = vpop.permute.xlu1 %2628  ;;  %v7071_v33 = vpop.permute.xlu0 %2498  ;;  %1621 = vmatprep.mubr.bf16.mxu1 %v8194_v35  ;;  %v4368_v50 = vmul.bf16 %v7077_v47, %v6316_v56 }
 0x1ab   : > { %5757 = vmatprep.subr.msk.bf16.mxu1 %vm318_vm1, %v1723_v0  ;;  %v1872_v0 = vsel %vm571_vm8, %v6627_v39, %v6743_v19  ;;  %v7155_v39 = vcombine.high %v7083_v7, %v7083_v7  ;;  %v7160_v19 = vld [vmem:[%s8164_s1 + $0x2] sm:$0x3] }
 0x1ac   : > { %4097 = vrot.lane.b32.xlu1 %v4094_v22, %s6108_s8  ;;  %3967 = vrot.lane.b32.xlu0 %v3961_v40, %s6104_s6  ;;  %v4310_v40 = vcombine.high %v4302_v21, %v4302_v21  ;;  %v1875_v59 = vsel %vm318_vm1, %v1872_v0, 0  ;;  %v4377_v60 = vrot.slane %v4368_v50, %v6239_v8  ;;  %v1800_v0 = vsel %vm318_vm1, %v1797_v13, 0  ;;  %v8201_v13 = vld [vmem:[#allocation9_spill] sm:$0xff] }
 0x1ad   : > { %5747 = vmatmul.mubr.msk.bf16.vlgmr.msra.gmra.mxu0 %vm314_vm7, %v6820_v16 }
 0x1ae   : > { %1529 = vmatpush1.bf16.msra.mxu0 %v1509_v24  ;;  %v7093_v34 = vpop.permute.xlu1 %2632  ;;  %v7095_v42 = vpop.permute.xlu0 %2553  ;;  %1546 = vmatprep.mubr.bf16.mxu0 %v8194_v35 }
 0x1af   : > { %5755 = vmatprep.subr.msk.bf16.mxu0 %vm318_vm1, %v1649_v63  ;;  %v441_v63 = vpop.f32.mrf.mxu1 }
 0x1b0   : > { %4236 = vrot.lane.b32.xlu1 %v7083_v7, %s6096_s10  ;;  %4022 = vrot.lane.b32.xlu0 %v6882_v53, %s6097_s11 }
 0x1b1   : > { %5753 = vmatmul.mubr.msk.bf16.vlgmr.msra.gmra.mxu1 %vm314_vm7, %v6943_v43  ;;  %v442_v24 = vpop.f32.mrf.mxu1 }
 0x1b2   : > { %1745 = vmatpush1.bf16.msra.mxu1 %v1725_v61  ;;  %v7120_v45 = vpop.permute.xlu1 %2705  ;;  %v7122_v53 = vpop.permute.xlu0 %2557  ;;  %1762 = vmatprep.mubr.bf16.mxu1 %v8194_v35  ;;  %v2005_v61 = vsel %vm717_vm11, %v6937_v54, %v6892_v3  ;;  %v1930_v3 = vsel %vm632_vm10, %v8198_v9, %v8197_v14 }
 0x1b3   : > { %5761 = vmatprep.subr.msk.bf16.mxu1 %vm318_vm1, %v1873_v23 }
 0x1b4   : > { %4240 = vrot.lane.b32.xlu1 %v7108_v1, %s6096_s10  ;;  %4095 = vrot.lane.b32.xlu0 %v4086_v52, %s6108_s8 }
 0x1b5   : > { %5751 = vmatmul.mubr.msk.bf16.vlgmr.msra.gmra.mxu0 %vm314_vm7, %v6873_v4 }
 0x1b6   : > { %1671 = vmatpush1.bf16.msra.mxu0 %v1651_v25  ;;  %v7145_v52 = vpop.permute.xlu1 %2760  ;;  %v7147_v22 = vpop.permute.xlu0 %2630  ;;  %1688 = vmatprep.mubr.bf16.mxu0 %v8194_v35  ;;  %v4370_v25 = vcombine.high %v4368_v50, %v4368_v50  ;;  %v8200_v50 = vld [vmem:[#allocation17_spill] sm:$0xff] }
 0x1b7   : > { %5759 = vmatprep.subr.msk.bf16.mxu0 %vm318_vm1, %v1798_v58 }
 0x1b8   : > { %4313 = vrot.lane.b32.xlu1 %v4310_v40, %s6107_s7  ;;  %4099 = vrot.lane.b32.xlu0 %v4093_v28, %s6108_s8  ;;  %v7178_v28 = vpop.f32.mrf.mxu0  ;;  %v2004_v40 = vsel %vm717_vm11, %v8200_v50, %v6937_v54  ;;  %v4384_v24 = vrot.slane %v4370_v25, %v6239_v8  ;;  %v4500_v25 = vmul.bf16 %v7077_v47, %v6347_v12  ;;  %v8203_v50 = vld [vmem:[#allocation19_spill] sm:$0xff] }
 0x1b9   : > { %5758 = vmatmul.mubr.msk.bf16.vlgmr.msra.gmra.mxu1 %vm314_vm7, %v7160_v19  ;;  %v2007_v54 = vsel %vm318_vm1, %v2004_v40, 0 }
 0x1ba   : > { %1895 = vmatpush1.bf16.msra.mxu1 %v1875_v59  ;;  %v7172_v6 = vpop.permute.xlu1 %2764  ;;  %v7174_v23 = vpop.permute.xlu0 %2703  ;;  %1912 = vmatprep.mubr.bf16.mxu1 %v8194_v35 }
 0x1bb   : > { %5765 = vmatprep.subr.msk.bf16.mxu1 %vm318_vm1, %v2005_v61  ;;  %v7189_v58 = vpop.f32.mrf.mxu0  ;;  %v2270_v61 = vmul.bf16 %v8201_v13, %v6259_v31  ;;  %v8204_v13 = vld [vmem:[#allocation14_spill] sm:$0xff] }
 0x1bc   : > { %4386 = vrot.lane.b32.xlu1 %v4377_v60, %s6103_s5  ;;  %4238 = vrot.lane.b32.xlu0 %v7155_v39, %s6096_s10  ;;  %8199 = vst [vmem:[#allocation12_spill] sm:$0xff] %v7189_v58 }
 0x1bd   : > { %5756 = vmatmul.mubr.msk.bf16.vlgmr.msra.gmra.mxu0 %vm314_vm7, %v6475_v2  ;;  %v4295_v2 = vcombine.high %v7100_v26, %v7100_v26  ;;  %v363_v14 = vpop.f32.mrf.mxu0  ;;  %v8202_v26 = vld [vmem:[#allocation10_spill] sm:$0xff]  ;;  %v2278_v40 = vrot.slane %v2270_v61, %v6239_v8 }
 0x1be   : > { %1820 = vmatpush1.bf16.msra.mxu0 %v1800_v0  ;;  %v7194_v63 = vpop.permute.xlu1 %2837  ;;  %v7196_v59 = vpop.permute.xlu0 %2707  ;;  %1837 = vmatprep.mubr.bf16.mxu0 %v8194_v35  ;;  %v2137_v14 = vsel %vm863_vm12, %v8204_v13, %v8203_v50  ;;  %v8206_v50 = vld [vmem:[#allocation20_spill] sm:$0xff] }
 0x1bf   : > { %5763 = vmatprep.subr.msk.bf16.mxu0 %vm318_vm1, %v1930_v3  ;;  %v364_v0 = vpop.f32.mrf.mxu0  ;;  %v1929_v3 = vsel %vm632_vm10, %v8202_v26, %v8198_v9  ;;  %v4309_v48 = vrot.slane %v4295_v2, %v6239_v8  ;;  %v4509_v2 = vrot.slane %v4500_v25, %v6239_v8  ;;  %v4502_v26 = vcombine.high %v4500_v25, %v4500_v25 }
 0x1c0   : > { %4390 = vrot.lane.b32.xlu1 %v4384_v24, %s6103_s5  ;;  %4311 = vrot.lane.b32.xlu0 %v4302_v21, %s6107_s7  ;;  %v1932_v9 = vsel %vm318_vm1, %v1929_v3, 0  ;;  %v4385_v3 = vcombine.high %v4377_v60, %v4377_v60  ;;  %v8208_v60 = vld [vmem:[#allocation15_spill] sm:$0xff] }
 0x1c1   : > { %5762 = vmatmul.mubr.msk.bf16.vlgmr.msra.gmra.mxu1 %vm314_vm7, %v6679_v57 }
 0x1c2   : > { %2027 = vmatpush1.bf16.msra.mxu1 %v2007_v54  ;;  %v7218_v24 = vpop.permute.xlu1 %2976  ;;  %v7220_v21 = vpop.permute.xlu0 %2762  ;;  %2044 = vmatprep.mubr.bf16.mxu1 %v8194_v35  ;;  %v8205_v54 = vld [vmem:[#allocation13_spill] sm:$0xff] }
 0x1c3   : > { %5769 = vmatprep.subr.msk.bf16.mxu1 %vm318_vm1, %v2137_v14  ;;  %v2136_v0 = vsel %vm863_vm12, %v8205_v54, %v8204_v13  ;;  %v8207_v14 = vld [vmem:[#allocation18_spill] sm:$0xff]  ;;  %v7246_v13 = vmul.bf16 %v7077_v47, %v6323_v62  ;;  %v2279_v54 = vcombine.high %v2278_v40, %v2278_v40 }
 0x1c4   : > { %4445 = vrot.lane.b32.xlu1 %v7155_v39, %s6095_s25  ;;  %4315 = vrot.lane.b32.xlu0 %v4309_v48, %s6107_s7  ;;  %v2080_v61 = vsel %vm802_vm13, %v8207_v14, %v8206_v50  ;;  %v2139_v25 = vsel %vm318_vm1, %v2136_v0, 0 }
 0x1c5   : > { %5760 = vmatmul.mubr.msk.bf16.vlgmr.msra.gmra.mxu0 %vm314_vm7, %v6783_v55 }
 0x1c6   : > { %1952 = vmatpush1.bf16.msra.mxu0 %v1932_v9  ;;  %v7239_v5 = vpop.permute.xlu1 %2980  ;;  %v7241_v48 = vpop.permute.xlu0 %2835  ;;  %1969 = vmatprep.mubr.bf16.mxu0 %v8194_v35  ;;  %v2079_v9 = vsel %vm802_vm13, %v8208_v60, %v8207_v14  ;;  %v2281_v60 = vsel %vm318_vm1, %v2278_v40, 0  ;;  %v2428_v40 = vsel %vm486_vm9, %v6985_v17, %v7048_v29  ;;  %v2427_v29 = vsel %vm486_vm9, %v7028_v41, %v6985_v17 }
 0x1c7   : > { %5767 = vmatprep.subr.msk.bf16.mxu0 %vm318_vm1, %v2080_v61  ;;  %v4516_v61 = vrot.slane %v4502_v26, %v6239_v8  ;;  %v2082_v0 = vsel %vm318_vm1, %v2079_v9, 0  ;;  %v2212_v26 = vsel %vm948_vm14, %v6915_v18, %v6987_v51  ;;  %v7289_v51 = vmul.bf16 %v7077_v47, %v6396_v30 }
 0x1c8   : > { %4518 = vrot.lane.b32.xlu1 %v4509_v2, %s6106_s14  ;;  %4388 = vrot.lane.b32.xlu0 %v4385_v3, %s6103_s5  ;;  %v4584_v3 = vrot.slane %v7246_v13, %v6239_v8  ;;  %v2211_v9 = vsel %vm948_vm14, %v6967_v27, %v6915_v18  ;;  %v2430_v17 = vsel %vm318_vm1, %v2427_v29, 0  ;;  %v2503_v29 = vsel %vm571_vm8, %v7071_v33, %v7026_v44 }
 0x1c9   : > { %5766 = vmatmul.mubr.msk.bf16.vlgmr.msra.gmra.mxu1 %vm314_vm7, %v6820_v16  ;;  %v2214_v18 = vsel %vm318_vm1, %v2211_v9, 0  ;;  %v4716_v27 = vrot.slane %v7289_v51, %v6239_v8 }
 0x1ca   : > { %2159 = vmatpush1.bf16.msra.mxu1 %v2139_v25  ;;  %v7257_v50 = vpop.permute.xlu1 %3053  ;;  %v7259_v58 = vpop.permute.xlu0 %2839  ;;  %2176 = vmatprep.mubr.bf16.mxu1 %v8194_v35 }
 0x1cb   : > { %5774 = vmatprep.subr.msk.bf16.mxu1 %vm318_vm1, %v2279_v54  ;;  %v4592_v54 = vcombine.high %v4584_v3, %v4584_v3  ;;  %v4724_v41 = vcombine.high %v4716_v27, %v4716_v27 }
 0x1cc   : > { %4522 = vrot.lane.b32.xlu1 %v4516_v61, %s6106_s14  ;;  %4443 = vrot.lane.b32.xlu0 %v7083_v7, %s6095_s25 }
 0x1cd   : > { %5764 = vmatmul.mubr.msk.bf16.vlgmr.msra.gmra.mxu0 %vm314_vm7, %v6847_v10 }
 0x1ce   : > { %2102 = vmatpush1.bf16.msra.mxu0 %v2082_v0  ;;  %v7275_v14 = vpop.permute.xlu1 %3126  ;;  %v7277_v25 = vpop.permute.xlu0 %2978  ;;  %2119 = vmatprep.mubr.bf16.mxu0 %v8194_v35 }
 0x1cf   : > { %5771 = vmatprep.subr.msk.bf16.mxu0 %vm318_vm1, %v2212_v26  ;;  %v4517_v26 = vcombine.high %v4509_v2, %v4509_v2  ;;  %v2353_v2 = vsel %vm391_vm0, %v7006_v38, %v6965_v11  ;;  %v7332_v11 = vld [vmem:[%s8164_s1] sm:$0x3] }
 0x1d0   : > { %4595 = vrot.lane.b32.xlu1 %v4592_v54, %s6104_s6  ;;  %4447 = vrot.lane.b32.xlu0 %v7108_v1, %s6095_s25 }
 0x1d1   : > { %5770 = vmatmul.mubr.msk.bf16.vlgmr.msra.gmra.mxu1 %vm314_vm7, %v6873_v4 }
 0x1d2   : > { %2301 = vmatpush1.bf16.msra.mxu1 %v2281_v60  ;;  %v7297_v61 = vpop.permute.xlu1 %3130  ;;  %v7299_v0 = vpop.permute.xlu0 %3051  ;;  %2318 = vmatprep.mubr.bf16.mxu1 %v8194_v35  ;;  %v4577_v60 = vcombine.high %v7246_v13, %v7246_v13  ;;  %v2352_v13 = vsel %vm391_vm0, %v6935_v36, %v7006_v38 }
 0x1d3   : > { %5778 = vmatprep.subr.msk.bf16.mxu1 %vm318_vm1, %v2428_v40 }
 0x1d4   : > { %4650 = vrot.lane.b32.xlu1 %v7083_v7, %s6097_s11  ;;  %4520 = vrot.lane.b32.xlu0 %v4517_v26, %s6106_s14  ;;  %v4591_v40 = vrot.slane %v4577_v60, %v6239_v8  ;;  %v7350_v26 = vld [vmem:[%s6233_s20 + $0x2a] sm:$0x3f] }
 0x1d5   : > { %5768 = vmatmul.mubr.msk.bf16.vlgmr.msra.gmra.mxu0 %vm314_vm7, %v6899_v46  ;;  %v7356_v36 = vrot.slane %v7350_v26, %v6239_v8  ;;  %v4850_v38 = vcombine.high %v7350_v26, %v7350_v26 }
 0x1d6   : > { %2234 = vmatpush1.bf16.msra.mxu0 %v2214_v18  ;;  %v7317_v7 = vpop.permute.xlu1 %3185  ;;  %v7319_v54 = vpop.permute.xlu0 %3055  ;;  %2251 = vmatprep.mubr.bf16.mxu0 %v8194_v35  ;;  %v2559_v18 = vsel %vm632_vm10, %v7095_v42, %v7046_v32  ;;  %v2502_v42 = vsel %vm571_vm8, %v7004_v49, %v7071_v33 }
 0x1d7   : > { %5776 = vmatprep.subr.msk.bf16.mxu0 %vm318_vm1, %v2353_v2  ;;  %v7384_v44 = vrot.slane %v4850_v38, %v6239_v8  ;;  %v2505_v49 = vsel %vm318_vm1, %v2502_v42, 0 }
 0x1d8   : > { %4654 = vrot.lane.b32.xlu1 %v7108_v1, %s6097_s11  ;;  %4593 = vrot.lane.b32.xlu0 %v4584_v3, %s6104_s6  ;;  %v2560_v1 = vsel %vm632_vm10, %v7046_v32, %v7122_v53  ;;  %v2355_v53 = vsel %vm318_vm1, %v2352_v13, 0  ;;  %v2562_v32 = vsel %vm318_vm1, %v2559_v18, 0 }
 0x1d9   : > { %5775 = vmatmul.mubr.msk.bf16.vlgmr.msra.gmra.mxu1 %vm314_vm7, %v7332_v11 }
 0x1da   : > { %2450 = vmatpush1.bf16.msra.mxu1 %v2430_v17  ;;  %v7342_v3 = vpop.permute.xlu1 %3258  ;;  %v7344_v9 = vpop.permute.xlu0 %3128  ;;  %2467 = vmatprep.mubr.bf16.mxu1 %v8194_v35  ;;  %v7376_v17 = vmul.bf16 %v7350_v26, %v6355_v15  ;;  %v4709_v15 = vcombine.high %v7289_v51, %v7289_v51  ;;  %v2709_v51 = vsel %vm802_vm13, %v7174_v23, %v7120_v45 }
 0x1db   : > { %5782 = vmatprep.subr.msk.bf16.mxu1 %vm318_vm1, %v2560_v1  ;;  %v2635_v1 = vsel %vm717_vm11, %v7147_v22, %v7093_v34  ;;  %v2634_v23 = vsel %vm717_vm11, %v7069_v37, %v7147_v22 }
 0x1dc   : > { %4727 = vrot.lane.b32.xlu1 %v4724_v41, %s6108_s8  ;;  %4597 = vrot.lane.b32.xlu0 %v4591_v40, %s6104_s6  ;;  %v2710_v41 = vsel %vm802_vm13, %v7120_v45, %v7196_v59  ;;  %v4723_v33 = vrot.slane %v4709_v15, %v6239_v8  ;;  %v4998_v59 = vmul.bf16 %v7350_v26, %v6316_v56  ;;  %v2712_v45 = vsel %vm318_vm1, %v2709_v51, 0  ;;  %v8209_v15 = vld [vmem:[#allocation16_spill] sm:$0xff] }
 0x1dd   : > { %5772 = vmatmul.mubr.msk.bf16.vlgmr.msra.gmra.mxu0 %vm314_vm7, %v6943_v43  ;;  %v7430_v56 = vcombine.high %v7356_v36, %v7356_v36  ;;  %v2900_v42 = vmul.bf16 %v8209_v15, %v6259_v31  ;;  %v2637_v37 = vsel %vm318_vm1, %v2634_v23, 0  ;;  %v4925_v22 = vcombine.high %v7376_v17, %v7376_v17 }
 0x1de   : > { %2375 = vmatpush1.bf16.msra.mxu0 %v2355_v53  ;;  %v7369_v2 = vpop.permute.xlu1 %3262  ;;  %v7371_v60 = vpop.permute.xlu0 %3183  ;;  %2392 = vmatprep.mubr.bf16.mxu0 %v8194_v35  ;;  %v5007_v34 = vrot.slane %v4998_v59, %v6239_v8  ;;  %v2842_v53 = vsel %vm948_vm14, %v7194_v63, %v7259_v58  ;;  %v2841_v58 = vsel %vm948_vm14, %v7241_v48, %v7194_v63 }
 0x1df   : > { %5780 = vmatprep.subr.msk.bf16.mxu0 %vm318_vm1, %v2503_v29  ;;  %v2844_v63 = vsel %vm318_vm1, %v2841_v58, 0  ;;  %v2766_v48 = vsel %vm863_vm12, %v7145_v52, %v7220_v21 }
 0x1e0   : > { %4866 = vrot.lane.b32.xlu1 %v7356_v36, %s6096_s10  ;;  %4652 = vrot.lane.b32.xlu0 %v7155_v39, %s6097_s11 }
 0x1e1   : > { %5779 = vmatmul.mubr.msk.bf16.vlgmr.msra.gmra.mxu1 %vm314_vm7, %v6783_v55  ;;  %v4932_v55 = vrot.slane %v7376_v17, %v6239_v8  ;;  %v2908_v17 = vrot.slane %v2900_v42, %v6239_v8 }
 0x1e2   : > { %2582 = vmatpush1.bf16.msra.mxu1 %v2562_v32  ;;  %v7397_v39 = vpop.permute.xlu1 %3335  ;;  %v7399_v13 = vpop.permute.xlu0 %3187  ;;  %2599 = vmatprep.mubr.bf16.mxu1 %v8194_v35  ;;  %v5000_v32 = vcombine.high %v4998_v59, %v4998_v59  ;;  %v2983_v59 = vsel %vm391_vm0, %v7277_v25, %v7239_v5  ;;  %v2769_v5 = vsel %vm318_vm1, %v2766_v48, 0 }
 0x1e3   : > { %5786 = vmatprep.subr.msk.bf16.mxu1 %vm318_vm1, %v2710_v41  ;;  %v4940_v38 = vcombine.high %v4932_v55, %v4932_v55  ;;  %v2767_v41 = vsel %vm863_vm12, %v7220_v21, %v7172_v6  ;;  %v5130_v6 = vmul.bf16 %v7350_v26, %v6347_v12  ;;  %v2909_v12 = vcombine.high %v2908_v17, %v2908_v17 }
 0x1e4   : > { %4870 = vrot.lane.b32.xlu1 %v7384_v44, %s6096_s10  ;;  %4725 = vrot.lane.b32.xlu0 %v4716_v27, %s6108_s8  ;;  %v7501_v21 = vmul.bf16 %v7350_v26, %v6323_v62 }
 0x1e5   : > { %5777 = vmatmul.mubr.msk.bf16.vlgmr.msra.gmra.mxu0 %vm314_vm7, %v7160_v19  ;;  %v5139_v52 = vrot.slane %v5130_v6, %v6239_v8 }
 0x1e6   : > { %2525 = vmatpush1.bf16.msra.mxu0 %v2505_v49  ;;  %v7420_v27 = vpop.permute.xlu1 %3390  ;;  %v7422_v40 = vpop.permute.xlu0 %3260  ;;  %2542 = vmatprep.mubr.bf16.mxu0 %v8194_v35  ;;  %v5214_v42 = vrot.slane %v7501_v21, %v6239_v8 }
 0x1e7   : > { %5784 = vmatprep.subr.msk.bf16.mxu0 %vm318_vm1, %v2635_v1  ;;  %v4939_v1 = vrot.slane %v4925_v22, %v6239_v8  ;;  %v3132_v22 = vsel %vm571_vm8, %v7275_v14, %v7344_v9  ;;  %v7555_v14 = vmul.bf16 %v7350_v26, %v6396_v30  ;;  %v5147_v48 = vcombine.high %v5139_v52, %v5139_v52 }
 0x1e8   : > { %4943 = vrot.lane.b32.xlu1 %v4940_v38, %s6107_s7  ;;  %4729 = vrot.lane.b32.xlu0 %v4723_v33, %s6108_s8  ;;  %v2982_v38 = vsel %vm391_vm0, %v7218_v24, %v7277_v25  ;;  %v3133_v24 = vsel %vm571_vm8, %v7344_v9, %v7297_v61  ;;  %v3058_v61 = vsel %vm486_vm9, %v7257_v50, %v7319_v54  ;;  %v3135_v54 = vsel %vm318_vm1, %v3132_v22, 0 }
 0x1e9   : > { %5783 = vmatmul.mubr.msk.bf16.vlgmr.msra.gmra.mxu1 %vm314_vm7, %v6847_v10  ;;  %v2985_v62 = vsel %vm318_vm1, %v2982_v38, 0  ;;  %v3057_v9 = vsel %vm486_vm9, %v7299_v0, %v7257_v50  ;;  %v5346_v50 = vrot.slane %v7555_v14, %v6239_v8  ;;  %v3190_v0 = vsel %vm632_vm10, %v7317_v7, %v7399_v13  ;;  %v7600_v13 = vld [vmem:[%s8164_s1 + $0x6] sm:$0x3] }
 0x1ea   : > { %2732 = vmatpush1.bf16.msra.mxu1 %v2712_v45  ;;  %v7442_v18 = vpop.permute.xlu1 %3394  ;;  %v7444_v29 = vpop.permute.xlu0 %3333  ;;  %2749 = vmatprep.mubr.bf16.mxu1 %v8194_v35  ;;  %v3060_v30 = vsel %vm318_vm1, %v3057_v9, 0 }
 0x1eb   : > { %5790 = vmatprep.subr.msk.bf16.mxu1 %vm318_vm1, %v2842_v53  ;;  %v5015_v53 = vcombine.high %v5007_v34, %v5007_v34 }
 0x1ec   : > { %5016 = vrot.lane.b32.xlu1 %v5007_v34, %s6103_s5  ;;  %4868 = vrot.lane.b32.xlu0 %v7430_v56, %s6096_s10  ;;  %s5707_s10 = sshll.u32 %s6229_s12, 5 }
 0x1ed   : > { %5781 = vmatmul.mubr.msk.bf16.vlgmr.msra.gmra.mxu0 %vm314_vm7, %v6679_v57  ;;  %v5014_v57 = vrot.slane %v5000_v32, %v6239_v8  ;;  %v5132_v32 = vcombine.high %v5130_v6, %v5130_v6 }
 0x1ee   : > { %2657 = vmatpush1.bf16.msra.mxu0 %v2637_v37  ;;  %v7464_v49 = vpop.permute.xlu1 %3467  ;;  %v7466_v33 = vpop.permute.xlu0 %3337  ;;  %2674 = vmatprep.mubr.bf16.mxu0 %v8194_v35  ;;  %v2911_v37 = vsel %vm318_vm1, %v2908_v17, 0  ;;  %v3265_v17 = vsel %vm717_vm11, %v7422_v40, %v7369_v2  ;;  %v3264_v2 = vsel %vm717_vm11, %v7342_v3, %v7422_v40  ;;  %v5354_v40 = vcombine.high %v5346_v50, %v5346_v50 }
 0x1ef   : > { %5788 = vmatprep.subr.msk.bf16.mxu0 %vm318_vm1, %v2767_v41  ;;  %v5146_v15 = vrot.slane %v5132_v32, %v6239_v8  ;;  %v3267_v3 = vsel %vm318_vm1, %v3264_v2, 0 }
 0x1f0   : > { %5020 = vrot.lane.b32.xlu1 %v5014_v57, %s6103_s5  ;;  %4941 = vrot.lane.b32.xlu0 %v4932_v55, %s6107_s7  ;;  %v5222_v57 = vcombine.high %v5214_v42, %v5214_v42 }
 0x1f1   : > { %5787 = vmatmul.mubr.msk.bf16.vlgmr.msra.gmra.mxu1 %vm314_vm7, %v6899_v46 }
 0x1f2   : > { %2864 = vmatpush1.bf16.msra.mxu1 %v2844_v63  ;;  %v7485_v51 = vpop.permute.xlu1 %3606  ;;  %v7487_v55 = vpop.permute.xlu0 %3392  ;;  %2881 = vmatprep.mubr.bf16.mxu1 %v8194_v35 }
 0x1f3   : > { %5795 = vmatprep.subr.msk.bf16.mxu1 %vm318_vm1, %v2983_v59  ;;  %v3396_v32 = vsel %vm863_vm12, %v7420_v27, %v7487_v55  ;;  %v3339_v27 = vsel %vm802_vm13, %v7444_v29, %v7397_v39 }
 0x1f4   : > { %5075 = vrot.lane.b32.xlu1 %v7430_v56, %s6095_s25  ;;  %4945 = vrot.lane.b32.xlu0 %v4939_v1, %s6107_s7  ;;  %v5207_v1 = vcombine.high %v7501_v21, %v7501_v21 }
 0x1f5   : > { %5785 = vmatmul.mubr.msk.bf16.vlgmr.msra.gmra.mxu0 %vm314_vm7, %v6820_v16 }
 0x1f6   : > { %2789 = vmatpush1.bf16.msra.mxu0 %v2769_v5  ;;  %v7506_v45 = vpop.permute.xlu1 %3610  ;;  %v7508_v23 = vpop.permute.xlu0 %3465  ;;  %2806 = vmatprep.mubr.bf16.mxu0 %v8194_v35  ;;  %v5221_v21 = vrot.slane %v5207_v1, %v6239_v8 }
 0x1f7   : > { %5793 = vmatprep.subr.msk.bf16.mxu0 %vm318_vm1, %v2909_v12  ;;  %v3530_v12 = vmul.bf16 %v6790_v20, %v6259_v31  ;;  %v3189_v20 = vsel %vm632_vm10, %v7371_v60, %v7317_v7  ;;  %v7624_v60 = vld [vmem:[%s8164_s1 + $0x4] sm:$0x3] }
 0x1f8   : > { %5148 = vrot.lane.b32.xlu1 %v5139_v52, %s6106_s14  ;;  %5018 = vrot.lane.b32.xlu0 %v5015_v53, %s6103_s5  ;;  %v3192_v7 = vsel %vm318_vm1, %v3189_v20, 0  ;;  %v3340_v53 = vsel %vm802_vm13, %v7397_v39, %v7466_v33  ;;  %s8064_s5 = scalar_lea.vmem [#allocation6], %s5707_s10 }
 0x1f9   : > { %5791 = vmatmul.mubr.msk.bf16.vlgmr.msra.gmra.mxu1 %vm314_vm7, %v6943_v43  ;;  %v3538_v38 = vrot.slane %v3530_v12, %v6239_v8  ;;  %s5629_s7 = sshll.u32 %s8064_s5, 4  ;;  %s8119_s7 = int_to_ptr.vmem [resolvable:$true] %s5629_s7 }
 0x1fa   : > { %3005 = vmatpush1.bf16.msra.mxu1 %v2985_v62  ;;  %v7520_v25 = vpop.permute.xlu1 %3683  ;;  %v7522_v34 = vpop.permute.xlu0 %3469  ;;  %3022 = vmatprep.mubr.bf16.mxu1 %v8194_v35  ;;  %s6024_s22 = scalar_lea.vmem %s8119_s7, 512 }
 0x1fb   : > { %5799 = vmatprep.subr.msk.bf16.mxu1 %vm318_vm1, %v3133_v24  ;;  %v3472_v39 = vsel %vm948_vm14, %v7464_v49, %v7522_v34  ;;  %p6025_p11 = scmp.ne.s32.totalorder %s8119_s7, %s6024_s22 }
 0x1fc   : > { %5152 = vrot.lane.b32.xlu1 %v5146_v15, %s6106_s14  ;;  %5073 = vrot.lane.b32.xlu0 %v7356_v36, %s6095_s25  ;;  %v3539_v15 = vcombine.high %v3538_v38, %v3538_v38 }
 0x1fd   : > { %5789 = vmatmul.mubr.msk.bf16.vlgmr.msra.gmra.mxu0 %vm314_vm7, %v6873_v4  ;;  %p6026_p13 = pnand %p6025_p11, %p8213_p12 }
 0x1fe   : > { %2931 = vmatpush1.bf16.msra.mxu0 %v2911_v37  ;;  %v7541_v58 = vpop.permute.xlu1 %3756  ;;  %v7543_v41 = vpop.permute.xlu0 %3608  ;;  %2948 = vmatprep.mubr.bf16.mxu0 %v8194_v35  ;;  %v5339_v37 = vcombine.high %v7555_v14, %v7555_v14 }
 0x1ff   : > { %5797 = vmatprep.subr.msk.bf16.mxu0 %vm318_vm1, %v3058_v61  ;;  %p6027_p4 = pneg %p6026_p13 }
 0x200   : > { %5225 = vrot.lane.b32.xlu1 %v5222_v57, %s6104_s6  ;;  %5077 = vrot.lane.b32.xlu0 %v7384_v44, %s6095_s25  ;;  %v5353_v22 = vrot.slane %v5339_v37, %v6239_v8  ;;  %v3541_v57 = vsel %vm318_vm1, %v3538_v38, 0  ;;  %v7748_v38 = vld [vmem:[%s8164_s1 + $0x8] sm:$0x3] }
 0x201   : > { %5796 = vmatmul.mubr.msk.bf16.vlgmr.msra.gmra.mxu1 %vm314_vm7, %v7160_v19 }
 0x202   : > { %3155 = vmatpush1.bf16.msra.mxu1 %v3135_v54  ;;  %v7563_v63 = vpop.permute.xlu1 %3760  ;;  %v7565_v6 = vpop.permute.xlu0 %3681  ;;  %3172 = vmatprep.mubr.bf16.mxu1 %v8194_v35  ;;  %v3471_v54 = vsel %vm948_vm14, %v7508_v23, %v7464_v49  ;;  %v3613_v49 = vsel %vm391_vm0, %v7543_v41, %v7506_v45 }
 0x203   : > { %5803 = vmatprep.subr.msk.bf16.mxu1 %vm318_vm1, %v3265_v17  ;;  %v3687_v23 = vsel %vm486_vm9, %v7565_v6, %v7520_v25 }
 0x204   : > { %5280 = vrot.lane.b32.xlu1 %v7356_v36, %s6097_s11  ;;  %5150 = vrot.lane.b32.xlu0 %v5147_v48, %s6106_s14  ;;  %s5904_s14 = sshll.u32 %s6159_s19, 9  ;;  %s6110_s19 = smov [#allocation6]  }
 0x205   : > { %5794 = vmatmul.mubr.msk.bf16.vlgmr.msra.gmra.mxu0 %vm314_vm7, %v7332_v11  ;;  %s6028_s23 = sshll.u32 %s6110_s19, 4  ;;  %s6029_s23 = int_to_ptr.vmem [resolvable:$false] %s6028_s23 }
 0x206   : > { %3080 = vmatpush1.bf16.msra.mxu0 %v3060_v30  ;;  %v7583_v36 = vpop.permute.xlu1 %3815  ;;  %v7585_v59 = vpop.permute.xlu0 %3685  ;;  %3097 = vmatprep.mubr.bf16.mxu0 %v8194_v35  ;;  %s6030_s28 = scalar_lea.vmem %s6029_s23, 1024  ;;  %p6031_p5 = scmp.lt.s32.totalorder %s8119_s7, %s6029_s23 }
 0x207   : > { %5801 = vmatprep.subr.msk.bf16.mxu0 %vm318_vm1, %v3190_v0  ;;  %v3688_v14 = vsel %vm486_vm9, %v7520_v25, %v7585_v59  ;;  %v3690_v0 = vsel %vm318_vm1, %v3687_v23, 0  ;;  %v7810_v23 = vld [vmem:[%s8164_s1 + $0x10] sm:$0x3]  ;;  %p6032_p7 = scmp.lt.s32.totalorder %s6030_s28, %s6024_s22 }
 0x208   : > { %5284 = vrot.lane.b32.xlu1 %v7384_v44, %s6097_s11  ;;  %5223 = vrot.lane.b32.xlu0 %v5214_v42, %s6104_s6  ;;  %v3397_v44 = vsel %vm863_vm12, %v7487_v55, %v7442_v18  ;;  %v234_v18 = vld [vmem:[%s8165_s2] sm:$0xf]  ;;  %v3399_v42 = vsel %vm318_vm1, %v3396_v32, 0 }
 0x209   : > { %5800 = vmatmul.mubr.msk.bf16.vlgmr.msra.gmra.mxu1 %vm314_vm7, %v7600_v13  ;;  %p6033_p8 = por %p6032_p7, %p6031_p5 }
 0x20a   : > { %3287 = vmatpush1.bf16.msra.mxu1 %v3267_v3  ;;  %v7610_v5 = vpop.permute.xlu1 %3888  ;;  %v7612_v52 = vpop.permute.xlu0 %3758  ;;  %3304 = vmatprep.mubr.bf16.mxu1 %v8194_v35 }
 0x20b   : > { %5807 = vmatprep.subr.msk.bf16.mxu1 %vm318_vm1, %v3397_v44  ;;  %p6034_p10 = pnand %p6033_p8, %p6027_p4 }
 0x20c   : > { %5357 = vrot.lane.b32.xlu1 %v5354_v40, %s6108_s8  ;;  %5227 = vrot.lane.b32.xlu0 %v5221_v21, %s6104_s6 }
 0x20d   : > { %5798 = vmatmul.mubr.msk.bf16.vlgmr.msra.gmra.mxu0 %vm314_vm7, %v7624_v60 }
 0x20e   : > { %3212 = vmatpush1.bf16.msra.mxu0 %v3192_v7  ;;  %v7637_v62 = vpop.permute.xlu1 %3892  ;;  %v3814_v24 = vpop.permute.xlu0 %3813  ;;  %3229 = vmatprep.mubr.bf16.mxu0 %v8194_v35 }
 0x20f   : > { %5805 = vmatprep.subr.msk.bf16.mxu0 %vm318_vm1, %v3340_v53 }
 0x210   : > { %5282 = vrot.lane.b32.xlu0 %v7430_v56, %s6097_s11  ;;  %237 = vperm.xlu1 %5975, %v234_v18   ;;  %v3342_v56 = vsel %vm318_vm1, %v3339_v27, 0 }
 0x211   : > { %5804 = vmatmul.mubr.msk.bf16.vlgmr.msra.gmra.mxu1 %vm314_vm7, %v6820_v16 }
 0x212   : > { %3419 = vmatpush1.bf16.msra.mxu1 %v3399_v42  ;;  %v7649_v33 = vpop.permute.xlu1 %3965  ;;  %v3818_v55 = vpop.permute.xlu0 %3817  ;;  %3436 = vmatprep.mubr.bf16.mxu1 %v8194_v35 }
 0x213   : > { %5812 = vmatprep.subr.msk.bf16.mxu1 %vm318_vm1, %v3539_v15  ;;  %v3820_v45 = vsel %vm632_vm10, %v7583_v36, %v3818_v55  ;;  %v7777_v55 = vld [vmem:[%s8164_s1 + $0xc] sm:$0x3] }
 0x214   : > { %5355 = vrot.lane.b32.xlu0 %v5346_v50, %s6108_s8 }
 0x215   : > { %5802 = vmatmul.mubr.msk.bf16.vlgmr.msra.gmra.mxu0 %vm314_vm7, %v6847_v10  ;;  %v7659_v16 = vpop.f32.mrf.mxu1 }
 0x216   : > { %3362 = vmatpush1.bf16.msra.mxu0 %v3342_v56  ;;  %v7664_v29 = vpop.permute.xlu1 %4020  ;;  %v7666_v61 = vpop.permute.xlu0 %3890  ;;  %3379 = vmatprep.mubr.bf16.mxu0 %v8194_v35 }
 0x217   : > { %5809 = vmatprep.subr.msk.bf16.mxu0 %vm318_vm1, %v3472_v39  ;;  %v7672_v10 = vpop.f32.mrf.mxu1  ;;  %v3894_v7 = vsel %vm717_vm11, %v7610_v5, %v7666_v61 }
 0x218   : > { %5359 = vrot.lane.b32.xlu0 %v5353_v22, %s6108_s8  ;;  %s8117_s8 = scalar_lea.hbm %s8167_s4, %s5904_s14 }
 0x219   : > { %5808 = vmatmul.mubr.msk.bf16.vlgmr.msra.gmra.mxu1 %vm314_vm7, %v6873_v4  ;;  %v621_v34 = vpop.f32.mrf.mxu1  ;;  %v3474_v4 = vsel %vm318_vm1, %v3471_v54, 0  ;;  %v7792_v54 = vld [vmem:[%s8164_s1 + $0xa] sm:$0x3] }
 0x21a   : > { %3561 = vmatpush1.bf16.msra.mxu1 %v3541_v57  ;;  %v7683_v9 = vpop.permute.xlu1 %4024  ;;  %v3964_v17 = vpop.permute.xlu0 %3963  ;;  %3578 = vmatprep.mubr.bf16.mxu1 %v8194_v35 }
 0x21b   : > { %5816 = vmatprep.subr.msk.bf16.mxu1 %vm318_vm1, %v3688_v14  ;;  %v622_v48 = vpop.f32.mrf.mxu1  ;;  %v3969_v20 = vsel %vm802_vm13, %v3964_v17, %v7649_v33 }
 0x21c   : > { %v3972_v21 = vsel %vm318_vm1, %v3969_v20, 0 }
 0x21d   : > { %5806 = vmatmul.mubr.msk.bf16.vlgmr.msra.gmra.mxu0 %vm314_vm7, %v6899_v46  ;;  %v3612_v46 = vsel %vm391_vm0, %v7485_v51, %v7543_v41  ;;  %v3763_v51 = vsel %vm571_vm8, %v7612_v52, %v7563_v63  ;;  %v3819_v41 = vsel %vm632_vm10, %v3814_v24, %v7583_v36  ;;  %v3897_v24 = vsel %vm318_vm1, %v3894_v7, 0 }
 0x21e   : > { %3494 = vmatpush1.bf16.msra.mxu0 %v3474_v4  ;;  %v4098_v30 = vpop.permute.xlu1 %4097  ;;  %v3968_v50 = vpop.permute.xlu0 %3967  ;;  %3511 = vmatprep.mubr.bf16.mxu0 %v8194_v35  ;;  %v3615_v2 = vsel %vm318_vm1, %v3612_v46, 0  ;;  %v3822_v12 = vsel %vm318_vm1, %v3819_v41, 0 }
 0x21f   : > { %5814 = vmatprep.subr.msk.bf16.mxu0 %vm318_vm1, %v3613_v49  ;;  %v3970_v63 = vsel %vm802_vm13, %v7649_v33, %v3968_v50 }
 0x221   : > { %5813 = vmatmul.mubr.msk.bf16.vlgmr.msra.gmra.mxu1 %vm314_vm7, %v7332_v11 }
 0x222   : > { %3710 = vmatpush1.bf16.msra.mxu1 %v3690_v0  ;;  %v7706_v25 = vpop.permute.xlu1 %4236  ;;  %v4023_v6 = vpop.permute.xlu0 %4022  ;;  %3727 = vmatprep.mubr.bf16.mxu1 %v8194_v35 }
 0x223   : > { %5820 = vmatprep.subr.msk.bf16.mxu1 %vm318_vm1, %v3820_v45  ;;  %v4027_v5 = vsel %vm863_vm12, %v4023_v6, %v7683_v9  ;;  %v4026_v37 = vsel %vm863_vm12, %v7664_v29, %v4023_v6 }
 0x224   : > { %v4029_v57 = vsel %vm318_vm1, %v4026_v37, 0 }
 0x225   : > { %5810 = vmatmul.mubr.msk.bf16.vlgmr.msra.gmra.mxu0 %vm314_vm7, %v6943_v43  ;;  %v3762_v43 = vsel %vm571_vm8, %v7541_v58, %v7612_v52  ;;  %v3895_v58 = vsel %vm717_vm11, %v7666_v61, %v7637_v62  ;;  %v4160_v62 = vmul.bf16 %v7077_v47, %v6259_v31 }
 0x226   : > { %3635 = vmatpush1.bf16.msra.mxu0 %v3615_v2  ;;  %v4241_v59 = vpop.permute.xlu1 %4240  ;;  %v4096_v1 = vpop.permute.xlu0 %4095  ;;  %3652 = vmatprep.mubr.bf16.mxu0 %v8194_v35  ;;  %v3765_v40 = vsel %vm318_vm1, %v3762_v43, 0 }
 0x227   : > { %5818 = vmatprep.subr.msk.bf16.mxu0 %vm318_vm1, %v3763_v51  ;;  %v4101_v15 = vsel %vm948_vm14, %v4096_v1, %v4098_v30  ;;  %v4168_v47 = vrot.slane %v4160_v62, %v6239_v8  ;;  %v7827_v51 = vld [vmem:[%s8164_s1 + $0xe] sm:$0x3] }
 0x228   : > { %v4104_v33 = vsel %vm318_vm1, %v4101_v15, 0 }
 0x229   : > { %5817 = vmatmul.mubr.msk.bf16.vlgmr.msra.gmra.mxu1 %vm314_vm7, %v7624_v60  ;;  %v4169_v22 = vcombine.high %v4168_v47, %v4168_v47 }
 0x22a   : > { %3842 = vmatpush1.bf16.msra.mxu1 %v3822_v12  ;;  %v7728_v36 = vpop.permute.xlu1 %4313  ;;  %v4100_v3 = vpop.permute.xlu0 %4099  ;;  %3859 = vmatprep.mubr.bf16.mxu1 %v8194_v35 }
 0x22b   : > { %5824 = vmatprep.subr.msk.bf16.mxu1 %vm318_vm1, %v3970_v63  ;;  %v4102_v18 = vsel %vm948_vm14, %v4098_v30, %v4100_v3 }
 0x22d   : > { %5815 = vmatmul.mubr.msk.bf16.vlgmr.msra.gmra.mxu0 %vm314_vm7, %v7160_v19 }
 0x22e   : > { %3785 = vmatpush1.bf16.msra.mxu0 %v3765_v40  ;;  %v7740_v44 = vpop.permute.xlu1 %4386  ;;  %v4239_v52 = vpop.permute.xlu0 %4238  ;;  %3802 = vmatprep.mubr.bf16.mxu0 %v8194_v35 }
 0x22f   : > { %5822 = vmatprep.subr.msk.bf16.mxu0 %vm318_vm1, %v3895_v58  ;;  %v4243_v56 = vsel %vm391_vm0, %v4239_v52, %v4241_v59  ;;  %v4242_v29 = vsel %vm391_vm0, %v7706_v25, %v4239_v52  ;;  %v4171_v25 = vsel %vm318_vm1, %v4168_v47, 0  ;;  %v4790_v47 = vmul.bf16 %v7350_v26, %v6259_v31 }
 0x230   : > { %v4245_v48 = vsel %vm318_vm1, %v4242_v29, 0 }
 0x231   : > { %5821 = vmatmul.mubr.msk.bf16.vlgmr.msra.gmra.mxu1 %vm314_vm7, %v7748_v38  ;;  %v4798_v29 = vrot.slane %v4790_v47, %v6239_v8 }
 0x232   : > { %3992 = vmatpush1.bf16.msra.mxu1 %v3972_v21  ;;  %v4391_v53 = vpop.permute.xlu1 %4390  ;;  %v7756_v32 = vpop.permute.xlu0 %4311  ;;  %4009 = vmatprep.mubr.bf16.mxu1 %v8194_v35 }
 0x233   : > { %5828 = vmatprep.subr.msk.bf16.mxu1 %vm318_vm1, %v4102_v18 }
 0x235   : > { %5819 = vmatmul.mubr.msk.bf16.vlgmr.msra.gmra.mxu0 %vm314_vm7, %v7600_v13 }
 0x236   : > { %3917 = vmatpush1.bf16.msra.mxu0 %v3897_v24  ;;  %v7768_v42 = vpop.permute.xlu1 %4445  ;;  %v4316_v27 = vpop.permute.xlu0 %4315  ;;  %3934 = vmatprep.mubr.bf16.mxu0 %v8194_v35 }
 0x237   : > { %5826 = vmatprep.subr.msk.bf16.mxu0 %vm318_vm1, %v4027_v5  ;;  %v4318_v41 = vsel %vm486_vm9, %v7728_v36, %v4316_v27 }
 0x239   : > { %5825 = vmatmul.mubr.msk.bf16.vlgmr.msra.gmra.mxu1 %vm314_vm7, %v7777_v55 }
 0x23a   : > { %4124 = vmatpush1.bf16.msra.mxu1 %v4104_v33  ;;  %v4519_v39 = vpop.permute.xlu1 %4518  ;;  %v4389_v61 = vpop.permute.xlu0 %4388  ;;  %4141 = vmatprep.mubr.bf16.mxu1 %v8194_v35 }
 0x23b   : > { %5833 = vmatprep.subr.msk.bf16.mxu1 %vm318_vm1, %v4243_v56  ;;  %v4393_v30 = vsel %vm571_vm8, %v4389_v61, %v4391_v53  ;;  %v4392_v59 = vsel %vm571_vm8, %v7740_v44, %v4389_v61  ;;  %v4317_v44 = vsel %vm486_vm9, %v7756_v32, %v7728_v36 }
 0x23c   : > { %v4395_v40 = vsel %vm318_vm1, %v4392_v59, 0  ;;  %v4320_v53 = vsel %vm318_vm1, %v4317_v44, 0 }
 0x23d   : > { %v7787_v34 = vpop.f32.mrf.mxu0  ;;  %5823 = vmatmul.mubr.msk.bf16.vlgmr.msra.gmra.mxu0 %vm314_vm7, %v7792_v54 }
 0x23e   : > { %4049 = vmatpush1.bf16.msra.mxu0 %v4029_v57  ;;  %v4523_v14 = vpop.permute.xlu1 %4522  ;;  %v7798_v9 = vpop.permute.xlu0 %4443  ;;  %4066 = vmatprep.mubr.bf16.mxu0 %v8194_v35 }
 0x23f   : > { %v7801_v17 = vpop.f32.mrf.mxu0  ;;  %5831 = vmatprep.subr.msk.bf16.mxu0 %vm318_vm1, %v4169_v22 }
 0x241   : > { %v536_v4 = vpop.f32.mrf.mxu0  ;;  %v7805_v49 = vpop.f32.mrf.mxu1  ;;  %5829 = vmatmul.mubr.msk.bf16.vlgmr.msra.gmra.mxu1 %vm314_vm7, %v7810_v23 }
 0x242   : > { %4265 = vmatpush1.bf16.msra.mxu1 %v4245_v48  ;;  %v7815_v50 = vpop.permute.xlu1 %4595  ;;  %v4448_v0 = vpop.permute.xlu0 %4447  ;;  %4282 = vmatprep.mubr.bf16.mxu1 %v8194_v35 }
 0x243   : > { %5837 = vmatprep.subr.msk.bf16.mxu1 %vm318_vm1, %v4393_v30  ;;  %v537_v46 = vpop.f32.mrf.mxu0  ;;  %v7819_v45 = vpop.f32.mrf.mxu1 }
 0x245   : > { %v7822_v6 = vpop.f32.mrf.mxu0  ;;  %v767_v2 = vpop.f32.mrf.mxu1  ;;  %5827 = vmatmul.mubr.msk.bf16.vlgmr.msra.gmra.mxu0 %vm314_vm7, %v7827_v51 }
 0x246   : > { %4191 = vmatpush1.bf16.msra.mxu0 %v4171_v25  ;;  %v4651_v1 = vpop.permute.xlu1 %4650  ;;  %v4521_v12 = vpop.permute.xlu0 %4520  ;;  %4208 = vmatprep.mubr.bf16.mxu0 %v8194_v35  ;;  %v4799_v25 = vcombine.high %v4798_v29, %v4798_v29 }
 0x247   : > { %5835 = vmatprep.subr.msk.bf16.mxu0 %vm318_vm1, %v4318_v41  ;;  %v7837_v43 = vpop.f32.mrf.mxu0  ;;  %v768_v63 = vpop.f32.mrf.mxu1  ;;  %v4525_v3 = vsel %vm717_vm11, %v4521_v12, %v4523_v14  ;;  %v4524_v36 = vsel %vm717_vm11, %v4519_v39, %v4521_v12  ;;  %v4449_v39 = vsel %vm632_vm10, %v7798_v9, %v7768_v42 }
 0x248   : > { %v4527_v33 = vsel %vm318_vm1, %v4524_v36, 0  ;;  %v4452_v14 = vsel %vm318_vm1, %v4449_v39, 0 }
 0x249   : > { %v682_v58 = vpop.f32.mrf.mxu0  ;;  %v7841_v20 = vpop.f32.mrf.mxu1  ;;  %5834 = vmatmul.mubr.msk.bf16.vlgmr.msra.gmra.mxu1 %vm314_vm7, %v7160_v19  ;;  %v4450_v19 = vsel %vm632_vm10, %v7768_v42, %v4448_v0 }
 0x24a   : > { %4415 = vmatpush1.bf16.msra.mxu1 %v4395_v40  ;;  %v4655_v52 = vpop.permute.xlu1 %4654  ;;  %v4594_v21 = vpop.permute.xlu0 %4593  ;;  %4432 = vmatprep.mubr.bf16.mxu1 %v8194_v35 }
 0x24b   : > { %5841 = vmatprep.subr.msk.bf16.mxu1 %vm318_vm1, %v4525_v3  ;;  %v683_v7 = vpop.f32.mrf.mxu0  ;;  %v7850_v18 = vpop.f32.mrf.mxu1 }
 0x24d   : > { %v7853_v62 = vpop.f32.mrf.mxu0  ;;  %v913_v24 = vpop.f32.mrf.mxu1  ;;  %5832 = vmatmul.mubr.msk.bf16.vlgmr.msra.gmra.mxu0 %vm314_vm7, %v7332_v11 }
 0x24e   : > { %4340 = vmatpush1.bf16.msra.mxu0 %v4320_v53  ;;  %v7860_v32 = vpop.permute.xlu1 %4727  ;;  %v4598_v5 = vpop.permute.xlu0 %4597  ;;  %4357 = vmatprep.mubr.bf16.mxu0 %v8194_v35 }
 0x24f   : > { %5839 = vmatprep.subr.msk.bf16.mxu0 %vm318_vm1, %v4450_v19  ;;  %v7864_v15 = vpop.f32.mrf.mxu0  ;;  %v914_v27 = vpop.f32.mrf.mxu1  ;;  %v4600_v9 = vsel %vm802_vm13, %v7815_v50, %v4598_v5  ;;  %v4801_v19 = vsel %vm318_vm1, %v4798_v29, 0 }
 0x251   : > { %v852_v37 = vpop.f32.mrf.mxu0  ;;  %v7869_v56 = vpop.f32.mrf.mxu1  ;;  %5838 = vmatmul.mubr.msk.bf16.vlgmr.msra.gmra.mxu1 %vm314_vm7, %v7600_v13 }
 0x252   : > { %4547 = vmatpush1.bf16.msra.mxu1 %v4527_v33  ;;  %v7876_v61 = vpop.permute.xlu1 %4866  ;;  %v4653_v22 = vpop.permute.xlu0 %4652  ;;  %4564 = vmatprep.mubr.bf16.mxu1 %v8194_v35 }
 0x253   : > { %v4657_v31 = vsel %vm863_vm12, %v4653_v22, %v4655_v52  ;;  %v853_v26 = vpop.f32.mrf.mxu0  ;;  %v7880_v57 = vpop.f32.mrf.mxu1  ;;  %v4656_v4 = vsel %vm863_vm12, %v4651_v1, %v4653_v22  ;;  %v4599_v1 = vsel %vm802_vm13, %v4594_v21, %v7815_v50 }
 0x254   : > { %5845 = vmatprep.subr.msk.bf16.mxu1 %vm318_vm1, %v4657_v31  ;;  %v4659_v2 = vsel %vm318_vm1, %v4656_v4, 0  ;;  %v4602_v44 = vsel %vm318_vm1, %v4599_v1, 0 }
 0x255   : > { %v7885_v48 = vpop.f32.mrf.mxu0  ;;  %v1064_v42 = vpop.f32.mrf.mxu1  ;;  %5836 = vmatmul.mubr.msk.bf16.vlgmr.msra.gmra.mxu0 %vm314_vm7, %v7624_v60 }
 0x256   : > { %4472 = vmatpush1.bf16.msra.mxu0 %v4452_v14  ;;  %v4871_v30 = vpop.permute.xlu1 %4870  ;;  %v4726_v0 = vpop.permute.xlu0 %4725  ;;  %4489 = vmatprep.mubr.bf16.mxu0 %v8194_v35 }
 0x257   : > { %5843 = vmatprep.subr.msk.bf16.mxu0 %vm318_vm1, %v4600_v9  ;;  %v7894_v8 = vpop.f32.mrf.mxu0  ;;  %v1065_v46 = vpop.f32.mrf.mxu1  ;;  %v4731_v27 = vsel %vm948_vm14, %v4726_v0, %v7860_v32 }
 0x258   : > { %v4734_v22 = vsel %vm318_vm1, %v4731_v27, 0 }
 0x259   : > { %v998_v41 = vpop.f32.mrf.mxu0  ;;  %v7897_v59 = vpop.f32.mrf.mxu1  ;;  %5842 = vmatmul.mubr.msk.bf16.vlgmr.msra.gmra.mxu1 %vm314_vm7, %v7792_v54 }
 0x25a   : > { %4679 = vmatpush1.bf16.msra.mxu1 %v4659_v2  ;;  %v4944_v12 = vpop.permute.xlu1 %4943  ;;  %v4730_v63 = vpop.permute.xlu0 %4729  ;;  %4696 = vmatprep.mubr.bf16.mxu1 %v8194_v35 }
 0x25b   : > { %v999_v3 = vpop.f32.mrf.mxu0  ;;  %v7904_v40 = vpop.f32.mrf.mxu1  ;;  %5850 = vmatprep.subr.msk.bf16.mxu1 %vm318_vm1, %v4799_v25  ;;  %v4732_v58 = vsel %vm948_vm14, %v7860_v32, %v4730_v63 }
 0x25d   : > { %v7910_v52 = vpop.f32.mrf.mxu0  ;;  %v1213_v7 = vpop.f32.mrf.mxu1  ;;  %5840 = vmatmul.mubr.msk.bf16.vlgmr.msra.gmra.mxu0 %vm314_vm7, %v7748_v38 }
 0x25e   : > { %4622 = vmatpush1.bf16.msra.mxu0 %v4602_v44  ;;  %v5017_v50 = vpop.permute.xlu1 %5016  ;;  %v4869_v21 = vpop.permute.xlu0 %4868  ;;  %4639 = vmatprep.mubr.bf16.mxu0 %v8194_v35 }
 0x25f   : > { %5847 = vmatprep.subr.msk.bf16.mxu0 %vm318_vm1, %v4732_v58  ;;  %v7916_v53 = vpop.f32.mrf.mxu0  ;;  %v1214_v24 = vpop.f32.mrf.mxu1  ;;  %v4873_v29 = vsel %vm391_vm0, %v4869_v21, %v4871_v30  ;;  %v4872_v2 = vsel %vm391_vm0, %v7876_v61, %v4869_v21 }
 0x260   : > { %v4875_v58 = vsel %vm318_vm1, %v4872_v2, 0 }
 0x261   : > { %v1138_v36 = vpop.f32.mrf.mxu0  ;;  %v7919_v5 = vpop.f32.mrf.mxu1  ;;  %5846 = vmatmul.mubr.msk.bf16.vlgmr.msra.gmra.mxu1 %vm314_vm7, %v7827_v51 }
 0x262   : > { %v5021_v47 = vpop.permute.xlu1 %5020  ;;  %v4942_v33 = vpop.permute.xlu0 %4941  ;;  %4821 = vmatpush1.bf16.msra.mxu1 %v4801_v19  ;;  %4838 = vmatprep.mubr.bf16.mxu1 %v8194_v35 }
 0x263   : > { %v1139_v37 = vpop.f32.mrf.mxu0  ;;  %v7926_v39 = vpop.f32.mrf.mxu1  ;;  %v4947_v32 = vsel %vm486_vm9, %v4942_v33, %v4944_v12 }
 0x264   : > { %v4950_v46 = vsel %vm318_vm1, %v4947_v32, 0 }
 0x265   : > { %v7929_v31 = vpop.f32.mrf.mxu0  ;;  %v1345_v26 = vpop.f32.mrf.mxu1  ;;  %5844 = vmatmul.mubr.msk.bf16.vlgmr.msra.gmra.mxu0 %vm314_vm7, %v7777_v55 }
 0x266   : > { %4754 = vmatpush1.bf16.msra.mxu0 %v4734_v22  ;;  %v5076_v14 = vpop.permute.xlu1 %5075  ;;  %v4946_v42 = vpop.permute.xlu0 %4945  ;;  %4771 = vmatprep.mubr.bf16.mxu0 %v8194_v35 }
 0x267   : > { %5852 = vmatprep.subr.msk.bf16.mxu0 %vm318_vm1, %v4873_v29  ;;  %v4948_v9 = vsel %vm486_vm9, %v4944_v12, %v4946_v42  ;;  %v7938_v4 = vpop.f32.mrf.mxu0  ;;  %v1346_v0 = vpop.f32.mrf.mxu1 }
 0x268   : > { %5854 = vmatprep.subr.msk.bf16.mxu1 %vm318_vm1, %v4948_v9 }
 0x269   : > { %v1288_v25 = vpop.f32.mrf.mxu0  ;;  %v7942_v30 = vpop.f32.mrf.mxu1  ;;  %5851 = vmatmul.mubr.msk.bf16.vlgmr.msra.gmra.mxu1 %vm314_vm7, %v7332_v11 }
 0x26a   : > { %4970 = vmatpush1.bf16.msra.mxu1 %v4950_v46  ;;  %v5149_v41 = vpop.permute.xlu1 %5148  ;;  %v5019_v1 = vpop.permute.xlu0 %5018  ;;  %4987 = vmatprep.mubr.bf16.mxu1 %v8194_v35 }
 0x26b   : > { %v1289_v12 = vpop.f32.mrf.mxu0  ;;  %v7949_v63 = vpop.f32.mrf.mxu1  ;;  %v5023_v3 = vsel %vm571_vm8, %v5019_v1, %v5021_v47  ;;  %v5022_v47 = vsel %vm571_vm8, %v5017_v50, %v5019_v1 }
 0x26c   : > { %v5025_v32 = vsel %vm318_vm1, %v5022_v47, 0 }
 0x26d   : > { %v7953_v44 = vpop.f32.mrf.mxu0  ;;  %v1495_v7 = vpop.f32.mrf.mxu1  ;;  %5848 = vmatmul.mubr.msk.bf16.vlgmr.msra.gmra.mxu0 %vm314_vm7, %v7810_v23 }
 0x26e   : > { %4895 = vmatpush1.bf16.msra.mxu0 %v4875_v58  ;;  %v5074_v11 = vpop.permute.xlu0 %5073  ;;  %4912 = vmatprep.mubr.bf16.mxu0 %v8194_v35  ;;  %v5153_v24 = vpop.permute.xlu1 %5152 }
 0x26f   : > { %5856 = vmatprep.subr.msk.bf16.mxu0 %vm318_vm1, %v5023_v3  ;;  %v7959_v61 = vpop.f32.mrf.mxu0  ;;  %v1496_v21 = vpop.f32.mrf.mxu1  ;;  %v5079_v19 = vsel %vm632_vm10, %v5074_v11, %v5076_v14 }
 0x270   : > { %v5082_v29 = vsel %vm318_vm1, %v5079_v19, 0 }
 0x271   : > { %v1420_v36 = vpop.f32.mrf.mxu0  ;;  %v7962_v27 = vpop.f32.mrf.mxu1  ;;  %5855 = vmatmul.mubr.msk.bf16.vlgmr.msra.gmra.mxu1 %vm314_vm7, %v7624_v60  ;;  %v5995_v60 = vld [vmem:[%s8164_s1 + $0x2] sm:$0x3] }
 0x272   : > { %v5078_v33 = vpop.permute.xlu0 %5077  ;;  %5119 = vmatprep.mubr.bf16.mxu1 %v8194_v35  ;;  %v5226_v50 = vpop.permute.xlu1 %5225 }
 0x273   : > { %v5080_v37 = vsel %vm632_vm10, %v5076_v14, %v5078_v33  ;;  %v1421_v22 = vpop.f32.mrf.mxu0  ;;  %v7969_v26 = vpop.f32.mrf.mxu1 }
 0x274   : > { %5858 = vmatprep.subr.msk.bf16.mxu1 %vm318_vm1, %v5080_v37 }
 0x275   : > { %v7974_v42 = vpop.f32.mrf.mxu0  ;;  %v1627_v9 = vpop.f32.mrf.mxu1  ;;  %5853 = vmatmul.mubr.msk.bf16.vlgmr.msra.gmra.mxu0 %vm314_vm7, %v5995_v60  ;;  %5102 = vmatpush1.bf16.msra.mxu1 %v5082_v29 }
 0x276   : > { %5045 = vmatpush1.bf16.msra.mxu0 %v5025_v32  ;;  %v5151_v14 = vpop.permute.xlu0 %5150  ;;  %5062 = vmatprep.mubr.bf16.mxu0 %v8194_v35  ;;  %v5281_v11 = vpop.permute.xlu1 %5280 }
 0x277   : > { %v5155_v0 = vsel %vm717_vm11, %v5151_v14, %v5153_v24  ;;  %v7982_v46 = vpop.f32.mrf.mxu0  ;;  %v1628_v25 = vpop.f32.mrf.mxu1  ;;  %v5154_v12 = vsel %vm717_vm11, %v5149_v41, %v5151_v14 }
 0x278   : > { %5860 = vmatprep.subr.msk.bf16.mxu0 %vm318_vm1, %v5155_v0  ;;  %v5157_v21 = vsel %vm318_vm1, %v5154_v12, 0 }
 0x279   : > { %v1552_v2 = vpop.f32.mrf.mxu0  ;;  %v7985_v1 = vpop.f32.mrf.mxu1  ;;  %5859 = vmatmul.mubr.msk.bf16.vlgmr.msra.gmra.mxu1 %vm314_vm7, %v7748_v38 }
 0x27a   : > { %v5224_v3 = vpop.permute.xlu0 %5223  ;;  %5269 = vmatprep.mubr.bf16.mxu1 %v8194_v35  ;;  %v5285_v32 = vpop.permute.xlu1 %5284 }
 0x27b   : > { %v1553_v58 = vpop.f32.mrf.mxu0  ;;  %v1766_v7 = vpop.f32.mrf.mxu1  ;;  %v5229_v24 = vsel %vm802_vm13, %v5224_v3, %v5226_v50 }
 0x27c   : > { %v5232_v37 = vsel %vm318_vm1, %v5229_v24, 0 }
 0x27d   : > { %v1690_v19 = vpop.f32.mrf.mxu0  ;;  %v1768_v36 = vpop.f32.mrf.mxu1  ;;  %5857 = vmatmul.mubr.msk.bf16.vlgmr.msra.gmra.mxu0 %vm314_vm7, %v7600_v13 }
 0x27e   : > { %5177 = vmatpush1.bf16.msra.mxu0 %v5157_v21  ;;  %v5228_v47 = vpop.permute.xlu0 %5227  ;;  %5194 = vmatprep.mubr.bf16.mxu0 %v8194_v35 }
 0x27f   : > { %v5230_v38 = vsel %vm802_vm13, %v5226_v50, %v5228_v47  ;;  %v1692_v41 = vpop.f32.mrf.mxu0  ;;  %v1769_v33 = vpop.f32.mrf.mxu1 }
 0x280   : > { %5862 = vmatprep.subr.msk.bf16.mxu1 %vm318_vm1, %v5230_v38 }
 0x281   : > { %v1694_v22 = vpop.f32.mrf.mxu0  ;;  %v1914_v29 = vpop.f32.mrf.mxu1  ;;  %5252 = vmatpush1.bf16.msra.mxu1 %v5232_v37 }
 0x282   : > { %v5283_v9 = vpop.permute.xlu0 %5282 }
 0x283   : > { %v5286_v60 = vsel %vm863_vm12, %v5281_v11, %v5283_v9  ;;  %v5287_v13 = vsel %vm863_vm12, %v5283_v9, %v5285_v32  ;;  %v1695_v14 = vpop.f32.mrf.mxu0  ;;  %v1916_v0 = vpop.f32.mrf.mxu1 }
 0x284   : > { %v5289_v25 = vsel %vm318_vm1, %v5286_v60, 0  ;;  %5864 = vmatprep.subr.msk.bf16.mxu0 %vm318_vm1, %v5287_v13  ;;  %5863 = vmatmul.mubr.msk.bf16.vlgmr.msra.gmra.mxu1 %vm314_vm7, %v7777_v55  ;;  %v5358_v11 = vpop.permute.xlu1 %5357  ;;  %v8210_v13 = vld [vmem:[#allocation12_spill] sm:$0xff] }
 0x285   : > { %v1839_v50 = vpop.f32.mrf.mxu0  ;;  %v1918_v2 = vpop.f32.mrf.mxu1  ;;  %5861 = vmatmul.mubr.msk.bf16.vlgmr.msra.gmra.mxu0 %vm314_vm7, %v7792_v54  ;;  %5401 = vmatprep.mubr.bf16.mxu1 %v8194_v35 }
 0x286   : > { %5309 = vmatpush1.bf16.msra.mxu0 %v5289_v25  ;;  %v5356_v12 = vpop.permute.xlu0 %5355  ;;  %5326 = vmatprep.mubr.bf16.mxu0 %v8194_v35 }
 0x287   : > { %v1841_v3 = vpop.f32.mrf.mxu0  ;;  %v1919_v58 = vpop.f32.mrf.mxu1  ;;  %v5361_v21 = vsel %vm948_vm14, %v5356_v12, %v5358_v11 }
 0x288   : > { %v5364_v54 = vsel %vm318_vm1, %v5361_v21, 0 }
 0x289   : > { %v1843_v24 = vpop.f32.mrf.mxu0  ;;  %v2046_v36 = vpop.f32.mrf.mxu1 }
 0x28a   : > { %v5360_v47 = vpop.permute.xlu0 %5359 }
 0x28b   : > { %v5362_v55 = vsel %vm948_vm14, %v5358_v11, %v5360_v47  ;;  %v1844_v38 = vpop.f32.mrf.mxu0  ;;  %v2048_v33 = vpop.f32.mrf.mxu1  ;;  %v8211_v11 = vld [vmem:[#allocation21_spill] sm:$0xff] }
 0x28c   : > { %v8012_v37 = vpop.permute.xlu1 %237  ;;  %5866 = vmatprep.subr.msk.bf16.mxu1 %vm318_vm1, %v5362_v55 }
 0x28d   : > { %v1697_v35 = vadd.f32 %v1690_v19, %v8012_v37  ;;  %v1971_v22 = vpop.f32.mrf.mxu0  ;;  %v2050_v32 = vpop.f32.mrf.mxu1  ;;  %5865 = vmatmul.mubr.msk.bf16.vlgmr.msra.gmra.mxu0 %vm314_vm7, %v7827_v51  ;;  %5384 = vmatpush1.bf16.msra.mxu1 %v5364_v54  ;;  %v1698_v9 = vadd.f32 %v1692_v41, %v8012_v37  ;;  %v366_v60 = vadd.f32 %v7178_v28, %v8012_v37  ;;  %v8212_v28 = vld [vmem:[#allocation22_spill] sm:$0xff] }
 0x28e   : > { %v367_v14 = vadd.f32 %v8210_v13, %v8012_v37  ;;  %v1067_v25 = vadd.f32 %v7869_v56, %v8012_v37  ;;  %v1068_v19 = vadd.f32 %v7880_v57, %v8012_v37 }
 0x28f   : > { %v1771_v2 = vadd.f32 %v7985_v1, %v1697_v35  ;;  %v1772_v12 = vadd.f32 %v1766_v7, %v1698_v9  ;;  %v1973_v58 = vpop.f32.mrf.mxu0  ;;  %v2051_v51 = vpop.f32.mrf.mxu1  ;;  %v444_v21 = vadd.f32 %v8211_v11, %v366_v60 }
 0x290   : > { %5867 = vmatmul.mubr.msk.bf16.vlgmr.msra.gmra.mxu1 %vm314_vm7, %v7810_v23  ;;  %v445_v41 = vadd.f32 %v8212_v28, %v367_v14  ;;  %v1141_v24 = vadd.f32 %v7910_v52, %v1067_v25  ;;  %v1142_v47 = vadd.f32 %v7916_v53, %v1068_v19 }
 0x291   : > { %v1846_v56 = vadd.f32 %v1839_v50, %v1771_v2  ;;  %v1847_v55 = vadd.f32 %v1841_v3, %v1772_v12  ;;  %v1975_v38 = vpop.f32.mrf.mxu0  ;;  %v2178_v57 = vpop.f32.mrf.mxu1  ;;  %v539_v1 = vadd.f32 %v7787_v34, %v444_v21 }
 0x292   : > { %v540_v7 = vadd.f32 %v7801_v17, %v445_v41  ;;  %v1216_v54 = vadd.f32 %v7897_v59, %v1141_v24  ;;  %v1217_v35 = vadd.f32 %v7904_v40, %v1142_v47 }
 0x293   : > { %v1921_v32 = vadd.f32 %v1914_v29, %v1846_v56  ;;  %v1922_v23 = vadd.f32 %v1916_v0, %v1847_v55  ;;  %v1976_v9 = vpop.f32.mrf.mxu0  ;;  %v2180_v60 = vpop.f32.mrf.mxu1  ;;  %v624_v52 = vadd.f32 %v7659_v16, %v539_v1 }
 0x294   : > { %v625_v53 = vadd.f32 %v7672_v10, %v540_v7  ;;  %v1291_v50 = vadd.f32 %v7929_v31, %v1216_v54  ;;  %v1292_v3 = vadd.f32 %v7938_v4, %v1217_v35 }
 0x295   : > { %v1978_v13 = vadd.f32 %v1971_v22, %v1921_v32  ;;  %v2121_v34 = vpop.f32.mrf.mxu0  ;;  %v2182_v14 = vpop.f32.mrf.mxu1  ;;  %v685_v17 = vadd.f32 %v7822_v6, %v624_v52  ;;  %v1979_v59 = vadd.f32 %v1973_v58, %v1922_v23 }
 0x296   : > { %v686_v40 = vadd.f32 %v7837_v43, %v625_v53  ;;  %v1348_v29 = vadd.f32 %v7919_v5, %v1291_v50  ;;  %v1349_v0 = vadd.f32 %v7926_v39, %v1292_v3 }
 0x297   : > { %v2123_v25 = vpop.f32.mrf.mxu0  ;;  %v2183_v16 = vpop.f32.mrf.mxu1  ;;  %v770_v10 = vadd.f32 %v7805_v49, %v685_v17  ;;  %v2053_v19 = vadd.f32 %v2046_v36, %v1978_v13  ;;  %v2054_v43 = vadd.f32 %v2048_v33, %v1979_v59 }
 0x298   : > { %v771_v31 = vadd.f32 %v7819_v45, %v686_v40  ;;  %v1423_v4 = vadd.f32 %v7953_v44, %v1348_v29  ;;  %v1424_v22 = vadd.f32 %v7959_v61, %v1349_v0 }
 0x299   : > { %v2125_v2 = vpop.f32.mrf.mxu0  ;;  %v2320_v6 = vpop.f32.mrf.mxu1  ;;  %v855_v12 = vadd.f32 %v7853_v62, %v770_v10  ;;  %v2129_v21 = vadd.f32 %v2123_v25, %v2054_v43 }
 0x29a   : > { %v856_v5 = vadd.f32 %v7864_v15, %v771_v31  ;;  %v1498_v39 = vadd.f32 %v7942_v30, %v1423_v4  ;;  %v1499_v58 = vadd.f32 %v7949_v63, %v1424_v22  ;;  %v2128_v15 = vadd.f32 %v2121_v34, %v2053_v19 }
 0x29b   : > { %v2126_v51 = vpop.f32.mrf.mxu0  ;;  %v2322_v49 = vpop.f32.mrf.mxu1  ;;  %v916_v45 = vadd.f32 %v7841_v20, %v855_v12  ;;  %v2327_v17 = vadd.f32 %v2320_v6, %v8012_v37 }
 0x29c   : > { %v917_v44 = vadd.f32 %v7850_v18, %v856_v5  ;;  %v1555_v61 = vadd.f32 %v7974_v42, %v1498_v39  ;;  %v1556_v36 = vadd.f32 %v7982_v46, %v1499_v58  ;;  %v2185_v47 = vadd.f32 %v2178_v57, %v2128_v15 }
 0x29d   : > { %v2253_v11 = vpop.f32.mrf.mxu0  ;;  %v2324_v62 = vpop.f32.mrf.mxu1  ;;  %v1001_v33 = vadd.f32 %v7885_v48, %v916_v45  ;;  %v2186_v46 = vadd.f32 %v2180_v60, %v2129_v21  ;;  %v6109_v48 = vmov 0.0   ;;  %v2328_v25 = vadd.f32 %v2322_v49, %v8012_v37 }
 0x29e   : > { %v1002_v30 = vadd.f32 %v7894_v8, %v917_v44  ;;  %v1630_v63 = vadd.f32 %v7962_v27, %v1555_v61  ;;  %v1631_v28 = vadd.f32 %v7969_v26, %v1556_v36  ;;  %v2260_v23 = vadd.f32 %v2253_v11, %v2185_v47 }
 0x29f   : > { %v2255_v20 = vpop.f32.mrf.mxu0  ;;  %v2325_v41 = vpop.f32.mrf.mxu1 }
 0x2a0   : > { %v1005_v18 = vcombine.low %v1001_v33, %v1002_v30  ;;  %v1634_v55 = vcombine.low %v1630_v63, %v1631_v28  ;;  %v2261_v7 = vadd.f32 %v2255_v20, %v2186_v46 }
 0x2a1   : > { %v2257_v24 = vpop.f32.mrf.mxu0  ;;  %v2469_v42 = vpop.f32.mrf.mxu1 }
 0x2a2   : > { %vm5420_vm15 = vcmp.gt.f32.partialorder %v1005_v18, 0.3  ;;  %v5440_v56 = vmul.f32 0.2, %v1005_v18  ;;  %v2264_v53 = vcombine.low %v2260_v23, %v2261_v7 }
 0x2a3   : > { %v5868_v38 = vsel %vm5420_vm15, 1.0, %v6109_v48  ;;  %v2258_v1 = vpop.f32.mrf.mxu0  ;;  %v2471_v8 = vpop.f32.mrf.mxu1 }
 0x2a4   : > { %v5424_v27 = vcombine.high %v5868_v38, %v5868_v38  ;;  %v5441_v54 = vsel %vm5420_vm15, 0.0, %v5440_v56 }
 0x2a5   : > { %v5443_v26 = vadd.f32 %v5441_v54, %v1634_v55  ;;  %v2394_v35 = vpop.f32.mrf.mxu0  ;;  %v2473_v32 = vpop.f32.mrf.mxu1 }
 0x2a6   : > { %v5869_v9 = vpack.c.bf16 %v5424_v27, %v5868_v38  ;;  %v2401_v16 = vadd.f32 %v2394_v35, %v2327_v17 }
 0x2a7   : > { %vm5444_vm0 = vcmp.gt.f32.partialorder %v5443_v26, 0.3  ;;  %v5465_v57 = vmul.f32 0.2, %v5443_v26  ;;  %v2396_v52 = vpop.f32.mrf.mxu0  ;;  %v2474_v60 = vpop.f32.mrf.mxu1 }
 0x2a8   : > { %5870 = vst.sshfl [vmem:[%s8064_s5] sm:$0x33 pattern:$0x76325410] %v5869_v9  ;;  %v5871_v50 = vsel %vm5444_vm0, 1.0, %v6109_v48  ;;  %v2402_v19 = vadd.f32 %v2396_v52, %v2328_v25  ;;  %v2476_v43 = vadd.f32 %v2469_v42, %v2401_v16 }
 0x2a9   : > { %v5448_v3 = vcombine.high %v5871_v50, %v5871_v50  ;;  %v5466_v13 = vsel %vm5444_vm0, 0.0, %v5465_v57  ;;  %v2398_v34 = vpop.f32.mrf.mxu0  ;;  %v2601_v14 = vpop.f32.mrf.mxu1 }
 0x2aa   : > { %v5468_v59 = vadd.f32 %v5466_v13, %v2264_v53  ;;  %v2477_v51 = vadd.f32 %v2471_v8, %v2402_v19 }
 0x2ab   : > { %v5872_v40 = vpack.c.bf16 %v5448_v3, %v5871_v50  ;;  %v2399_v29 = vpop.f32.mrf.mxu0  ;;  %v2603_v0 = vpop.f32.mrf.mxu1 }
 0x2ac   : > { %vm5469_vm1 = vcmp.gt.f32.partialorder %v5468_v59, 0.3  ;;  %v5490_v1 = vmul.f32 0.2, %v5468_v59 }
 0x2ad   : > { %5897 = vst.sshfl [vmem:[%s8064_s5 + $0x4] sm:$0x33 pattern:$0x76325410] %v5872_v40  ;;  %v5874_v10 = vsel %vm5469_vm1, 1.0, %v6109_v48  ;;  %v2544_v31 = vpop.f32.mrf.mxu0  ;;  %v2605_v4 = vpop.f32.mrf.mxu1 }
 0x2ae   : > { %v5473_v22 = vcombine.high %v5874_v10, %v5874_v10  ;;  %v2551_v58 = vadd.f32 %v2544_v31, %v2476_v43  ;;  %v5491_v23 = vsel %vm5469_vm1, 0.0, %v5490_v1 }
 0x2af   : > { %v2546_v2 = vpop.f32.mrf.mxu0  ;;  %v2606_v12 = vpop.f32.mrf.mxu1 }
 0x2b0   : > { %v5875_v6 = vpack.c.bf16 %v5473_v22, %v5874_v10  ;;  %v2552_v44 = vadd.f32 %v2546_v2, %v2477_v51  ;;  %v2608_v11 = vadd.f32 %v2601_v14, %v2551_v58 }
 0x2b1   : > { %v2548_v5 = vpop.f32.mrf.mxu0  ;;  %v2751_v39 = vpop.f32.mrf.mxu1 }
 0x2b2   : > { %5898 = vst.sshfl [vmem:[%s8064_s5 + $0x8] sm:$0x33 pattern:$0x76325410] %v5875_v6  ;;  %v2609_v21 = vadd.f32 %v2603_v0, %v2552_v44 }
 0x2b3   : > { %v2549_v49 = vpop.f32.mrf.mxu0  ;;  %v2753_v45 = vpop.f32.mrf.mxu1 }
 0x2b5   : > { %v2676_v61 = vpop.f32.mrf.mxu0  ;;  %v2755_v36 = vpop.f32.mrf.mxu1 }
 0x2b6   : > { %v2683_v15 = vadd.f32 %v2676_v61, %v2608_v11 }
 0x2b7   : > { %v2678_v62 = vpop.f32.mrf.mxu0  ;;  %v2756_v33 = vpop.f32.mrf.mxu1 }
 0x2b8   : > { %v2684_v28 = vadd.f32 %v2678_v62, %v2609_v21  ;;  %v2758_v18 = vadd.f32 %v2751_v39, %v2683_v15 }
 0x2b9   : > { %v2680_v30 = vpop.f32.mrf.mxu0  ;;  %v2883_v63 = vpop.f32.mrf.mxu1 }
 0x2ba   : > { %v2759_v46 = vadd.f32 %v2753_v45, %v2684_v28 }
 0x2bb   : > { %v2681_v20 = vpop.f32.mrf.mxu0  ;;  %v2885_v41 = vpop.f32.mrf.mxu1 }
 0x2bd   : > { %v2808_v24 = vpop.f32.mrf.mxu0  ;;  %v2887_v42 = vpop.f32.mrf.mxu1 }
 0x2be   : > { %v2815_v47 = vadd.f32 %v2808_v24, %v2758_v18 }
 0x2bf   : > { %v2810_v56 = vpop.f32.mrf.mxu0  ;;  %v2888_v55 = vpop.f32.mrf.mxu1 }
 0x2c0   : > { %v2816_v38 = vadd.f32 %v2810_v56, %v2759_v46  ;;  %v2890_v27 = vadd.f32 %v2883_v63, %v2815_v47 }
 0x2c1   : > { %v2812_v8 = vpop.f32.mrf.mxu0  ;;  %v3024_v7 = vpop.f32.mrf.mxu1 }
 0x2c2   : > { %v2891_v54 = vadd.f32 %v2885_v41, %v2816_v38 }
 0x2c3   : > { %v2813_v26 = vpop.f32.mrf.mxu0  ;;  %v3026_v35 = vpop.f32.mrf.mxu1 }
 0x2c4   : > { %v2894_v32 = vcombine.low %v2890_v27, %v2891_v54 }
 0x2c5   : > { %v2950_v9 = vpop.f32.mrf.mxu0  ;;  %v3028_v57 = vpop.f32.mrf.mxu1 }
 0x2c6   : > { %v8075_v52 = vadd.f32 %v5491_v23, %v2894_v32  ;;  %v2957_v16 = vadd.f32 %v2950_v9, %v8012_v37 }
 0x2c7   : > { %v2952_v60 = vpop.f32.mrf.mxu0  ;;  %v3029_v53 = vpop.f32.mrf.mxu1 }
 0x2c8   : > { %vm5494_vm2 = vcmp.gt.f32.partialorder %v8075_v52, 0.3  ;;  %v2958_v10 = vadd.f32 %v2952_v60, %v8012_v37  ;;  %v3031_v2 = vadd.f32 %v3024_v7, %v2957_v16  ;;  %v5515_v7 = vmul.f32 0.2, %v8075_v52 }
 0x2c9   : > { %v2954_v50 = vpop.f32.mrf.mxu0  ;;  %v3174_v3 = vpop.f32.mrf.mxu1  ;;  %v5877_v13 = vsel %vm5494_vm2, 1.0, %v6109_v48 }
 0x2ca   : > { %v5498_v34 = vcombine.high %v5877_v13, %v5877_v13  ;;  %v3032_v12 = vadd.f32 %v3026_v35, %v2958_v10  ;;  %v5516_v9 = vsel %vm5494_vm2, 0.0, %v5515_v7 }
 0x2cb   : > { %v2955_v14 = vpop.f32.mrf.mxu0  ;;  %v3176_v17 = vpop.f32.mrf.mxu1 }
 0x2cc   : > { %v5878_v59 = vpack.c.bf16 %v5498_v34, %v5877_v13 }
 0x2cd   : > { %v3099_v40 = vpop.f32.mrf.mxu0  ;;  %v3178_v29 = vpop.f32.mrf.mxu1 }
 0x2ce   : > { %5899 = vst.sshfl [vmem:[%s8064_s5 + $0xc] sm:$0x33 pattern:$0x76325410] %v5878_v59  ;;  %v3106_v5 = vadd.f32 %v3099_v40, %v3031_v2 }
 0x2cf   : > { %v3101_v0 = vpop.f32.mrf.mxu0  ;;  %v3179_v25 = vpop.f32.mrf.mxu1 }
 0x2d0   : > { %v3107_v39 = vadd.f32 %v3101_v0, %v3032_v12  ;;  %v3181_v44 = vadd.f32 %v3174_v3, %v3106_v5 }
 0x2d1   : > { %v3103_v31 = vpop.f32.mrf.mxu0  ;;  %v3306_v4 = vpop.f32.mrf.mxu1 }
 0x2d2   : > { %v3182_v61 = vadd.f32 %v3176_v17, %v3107_v39 }
 0x2d3   : > { %v3104_v22 = vpop.f32.mrf.mxu0  ;;  %v3308_v19 = vpop.f32.mrf.mxu1 }
 0x2d5   : > { %v3231_v6 = vpop.f32.mrf.mxu0  ;;  %v3310_v43 = vpop.f32.mrf.mxu1 }
 0x2d6   : > { %v3238_v62 = vadd.f32 %v3231_v6, %v3181_v44 }
 0x2d7   : > { %v3233_v58 = vpop.f32.mrf.mxu0  ;;  %v3311_v51 = vpop.f32.mrf.mxu1 }
 0x2d8   : > { %v3239_v33 = vadd.f32 %v3233_v58, %v3182_v61  ;;  %v3313_v28 = vadd.f32 %v3306_v4, %v3238_v62 }
 0x2d9   : > { %v3235_v49 = vpop.f32.mrf.mxu0  ;;  %v3438_v45 = vpop.f32.mrf.mxu1 }
 0x2da   : > { %v3314_v20 = vadd.f32 %v3308_v19, %v3239_v33 }
 0x2db   : > { %v3236_v36 = vpop.f32.mrf.mxu0  ;;  %v3440_v11 = vpop.f32.mrf.mxu1 }
 0x2dd   : > { %v3381_v15 = vpop.f32.mrf.mxu0  ;;  %v3442_v21 = vpop.f32.mrf.mxu1 }
 0x2de   : > { %v3388_v24 = vadd.f32 %v3381_v15, %v3313_v28 }
 0x2df   : > { %v3383_v30 = vpop.f32.mrf.mxu0  ;;  %v3443_v63 = vpop.f32.mrf.mxu1 }
 0x2e0   : > { %v3389_v42 = vadd.f32 %v3383_v30, %v3314_v20  ;;  %v3445_v38 = vadd.f32 %v3438_v45, %v3388_v24 }
 0x2e1   : > { %v3385_v41 = vpop.f32.mrf.mxu0  ;;  %v3580_v18 = vpop.f32.mrf.mxu1 }
 0x2e2   : > { %v3446_v1 = vadd.f32 %v3440_v11, %v3389_v42  ;;  %v3587_v29 = vadd.f32 %v3580_v18, %v8012_v37 }
 0x2e3   : > { %v3386_v47 = vpop.f32.mrf.mxu0  ;;  %v3582_v46 = vpop.f32.mrf.mxu1 }
 0x2e4   : > { %v3588_v16 = vadd.f32 %v3582_v46, %v8012_v37 }
 0x2e5   : > { %v3513_v56 = vpop.f32.mrf.mxu0  ;;  %v3584_v55 = vpop.f32.mrf.mxu1 }
 0x2e6   : > { %v3520_v54 = vadd.f32 %v3513_v56, %v3445_v38 }
 0x2e7   : > { %v3515_v8 = vpop.f32.mrf.mxu0  ;;  %v3585_v27 = vpop.f32.mrf.mxu1 }
 0x2e8   : > { %v3521_v26 = vadd.f32 %v3515_v8, %v3446_v1 }
 0x2e9   : > { %v3517_v35 = vpop.f32.mrf.mxu0  ;;  %v3729_v32 = vpop.f32.mrf.mxu1 }
 0x2ea   : > { %v3524_v23 = vcombine.low %v3520_v54, %v3521_v26 }
 0x2eb   : > { %v3518_v57 = vpop.f32.mrf.mxu0  ;;  %v3731_v60 = vpop.f32.mrf.mxu1 }
 0x2ec   : > { %v5518_v53 = vadd.f32 %v5516_v9, %v3524_v23 }
 0x2ed   : > { %v3654_v50 = vpop.f32.mrf.mxu0  ;;  %v3733_v3 = vpop.f32.mrf.mxu1 }
 0x2ee   : > { %vm5519_vm3 = vcmp.gt.f32.partialorder %v5518_v53, 0.3  ;;  %v3661_v10 = vadd.f32 %v3654_v50, %v3587_v29  ;;  %v5540_v55 = vmul.f32 0.2, %v5518_v53 }
 0x2ef   : > { %v5880_v13 = vsel %vm5519_vm3, 1.0, %v6109_v48  ;;  %v3656_v34 = vpop.f32.mrf.mxu0  ;;  %v3734_v14 = vpop.f32.mrf.mxu1 }
 0x2f0   : > { %v5523_v17 = vcombine.high %v5880_v13, %v5880_v13  ;;  %v3662_v22 = vadd.f32 %v3656_v34, %v3588_v16  ;;  %v3736_v12 = vadd.f32 %v3729_v32, %v3661_v10  ;;  %v5541_v35 = vsel %vm5519_vm3, 0.0, %v5540_v55 }
 0x2f1   : > { %v3658_v59 = vpop.f32.mrf.mxu0  ;;  %v3861_v40 = vpop.f32.mrf.mxu1 }
 0x2f2   : > { %v5881_v0 = vpack.c.bf16 %v5523_v17, %v5880_v13  ;;  %v3737_v39 = vadd.f32 %v3731_v60, %v3662_v22 }
 0x2f3   : > { %v3659_v52 = vpop.f32.mrf.mxu0  ;;  %v3863_v25 = vpop.f32.mrf.mxu1 }
 0x2f4   : > { %5900 = vst.sshfl [vmem:[%s8064_s5 + $0x10] sm:$0x33 pattern:$0x76325410] %v5881_v0 }
 0x2f5   : > { %v3804_v31 = vpop.f32.mrf.mxu0  ;;  %v3865_v4 = vpop.f32.mrf.mxu1 }
 0x2f6   : > { %v3811_v5 = vadd.f32 %v3804_v31, %v3736_v12 }
 0x2f7   : > { %v3806_v19 = vpop.f32.mrf.mxu0  ;;  %v3866_v2 = vpop.f32.mrf.mxu1 }
 0x2f8   : > { %v3812_v49 = vadd.f32 %v3806_v19, %v3737_v39  ;;  %v3868_v61 = vadd.f32 %v3861_v40, %v3811_v5 }
 0x2f9   : > { %v3808_v6 = vpop.f32.mrf.mxu0  ;;  %v4011_v43 = vpop.f32.mrf.mxu1 }
 0x2fa   : > { %v3869_v33 = vadd.f32 %v3863_v25, %v3812_v49 }
 0x2fb   : > { %v3809_v58 = vpop.f32.mrf.mxu0  ;;  %v4013_v51 = vpop.f32.mrf.mxu1 }
 0x2fd   : > { %v3936_v45 = vpop.f32.mrf.mxu0  ;;  %v4015_v44 = vpop.f32.mrf.mxu1 }
 0x2fe   : > { %v3943_v62 = vadd.f32 %v3936_v45, %v3868_v61 }
 0x2ff   : > { %v3938_v36 = vpop.f32.mrf.mxu0  ;;  %v4016_v11 = vpop.f32.mrf.mxu1 }
 0x300   : > { %v3944_v30 = vadd.f32 %v3938_v36, %v3869_v33  ;;  %v4018_v20 = vadd.f32 %v4011_v43, %v3943_v62 }
 0x301   : > { %v3940_v15 = vpop.f32.mrf.mxu0  ;;  %v4143_v21 = vpop.f32.mrf.mxu1 }
 0x302   : > { %v4019_v42 = vadd.f32 %v4013_v51, %v3944_v30 }
 0x303   : > { %v3941_v63 = vpop.f32.mrf.mxu0  ;;  %v4145_v28 = vpop.f32.mrf.mxu1 }
 0x305   : > { %v4068_v41 = vpop.f32.mrf.mxu0  ;;  %v4147_v18 = vpop.f32.mrf.mxu1 }
 0x306   : > { %v4075_v24 = vadd.f32 %v4068_v41, %v4018_v20 }
 0x307   : > { %v4070_v47 = vpop.f32.mrf.mxu0  ;;  %v4148_v46 = vpop.f32.mrf.mxu1 }
 0x308   : > { %v4076_v56 = vadd.f32 %v4070_v47, %v4019_v42  ;;  %v4150_v8 = vadd.f32 %v4143_v21, %v4075_v24 }
 0x309   : > { %v4072_v38 = vpop.f32.mrf.mxu0  ;;  %v4284_v1 = vpop.f32.mrf.mxu1 }
 0x30a   : > { %v4151_v7 = vadd.f32 %v4145_v28, %v4076_v56 }
 0x30b   : > { %v4073_v27 = vpop.f32.mrf.mxu0  ;;  %v4286_v54 = vpop.f32.mrf.mxu1 }
 0x30c   : > { %v4154_v26 = vcombine.low %v4150_v8, %v4151_v7 }
 0x30d   : > { %v4210_v32 = vpop.f32.mrf.mxu0  ;;  %v4288_v23 = vpop.f32.mrf.mxu1 }
 0x30e   : > { %v8093_v9 = vadd.f32 %v5541_v35, %v4154_v26  ;;  %v4217_v52 = vadd.f32 %v4210_v32, %v8012_v37 }
 0x30f   : > { %v4212_v57 = vpop.f32.mrf.mxu0  ;;  %v4289_v60 = vpop.f32.mrf.mxu1 }
 0x310   : > { %vm5544_vm4 = vcmp.gt.f32.partialorder %v8093_v9, 0.3  ;;  %v4218_v25 = vadd.f32 %v4212_v57, %v8012_v37  ;;  %v4291_v22 = vadd.f32 %v4284_v1, %v4217_v52  ;;  %v5565_v1 = vmul.f32 0.2, %v8093_v9 }
 0x311   : > { %v4214_v50 = vpop.f32.mrf.mxu0  ;;  %v4434_v3 = vpop.f32.mrf.mxu1  ;;  %v5883_v13 = vsel %vm5544_vm4, 1.0, %v6109_v48 }
 0x312   : > { %v5548_v34 = vcombine.high %v5883_v13, %v5883_v13  ;;  %v4292_v19 = vadd.f32 %v4286_v54, %v4218_v25  ;;  %v5566_v32 = vsel %vm5544_vm4, 0.0, %v5565_v1 }
 0x313   : > { %v4215_v14 = vpop.f32.mrf.mxu0  ;;  %v4436_v17 = vpop.f32.mrf.mxu1 }
 0x314   : > { %v5884_v53 = vpack.c.bf16 %v5548_v34, %v5883_v13 }
 0x315   : > { %v4359_v59 = vpop.f32.mrf.mxu0  ;;  %v4438_v40 = vpop.f32.mrf.mxu1 }
 0x316   : > { %5901 = vst.sshfl [vmem:[%s8064_s5 + $0x14] sm:$0x33 pattern:$0x76325410] %v5884_v53  ;;  %v4366_v6 = vadd.f32 %v4359_v59, %v4291_v22 }
 0x317   : > { %v4361_v29 = vpop.f32.mrf.mxu0  ;;  %v4439_v0 = vpop.f32.mrf.mxu1 }
 0x318   : > { %v4367_v43 = vadd.f32 %v4361_v29, %v4292_v19  ;;  %v4441_v49 = vadd.f32 %v4434_v3, %v4366_v6 }
 0x319   : > { %v4363_v16 = vpop.f32.mrf.mxu0  ;;  %v4566_v10 = vpop.f32.mrf.mxu1 }
 0x31a   : > { %v4442_v45 = vadd.f32 %v4436_v17, %v4367_v43 }
 0x31b   : > { %v4364_v31 = vpop.f32.mrf.mxu0  ;;  %v4568_v4 = vpop.f32.mrf.mxu1 }
 0x31d   : > { %v4491_v2 = vpop.f32.mrf.mxu0  ;;  %v4570_v12 = vpop.f32.mrf.mxu1 }
 0x31e   : > { %v4498_v36 = vadd.f32 %v4491_v2, %v4441_v49 }
 0x31f   : > { %v4493_v5 = vpop.f32.mrf.mxu0  ;;  %v4571_v39 = vpop.f32.mrf.mxu1 }
 0x320   : > { %v4499_v11 = vadd.f32 %v4493_v5, %v4442_v45  ;;  %v4573_v30 = vadd.f32 %v4566_v10, %v4498_v36 }
 0x321   : > { %v4495_v58 = vpop.f32.mrf.mxu0  ;;  %v4698_v51 = vpop.f32.mrf.mxu1 }
 0x322   : > { %v4574_v63 = vadd.f32 %v4568_v4, %v4499_v11 }
 0x323   : > { %v4496_v44 = vpop.f32.mrf.mxu0  ;;  %v4700_v61 = vpop.f32.mrf.mxu1 }
 0x325   : > { %v4641_v62 = vpop.f32.mrf.mxu0  ;;  %v4702_v33 = vpop.f32.mrf.mxu1 }
 0x326   : > { %v4648_v41 = vadd.f32 %v4641_v62, %v4573_v30 }
 0x327   : > { %v4643_v15 = vpop.f32.mrf.mxu0  ;;  %v4703_v21 = vpop.f32.mrf.mxu1 }
 0x328   : > { %v4649_v18 = vadd.f32 %v4643_v15, %v4574_v63  ;;  %v4705_v56 = vadd.f32 %v4698_v51, %v4648_v41 }
 0x329   : > { %v4645_v28 = vpop.f32.mrf.mxu0  ;;  %v4840_v20 = vpop.f32.mrf.mxu1 }
 0x32a   : > { %v4706_v55 = vadd.f32 %v4700_v61, %v4649_v18  ;;  %v4847_v9 = vadd.f32 %v4840_v20, %v8012_v37 }
 0x32b   : > { %v4646_v24 = vpop.f32.mrf.mxu0  ;;  %v4842_v42 = vpop.f32.mrf.mxu1 }
 0x32c   : > { %v4848_v52 = vadd.f32 %v4842_v42, %v8012_v37 }
 0x32d   : > { %v4773_v47 = vpop.f32.mrf.mxu0  ;;  %v4844_v46 = vpop.f32.mrf.mxu1 }
 0x32e   : > { %v4780_v7 = vadd.f32 %v4773_v47, %v4705_v56 }
 0x32f   : > { %v4775_v38 = vpop.f32.mrf.mxu0  ;;  %v4845_v8 = vpop.f32.mrf.mxu1 }
 0x330   : > { %v4781_v27 = vadd.f32 %v4775_v38, %v4706_v55 }
 0x331   : > { %v4777_v54 = vpop.f32.mrf.mxu0  ;;  %v4989_v26 = vpop.f32.mrf.mxu1 }
 0x332   : > { %v4784_v35 = vcombine.low %v4780_v7, %v4781_v27 }
 0x333   : > { %v4778_v23 = vpop.f32.mrf.mxu0  ;;  %v4991_v57 = vpop.f32.mrf.mxu1 }
 0x334   : > { %v5568_v60 = vadd.f32 %v5566_v32, %v4784_v35 }
 0x335   : > { %v4914_v50 = vpop.f32.mrf.mxu0  ;;  %v4993_v3 = vpop.f32.mrf.mxu1 }
 0x336   : > { %vm5569_vm5 = vcmp.gt.f32.partialorder %v5568_v60, 0.3  ;;  %v4921_v10 = vadd.f32 %v4914_v50, %v4847_v9  ;;  %v5590_v24 = vmul.f32 0.2, %v5568_v60 }
 0x337   : > { %v4916_v13 = vpop.f32.mrf.mxu0  ;;  %v4994_v34 = vpop.f32.mrf.mxu1  ;;  %v5886_v14 = vsel %vm5569_vm5, 1.0, %v6109_v48 }
 0x338   : > { %v5573_v17 = vcombine.high %v5886_v14, %v5886_v14  ;;  %v4922_v31 = vadd.f32 %v4916_v13, %v4848_v52  ;;  %v4996_v2 = vadd.f32 %v4989_v26, %v4921_v10  ;;  %v5591_v1 = vsel %vm5569_vm5, 0.0, %v5590_v24 }
 0x339   : > { %v4918_v53 = vpop.f32.mrf.mxu0  ;;  %v5121_v59 = vpop.f32.mrf.mxu1 }
 0x33a   : > { %v5887_v40 = vpack.c.bf16 %v5573_v17, %v5886_v14  ;;  %v4997_v12 = vadd.f32 %v4991_v57, %v4922_v31 }
 0x33b   : > { %v4919_v29 = vpop.f32.mrf.mxu0  ;;  %v5123_v0 = vpop.f32.mrf.mxu1 }
 0x33c   : > { %5902 = vst.sshfl [vmem:[%s8064_s5 + $0x18] sm:$0x33 pattern:$0x76325410] %v5887_v40 }
 0x33d   : > { %v5064_v25 = vpop.f32.mrf.mxu0  ;;  %v5125_v16 = vpop.f32.mrf.mxu1 }
 0x33e   : > { %v5071_v5 = vadd.f32 %v5064_v25, %v4996_v2 }
 0x33f   : > { %v5066_v4 = vpop.f32.mrf.mxu0  ;;  %v5126_v22 = vpop.f32.mrf.mxu1 }
 0x340   : > { %v5072_v39 = vadd.f32 %v5066_v4, %v4997_v12  ;;  %v5128_v44 = vadd.f32 %v5121_v59, %v5071_v5 }
 0x341   : > { %v5068_v19 = vpop.f32.mrf.mxu0 }
 0x342   : > { %v5129_v61 = vadd.f32 %v5123_v0, %v5072_v39 }
 0x343   : > { %v5069_v6 = vpop.f32.mrf.mxu0 }
 0x344   : > { %v5271_v43 = vpop.f32.mrf.mxu1 }
 0x345   : > { %v5196_v58 = vpop.f32.mrf.mxu0 }
 0x346   : > { %v5273_v51 = vpop.f32.mrf.mxu1  ;;  %v5203_v11 = vadd.f32 %v5196_v58, %v5128_v44 }
 0x347   : > { %v5198_v49 = vpop.f32.mrf.mxu0 }
 0x348   : > { %v5275_v45 = vpop.f32.mrf.mxu1  ;;  %v5204_v62 = vadd.f32 %v5198_v49, %v5129_v61  ;;  %v5278_v21 = vadd.f32 %v5271_v43, %v5203_v11 }
 0x349   : > { %v5200_v37 = vpop.f32.mrf.mxu0 }
 0x34a   : > { %v5276_v36 = vpop.f32.mrf.mxu1  ;;  %v5279_v30 = vadd.f32 %v5273_v51, %v5204_v62 }
 0x34b   : > { %v5201_v33 = vpop.f32.mrf.mxu0 }
 0x34d   : > { %v5328_v15 = vpop.f32.mrf.mxu0 }
 0x34e   : > { %v5335_v20 = vadd.f32 %v5328_v15, %v5278_v21 }
 0x34f   : > { %v5330_v63 = vpop.f32.mrf.mxu0 }
 0x350   : > { %v5403_v28 = vpop.f32.mrf.mxu1  ;;  %v5336_v41 = vadd.f32 %v5330_v63, %v5279_v30 }
 0x351   : > { %v5332_v18 = vpop.f32.mrf.mxu0  ;;  %v5410_v47 = vadd.f32 %v5403_v28, %v5335_v20 }
 0x352   : > { %v5405_v42 = vpop.f32.mrf.mxu1 }
 0x353   : > { %v5411_v46 = vadd.f32 %v5405_v42, %v5336_v41  ;;  %v5333_v56 = vpop.f32.mrf.mxu0 }
 0x354   : > { %v5407_v55 = vpop.f32.mrf.mxu1 }
 0x355   : > { %v5414_v38 = vcombine.low %v5410_v47, %v5411_v46 }
 0x356   : > { %v5408_v8 = vpop.f32.mrf.mxu1 }
 0x357   : > { %v5593_v7 = vadd.f32 %v5591_v1, %v5414_v38 }
 0x359   : > { %vm5594_vm6 = vcmp.gt.f32.partialorder %v5593_v7, 0.3 }
 0x35a   : > { %v5889_v27 = vsel %vm5594_vm6, 1.0, %v6109_v48 }
 0x35b   : > { %v5598_v54 = vcombine.high %v5889_v27, %v5889_v27 }
 0x35d   : > { %v5890_v26 = vpack.c.bf16 %v5598_v54, %v5889_v27 }
 0x35f   : > { %5903 = vst.sshfl [vmem:[%s8064_s5 + $0x1c] sm:$0x33 pattern:$0x76325410] %v5890_v26 }
 0x360   : > { %6037 = shalt.err (!%p6034_p10)
}
 0x361   : > { %s6038_s29 = scalar_lea.hbm %s8117_s8, 512  ;;  %s6042_s20 = scalar_lea.hbm %s8167_s4, 1024 }
 0x362   : > { %p6039_p0 = scmp.ne.s32.totalorder %s8117_s8, %s6038_s29  ;;  %p6043_p1 = scmp.lt.s32.totalorder %s8117_s8, %s8167_s4 }
 0x363   : > { %p6044_p3 = scmp.lt.s32.totalorder %s6042_s20, %s6038_s29 }
 0x364   : > { %p6040_p2 = pnand %p6039_p0, %p8213_p12 }
 0x365   : > { %p6045_p6 = por %p6044_p3, %p6043_p1 }
 0x366   : > { %p6041_p9 = pneg %p6040_p2 }
 0x368   : > { %p6046_p11 = pnand %p6045_p6, %p6041_p9 }
 0x36a   : > { %6049 = shalt.err (!%p6046_p11)
}
 0x36b   : > { %s6111_s5 = smov 64   ;;  %s6112_s14 = smov 4  }
 0x36c   : > { %5910 = dma.vmem_to_hbm [thread:$0]  (%p8213_p12), %s8119_s7, 512, %s8117_s8, %s5616_s13, %s6111_s5, %s6111_s5, %s6112_s14  }
 0x36d PF: > { %s5644_s11 = sand.u32 1, %s6076_s15   ;;  %p8214_p13 = scmp.ne.s32.totalorder %s8179_s27, 0 }
 0x36e   : > { %p8215_p4 = scmp.ge.s32.totalorder %s6088_s18, 2  ;;  %s5645_s6 = scalar_lea.sflag [#allocation5], %s5644_s11 }
 0x370   : > { %p5917_p5 = pnand %p8215_p4, %p8214_p13 }
 0x372   : > { %p5918_p7 = pneg %p5917_p5 }
 0x374   : > { %6071 = dma.done.wait (%p5918_p7), %s5645_s6, 512  }
 0x375   : > { %6073 = vsyncadd (%p5918_p7), %s5645_s6, 4294966784  ;;  %p17_p8 = scmp.ge.s32.totalorder %s6163_s21, 4   ;;  %s8216_s15 = smov %s6080_s16 }
 0x376   : > { %s8217_s16 = smov %s6084_s17  ;;  %s8218_s17 = smov %s6175_s24 }
 0x377   : > { %s8219_s18 = smov %s6163_s21  ;;  %19 = sbr.rel (!%p17_p8) target bundleno = 5 (0x5), region = 110 }
 0x37c   :  { %5650 = vsyncpa [#allocation4], 1 }
 0x37d   :  { %5652 = vsyncpa [#allocation4 + $0x1], 1 }
 0x37e   :  { %5653 = vsyncpa [#allocation5], 1 }
 0x37f   :  { %5655 = vsyncpa [#allocation5 + $0x1], 1 }

</bundles_post_ra>
